<compile_context>
chip_gen: v7x
topology: tpu7x:2x2x1
jax: 0.10.0
libtpu: 0.0.40
codegen_flags: <defaults>
</compile_context>

<pallas_src>
import math

import jax
import jax.numpy as jnp
import numpy as np
from jax.experimental import pallas as pl
from jax.experimental.pallas import tpu as pltpu

# ---- module-consistent shapes ----
L = 8          # obs_len (max_len of PositionalEncoding)
H = 32         # hid_dim
N_HEADS = 4    # heads of the injected transformer encoder
HD = H // N_HEADS
FF = 64        # positionwise feed-forward dim of the injected encoder
EPS = 1e-5     # torch LayerNorm default eps
LANES = 128    # lane width of the packed parameter slab

TB = 8                   # sequences processed per grid step
ROWS_PER_STEP = TB * L   # 64 activation rows per grid step

# -------------------- packed-slab row layout (all 8-aligned blocks) ----------
ROW_EMB_W = 0                         # (1, H)       w_emb * sqrt(H)
ROW_BQKV  = 1                         # (1, 3H)      [bq | bk | bv], lanes 96:128 zero
ROW_BO    = 2                         # (1, H)
ROW_LN1_G = 3                         # (1, H)
ROW_LN1_B = 4                         # (1, H)
ROW_B1    = 5                         # (1, FF)      lanes 64:128 zero
ROW_B2    = 6                         # (1, H)
ROW_LN2_G = 7                         # (1, H)
ROW_LN2_B = 8                         # (1, H)
ROW_WFC   = 9                         # (1, H)       fc weight as a row (lane reduce)
ROW_BFC   = 10                        # (1, 1)       fc bias scalar at lane 0
ROW_EMB_B = 16                        # (TB*L, H)    (b_emb*sqrt(H) + pe) replicated TB times
ROW_WQKV  = ROW_EMB_B + ROWS_PER_STEP       # 80   (H, 128)  [Wq | Wk | Wv | 0]
ROW_WO    = ROW_WQKV + H                    # 112  (H, H)
ROW_W1    = ROW_WO + H                      # 144  (H, 128)  [W1 | 0]
ROW_W2    = ROW_W1 + H                      # 176  (128, H)  rows FF:128 zero
TOTAL_ROWS = ROW_W2 + LANES                 # 304  (multiple of 8)


# -------------------- Pallas kernel --------------------
def _layer_norm(a, g, b):
    # a: (rows, H); g, b: (1, H)
    mean = jnp.mean(a, axis=-1, keepdims=True)
    var = jnp.mean((a - mean) ** 2, axis=-1, keepdims=True)
    return (a - mean) * jax.lax.rsqrt(var + EPS) * g + b


def mob_transformer_kernel(x_ref, p_ref, out_ref):
    x = x_ref[...]                                   # (TB*L, 1) float32
    rows = x.shape[0]                                # TB*L (static)

    def row(r, n=LANES):
        return p_ref[r:r + 1, 0:n]                   # (1, n)

    # -- input embedding: Linear(1, H)*sqrt(H) + pos-enc, all pre-folded/replicated --
    w_emb = row(ROW_EMB_W, H)                                  # (1, H)
    emb_b = p_ref[ROW_EMB_B:ROW_EMB_B + ROWS_PER_STEP, 0:H]    # (TB*L, H)
    src = x * w_emb + emb_b                                    # (TB*L, H) pure VPU

    # -------- single-layer transformer encoder (self-attn + FFN, post-LN) ----
    # fused QKV: one (TB*L, H) x (H, 128) matmul (lanes 96:128 are zero padding)
    wqkv = p_ref[ROW_WQKV:ROW_WQKV + H, :]           # (H, 128)
    bqkv = row(ROW_BQKV)                             # (1, 128)
    qkv = jnp.dot(src, wqkv, preferred_element_type=jnp.float32) + bqkv
    qkv3 = qkv.reshape(TB, L, LANES)                 # (TB, L, 128)

    # K transposed ONCE for the whole tile; per-head slices below are 8-aligned
    kT = jnp.swapaxes(qkv3[:, :, H:2 * H], 1, 2)     # (TB, H, L)

    # merged-head batch axis: (N_HEADS*TB, L, HD) — softmax reductions run once
    q_h = jnp.concatenate(
        [qkv3[:, :, h * HD:(h + 1) * HD] for h in range(N_HEADS)], axis=0)
    kT_h = jnp.concatenate(
        [kT[:, h * HD:(h + 1) * HD, :] for h in range(N_HEADS)], axis=0)
    v_h = jnp.concatenate(
        [qkv3[:, :, 2 * H + h * HD:2 * H + (h + 1) * HD] for h in range(N_HEADS)],
        axis=0)

    inv = jnp.float32(1.0 / math.sqrt(HD))
    energy = jnp.einsum("bqd,bdk->bqk", q_h, kT_h,
                        preferred_element_type=jnp.float32) * inv   # (NH*TB, L, L)
    energy = energy - jnp.max(energy, axis=-1, keepdims=True)
    pexp = jnp.exp(energy)
    attn = pexp * pl.reciprocal(jnp.sum(pexp, axis=-1, keepdims=True), approx=True)
    heads = jnp.einsum("bqk,bkd->bqd", attn, v_h,
                       preferred_element_type=jnp.float32)          # (NH*TB, L, HD)

    # re-concatenate heads along lanes (8-aligned) -> ONE output projection matmul
    concat = jnp.concatenate(
        [heads[h * TB:(h + 1) * TB] for h in range(N_HEADS)], axis=-1)   # (TB, L, H)
    wo = p_ref[ROW_WO:ROW_WO + H, 0:H]               # (H, H)
    attn_out = (jnp.dot(concat.reshape(rows, H), wo,
                        preferred_element_type=jnp.float32)
                + row(ROW_BO, H))                    # (TB*L, H)

    src1 = _layer_norm(src + attn_out, row(ROW_LN1_G, H), row(ROW_LN1_B, H))

    # FFN: w1 lane-padded to 128 output lanes, w2 row-padded to 128 (zeros)
    w1 = p_ref[ROW_W1:ROW_W1 + H, :]                 # (H, 128)
    b1 = row(ROW_B1)                                 # (1, 128)
    w2 = p_ref[ROW_W2:ROW_W2 + LANES, 0:H]           # (128, H)
    b2 = row(ROW_B2, H)                              # (1, H)
    ff = jnp.maximum(jnp.dot(src1, w1, preferred_element_type=jnp.float32) + b1, 0.0)
    ff = jnp.dot(ff, w2, preferred_element_type=jnp.float32) + b2
    src2 = _layer_norm(src1 + ff, row(ROW_LN2_G, H), row(ROW_LN2_B, H))

    # -- score = relu(fc(row)) for ALL rows (no sublane gather of the last token);
    #    lane-dense unmasked store; useful rows/lane picked outside the kernel.
    wfc = row(ROW_WFC, H)                            # (1, H)
    bfc = row(ROW_BFC, 1)                            # (1, 1)
    score = jnp.sum(src2 * wfc, axis=-1, keepdims=True) + bfc   # (TB*L, 1)
    out_ref[...] = jnp.broadcast_to(jnp.maximum(score, 0.0), (rows, LANES))


# -------------------- wrapper --------------------
def mob_transformer_forward(x, param_slab):
    """x: (n_seq, L) float32, param_slab: (TOTAL_ROWS, 128) float32 -> (n_seq, 1)."""
    n, l = x.shape
    assert l == L and n % TB == 0, "n_seq must be a multiple of TB"
    x_flat = x.astype(jnp.float32).reshape(n * L, 1)
    n_steps = n // TB

    flops = int(n * (
        2 * L * H                            # embedding
        + 2 * L * H * LANES                  # fused QKV matmul
        + N_HEADS * 2 * (2 * L * L * HD)     # energy + attn@V
        + 2 * L * H * H                      # output projection
        + 2 * L * H * LANES                  # FFN matmul 1
        + 2 * L * LANES * H                  # FFN matmul 2
        + 2 * L * H))                        # fc lane reduce
    transcendentals = int(n * (N_HEADS * L * L + 2 * L))
    bytes_accessed = int(x_flat.size * 4 + TOTAL_ROWS * LANES * 4
                         + n * L * LANES * 4)

    out = pl.pallas_call(
        mob_transformer_kernel,
        out_shape=jax.ShapeDtypeStruct((n * L, LANES), jnp.float32),
        grid_spec=pltpu.PrefetchScalarGridSpec(
            num_scalar_prefetch=0,
            grid=(n_steps,),
            in_specs=[
                pl.BlockSpec((ROWS_PER_STEP, 1), lambda i: (i, 0)),
                # constant index_map -> slab DMA'd once, kept resident
                pl.BlockSpec((TOTAL_ROWS, LANES), lambda i: (0, 0)),
            ],
            out_specs=pl.BlockSpec((ROWS_PER_STEP, LANES), lambda i: (i, 0)),
        ),
        compiler_params=pltpu.CompilerParams(dimension_semantics=("parallel",)),
        cost_estimate=pl.CostEstimate(flops=flops,
                                      transcendentals=transcendentals,
                                      bytes_accessed=bytes_accessed),
    )(x_flat, param_slab)
    # pick the last-token row of every sequence and lane 0 outside the kernel
    return out.reshape(n, L, LANES)[:, L - 1, :1]    # (n_seq, 1)


# -------------------- host-side parameter packing --------------------
def pack_params(p):
    """Pack all MobTransformer parameters into one (TOTAL_ROWS, 128) f32 slab."""
    slab = np.zeros((TOTAL_ROWS, LANES), np.float32)
    scale = math.sqrt(H)
    slab[ROW_EMB_W, :H] = np.asarray(p["w_emb"])[0] * scale
    emb_b = np.asarray(p["pe"]) + np.asarray(p["b_emb"])[0] * scale      # (L, H)
    slab[ROW_EMB_B:ROW_EMB_B + ROWS_PER_STEP, :H] = np.tile(emb_b, (TB, 1))
    slab[ROW_WQKV:ROW_WQKV + H, 0:H] = np.asarray(p["wq"])
    slab[ROW_WQKV:ROW_WQKV + H, H:2 * H] = np.asarray(p["wk"])
    slab[ROW_WQKV:ROW_WQKV + H, 2 * H:3 * H] = np.asarray(p["wv"])
    slab[ROW_BQKV, 0:H] = np.asarray(p["bq"])[0]
    slab[ROW_BQKV, H:2 * H] = np.asarray(p["bk"])[0]
    slab[ROW_BQKV, 2 * H:3 * H] = np.asarray(p["bv"])[0]
    slab[ROW_WO:ROW_WO + H, :H] = np.asarray(p["wo"])
    slab[ROW_BO, :H] = np.asarray(p["bo"])[0]
    slab[ROW_LN1_G, :H] = np.asarray(p["ln1_g"])[0]
    slab[ROW_LN1_B, :H] = np.asarray(p["ln1_b"])[0]
    slab[ROW_W1:ROW_W1 + H, :FF] = np.asarray(p["w1"])
    slab[ROW_B1, :FF] = np.asarray(p["b1"])[0]
    slab[ROW_W2:ROW_W2 + FF, :H] = np.asarray(p["w2"])
    slab[ROW_B2, :H] = np.asarray(p["b2"])[0]
    slab[ROW_LN2_G, :H] = np.asarray(p["ln2_g"])[0]
    slab[ROW_LN2_B, :H] = np.asarray(p["ln2_b"])[0]
    slab[ROW_WFC, :H] = np.asarray(p["w_fc"])[:, 0]
    slab[ROW_BFC, 0] = np.asarray(p["b_fc"])[0, 0]
    return jnp.asarray(slab)


# -------------------- deterministic parameter init --------------------
def positional_encoding(max_len, d_model):
    position = np.arange(max_len, dtype=np.float32)[:, None]
    div_term = np.exp(np.arange(0, d_model, 2, dtype=np.float32)
                      * (-math.log(10000.0) / d_model))
    pe = np.zeros((max_len, d_model), dtype=np.float32)
    pe[:, 0::2] = np.sin(position * div_term)
    pe[:, 1::2] = np.cos(position * div_term)
    return jnp.asarray(pe)


def _dense(key, din, dout):
    bound = 1.0 / math.sqrt(din)
    kw, kb = jax.random.split(key)
    w = jax.random.uniform(kw, (din, dout), jnp.float32, -bound, bound)
    b = jax.random.uniform(kb, (1, dout), jnp.float32, -bound, bound)
    return w, b


def make_params(key):
    ks = jax.random.split(key, 8)
    w_emb, b_emb = _dense(ks[0], 1, H)
    wq, bq = _dense(ks[1], H, H)
    wk, bk = _dense(ks[2], H, H)
    wv, bv = _dense(ks[3], H, H)
    wo, bo = _dense(ks[4], H, H)
    w1, b1 = _dense(ks[5], H, FF)
    w2, b2 = _dense(ks[6], FF, H)
    w_fc, b_fc = _dense(ks[7], H, 1)
    return dict(
        pe=positional_encoding(L, H),
        w_emb=w_emb, b_emb=b_emb,
        wq=wq, bq=bq, wk=wk, bk=bk, wv=wv, bv=bv, wo=wo, bo=bo,
        ln1_g=jnp.ones((1, H), jnp.float32), ln1_b=jnp.zeros((1, H), jnp.float32),
        w1=w1, b1=b1, w2=w2, b2=b2,
        ln2_g=jnp.ones((1, H), jnp.float32), ln2_b=jnp.zeros((1, H), jnp.float32),
        w_fc=w_fc, b_fc=b_fc,
    )


# -------------------- pure-JAX reference (sanity check) --------------------
def reference_forward(x, p):
    def lin(a, w, b):
        return jnp.einsum("bld,dh->blh", a, w) + b[None, :, :]

    def ln(a, g, b):
        m = a.mean(-1, keepdims=True)
        v = ((a - m) ** 2).mean(-1, keepdims=True)
        return (a - m) / jnp.sqrt(v + EPS) * g[None, :, :] + b[None, :, :]

    src = x[:, :, None] * p["w_emb"][None, :, :] + p["b_emb"][None, :, :]
    src = src * math.sqrt(H)
    src = src + p["pe"][None, :, :]
    q, k, v = (lin(src, p["wq"], p["bq"]),
               lin(src, p["wk"], p["bk"]),
               lin(src, p["wv"], p["bv"]))
    hd = H // N_HEADS
    heads = []
    for h in range(N_HEADS):
        sl = slice(h * hd, (h + 1) * hd)
        e = jnp.einsum("bqd,bkd->bqk", q[:, :, sl], k[:, :, sl]) / math.sqrt(hd)
        a = jax.nn.softmax(e, axis=-1)
        heads.append(jnp.einsum("bqk,bkd->bqd", a, v[:, :, sl]))
    ao = lin(jnp.concatenate(heads, -1), p["wo"], p["bo"])
    s1 = ln(src + ao, p["ln1_g"], p["ln1_b"])
    f = jax.nn.relu(lin(s1, p["w1"], p["b1"]))
    f = lin(f, p["w2"], p["b2"])
    s2 = ln(s1 + f, p["ln2_g"], p["ln2_b"])
    score = s2[:, -1, :] @ p["w_fc"] + p["b_fc"]
    return jax.nn.relu(score)


if __name__ == "__main__":
    key = jax.random.PRNGKey(0)
    kx, kp = jax.random.split(key)
    N_SEQ = 16                                       # 2 grid steps of TB=8 sequences
    x = jax.random.uniform(kx, (N_SEQ, L), jnp.float32)   # mobility sequences
    params = make_params(kp)
    slab = pack_params(params)

    out = mob_transformer_forward(x, slab)
    jax.block_until_ready(out)

    ref = reference_forward(x, params)
    assert out.shape == (N_SEQ, 1)
    # tolerance slightly relaxed: softmax normalization uses the EUP
    # approximate reciprocal (pl.reciprocal(approx=True)).
    np.testing.assert_allclose(np.asarray(out), np.asarray(ref),
                               rtol=5e-3, atol=5e-3)
    print("KERNEL_OK")
</pallas_src>

<mosaic_0001>
module attributes {stable_mosaic.version = 11 : i64} {
  func.func @mob_transformer_kernel(%arg0: i32, %arg1: memref<64x1xf32, #tpu.memory_space<vmem>>, %arg2: memref<304x128xf32, #tpu.memory_space<vmem>>, %arg3: memref<64x128xf32, #tpu.memory_space<vmem>>) attributes {dimension_semantics = [#tpu.dimension_semantics<parallel>], iteration_bounds = array<i64: 2>, scalar_prefetch = 0 : i64, scratch_operands = 0 : i64, tpu.core_type = #tpu.core_type<tc>, window_params = [{transform_indices = @transform_0, window_bounds = array<i64: 64, 1>}, {pipeline_mode = #tpu.pipeline_mode<synchronous>, transform_indices = @transform_1, window_bounds = array<i64: 304, 128>}, {transform_indices = @transform_2, window_bounds = array<i64: 64, 128>}]} {
    %c0 = arith.constant 0 : index
    %c0_0 = arith.constant 0 : index
    %0 = vector.load %arg1[%c0, %c0_0] : memref<64x1xf32, #tpu.memory_space<vmem>>, vector<64x1xf32>
    %c0_1 = arith.constant 0 : index
    %c0_2 = arith.constant 0 : index
    %1 = vector.load %arg2[%c0_1, %c0_2] : memref<304x128xf32, #tpu.memory_space<vmem>>, vector<1x32xf32>
    %c16 = arith.constant 16 : index
    %c0_3 = arith.constant 0 : index
    %2 = vector.load %arg2[%c16, %c0_3] : memref<304x128xf32, #tpu.memory_space<vmem>>, vector<64x32xf32>
    %3 = vector.broadcast %0 : vector<64x1xf32> to vector<64x32xf32>
    %4 = vector.broadcast %1 : vector<1x32xf32> to vector<64x32xf32>
    %5 = arith.mulf %3, %4 : vector<64x32xf32>
    %6 = arith.addf %5, %2 : vector<64x32xf32>
    %c80 = arith.constant 80 : index
    %c0_4 = arith.constant 0 : index
    %7 = vector.load %arg2[%c80, %c0_4] : memref<304x128xf32, #tpu.memory_space<vmem>>, vector<32x128xf32>
    %c1 = arith.constant 1 : index
    %c0_5 = arith.constant 0 : index
    %8 = vector.load %arg2[%c1, %c0_5] : memref<304x128xf32, #tpu.memory_space<vmem>>, vector<1x128xf32>
    %cst = arith.constant dense<0.000000e+00> : vector<64x128xf32>
    %9 = tpu.matmul %6, %7, %cst {dimension_numbers = #tpu.dot_dimension_numbers<[1], [0], [0], [1], [0, 0, 1, 1], [], []>} : vector<64x32xf32>, vector<32x128xf32>, vector<64x128xf32> -> vector<64x128xf32>
    %10 = vector.broadcast %8 : vector<1x128xf32> to vector<64x128xf32>
    %11 = arith.addf %9, %10 : vector<64x128xf32>
    %12 = vector.shape_cast %11 : vector<64x128xf32> to vector<8x8x128xf32>
    %13 = vector.extract_strided_slice %12 {offsets = [0, 0, 32], sizes = [8, 8, 32], strides = [1, 1, 1]} : vector<8x8x128xf32> to vector<8x8x32xf32>
    %14 = tpu.transpose %13, [0, 2, 1] : vector<8x8x32xf32> -> vector<8x32x8xf32>
    %15 = vector.extract_strided_slice %12 {offsets = [0, 0, 0], sizes = [8, 8, 8], strides = [1, 1, 1]} : vector<8x8x128xf32> to vector<8x8x8xf32>
    %16 = vector.extract_strided_slice %12 {offsets = [0, 0, 8], sizes = [8, 8, 8], strides = [1, 1, 1]} : vector<8x8x128xf32> to vector<8x8x8xf32>
    %17 = vector.extract_strided_slice %12 {offsets = [0, 0, 16], sizes = [8, 8, 8], strides = [1, 1, 1]} : vector<8x8x128xf32> to vector<8x8x8xf32>
    %18 = vector.extract_strided_slice %12 {offsets = [0, 0, 24], sizes = [8, 8, 8], strides = [1, 1, 1]} : vector<8x8x128xf32> to vector<8x8x8xf32>
    %19 = tpu.concatenate %15, %16, %17, %18 in 0 : vector<8x8x8xf32>, vector<8x8x8xf32>, vector<8x8x8xf32>, vector<8x8x8xf32> -> vector<32x8x8xf32>
    %20 = vector.extract_strided_slice %14 {offsets = [0, 0, 0], sizes = [8, 8, 8], strides = [1, 1, 1]} : vector<8x32x8xf32> to vector<8x8x8xf32>
    %21 = vector.extract_strided_slice %14 {offsets = [0, 8, 0], sizes = [8, 8, 8], strides = [1, 1, 1]} : vector<8x32x8xf32> to vector<8x8x8xf32>
    %22 = vector.extract_strided_slice %14 {offsets = [0, 16, 0], sizes = [8, 8, 8], strides = [1, 1, 1]} : vector<8x32x8xf32> to vector<8x8x8xf32>
    %23 = vector.extract_strided_slice %14 {offsets = [0, 24, 0], sizes = [8, 8, 8], strides = [1, 1, 1]} : vector<8x32x8xf32> to vector<8x8x8xf32>
    %24 = tpu.concatenate %20, %21, %22, %23 in 0 : vector<8x8x8xf32>, vector<8x8x8xf32>, vector<8x8x8xf32>, vector<8x8x8xf32> -> vector<32x8x8xf32>
    %25 = vector.extract_strided_slice %12 {offsets = [0, 0, 64], sizes = [8, 8, 8], strides = [1, 1, 1]} : vector<8x8x128xf32> to vector<8x8x8xf32>
    %26 = vector.extract_strided_slice %12 {offsets = [0, 0, 72], sizes = [8, 8, 8], strides = [1, 1, 1]} : vector<8x8x128xf32> to vector<8x8x8xf32>
    %27 = vector.extract_strided_slice %12 {offsets = [0, 0, 80], sizes = [8, 8, 8], strides = [1, 1, 1]} : vector<8x8x128xf32> to vector<8x8x8xf32>
    %28 = vector.extract_strided_slice %12 {offsets = [0, 0, 88], sizes = [8, 8, 8], strides = [1, 1, 1]} : vector<8x8x128xf32> to vector<8x8x8xf32>
    %29 = tpu.concatenate %25, %26, %27, %28 in 0 : vector<8x8x8xf32>, vector<8x8x8xf32>, vector<8x8x8xf32>, vector<8x8x8xf32> -> vector<32x8x8xf32>
    "tpu.trace_start"() <{level = 10 : i32, message = "bqd,bdk->bqk"}> : () -> ()
    %cst_6 = arith.constant dense<0.000000e+00> : vector<32x8x8xf32>
    %30 = tpu.matmul %19, %24, %cst_6 {dimension_numbers = #tpu.dot_dimension_numbers<[2], [1], [1], [2], [0, 0, 0, 1, 1, 2], [0], [0]>} : vector<32x8x8xf32>, vector<32x8x8xf32>, vector<32x8x8xf32> -> vector<32x8x8xf32>
    "tpu.trace_stop"() : () -> ()
    %cst_7 = arith.constant 0.353553385 : f32
    %31 = vector.broadcast %cst_7 : f32 to vector<32x8x8xf32>
    %32 = arith.mulf %30, %31 : vector<32x8x8xf32>
    %cst_8 = arith.constant dense<0xFF800000> : vector<32x8xf32>
    %33 = vector.multi_reduction <maximumf>, %32, %cst_8 [2] : vector<32x8x8xf32> to vector<32x8xf32>
    %34 = vector.shape_cast %33 : vector<32x8xf32> to vector<32x8x1xf32>
    %35 = vector.broadcast %34 : vector<32x8x1xf32> to vector<32x8x8xf32>
    %36 = arith.subf %32, %35 : vector<32x8x8xf32>
    %37 = math.exp %36 : vector<32x8x8xf32>
    %cst_9 = arith.constant dense<0.000000e+00> : vector<32x8xf32>
    %38 = vector.multi_reduction <add>, %37, %cst_9 [2] : vector<32x8x8xf32> to vector<32x8xf32>
    %39 = vector.shape_cast %38 : vector<32x8xf32> to vector<32x8x1xf32>
    %40 = tpu.reciprocal %39 {approx = true} : vector<32x8x1xf32> -> vector<32x8x1xf32>
    %41 = vector.broadcast %40 : vector<32x8x1xf32> to vector<32x8x8xf32>
    %42 = arith.mulf %37, %41 : vector<32x8x8xf32>
    "tpu.trace_start"() <{level = 10 : i32, message = "bqk,bkd->bqd"}> : () -> ()
    %cst_10 = arith.constant dense<0.000000e+00> : vector<32x8x8xf32>
    %43 = tpu.matmul %42, %29, %cst_10 {dimension_numbers = #tpu.dot_dimension_numbers<[2], [1], [1], [2], [0, 0, 0, 1, 1, 2], [0], [0]>} : vector<32x8x8xf32>, vector<32x8x8xf32>, vector<32x8x8xf32> -> vector<32x8x8xf32>
    "tpu.trace_stop"() : () -> ()
    %44 = vector.extract_strided_slice %43 {offsets = [0, 0, 0], sizes = [8, 8, 8], strides = [1, 1, 1]} : vector<32x8x8xf32> to vector<8x8x8xf32>
    %45 = vector.extract_strided_slice %43 {offsets = [8, 0, 0], sizes = [8, 8, 8], strides = [1, 1, 1]} : vector<32x8x8xf32> to vector<8x8x8xf32>
    %46 = vector.extract_strided_slice %43 {offsets = [16, 0, 0], sizes = [8, 8, 8], strides = [1, 1, 1]} : vector<32x8x8xf32> to vector<8x8x8xf32>
    %47 = vector.extract_strided_slice %43 {offsets = [24, 0, 0], sizes = [8, 8, 8], strides = [1, 1, 1]} : vector<32x8x8xf32> to vector<8x8x8xf32>
    %48 = tpu.concatenate %44, %45, %46, %47 in 2 : vector<8x8x8xf32>, vector<8x8x8xf32>, vector<8x8x8xf32>, vector<8x8x8xf32> -> vector<8x8x32xf32>
    %c112 = arith.constant 112 : index
    %c0_11 = arith.constant 0 : index
    %49 = vector.load %arg2[%c112, %c0_11] : memref<304x128xf32, #tpu.memory_space<vmem>>, vector<32x32xf32>
    %50 = vector.shape_cast %48 : vector<8x8x32xf32> to vector<64x32xf32>
    %cst_12 = arith.constant dense<0.000000e+00> : vector<64x32xf32>
    %51 = tpu.matmul %50, %49, %cst_12 {dimension_numbers = #tpu.dot_dimension_numbers<[1], [0], [0], [1], [0, 0, 1, 1], [], []>} : vector<64x32xf32>, vector<32x32xf32>, vector<64x32xf32> -> vector<64x32xf32>
    %c2 = arith.constant 2 : index
    %c0_13 = arith.constant 0 : index
    %52 = vector.load %arg2[%c2, %c0_13] : memref<304x128xf32, #tpu.memory_space<vmem>>, vector<1x32xf32>
    %53 = vector.broadcast %52 : vector<1x32xf32> to vector<64x32xf32>
    %54 = arith.addf %51, %53 : vector<64x32xf32>
    %55 = arith.addf %6, %54 : vector<64x32xf32>
    %c3 = arith.constant 3 : index
    %c0_14 = arith.constant 0 : index
    %56 = vector.load %arg2[%c3, %c0_14] : memref<304x128xf32, #tpu.memory_space<vmem>>, vector<1x32xf32>
    %c4 = arith.constant 4 : index
    %c0_15 = arith.constant 0 : index
    %57 = vector.load %arg2[%c4, %c0_15] : memref<304x128xf32, #tpu.memory_space<vmem>>, vector<1x32xf32>
    %cst_16 = arith.constant dense<0.000000e+00> : vector<64xf32>
    %58 = vector.multi_reduction <add>, %55, %cst_16 [1] : vector<64x32xf32> to vector<64xf32>
    %59 = vector.shape_cast %58 : vector<64xf32> to vector<64x1xf32>
    %cst_17 = arith.constant 3.200000e+01 : f32
    %60 = vector.broadcast %cst_17 : f32 to vector<64x1xf32>
    %61 = arith.divf %59, %60 : vector<64x1xf32>
    %62 = vector.broadcast %61 : vector<64x1xf32> to vector<64x32xf32>
    %63 = arith.subf %55, %62 : vector<64x32xf32>
    %64 = arith.mulf %63, %63 : vector<64x32xf32>
    %cst_18 = arith.constant dense<0.000000e+00> : vector<64xf32>
    %65 = vector.multi_reduction <add>, %64, %cst_18 [1] : vector<64x32xf32> to vector<64xf32>
    %66 = vector.shape_cast %65 : vector<64xf32> to vector<64x1xf32>
    %cst_19 = arith.constant 3.200000e+01 : f32
    %67 = vector.broadcast %cst_19 : f32 to vector<64x1xf32>
    %68 = arith.divf %66, %67 : vector<64x1xf32>
    %69 = vector.broadcast %61 : vector<64x1xf32> to vector<64x32xf32>
    %70 = arith.subf %55, %69 : vector<64x32xf32>
    %cst_20 = arith.constant 9.99999974E-6 : f32
    %71 = vector.broadcast %cst_20 : f32 to vector<64x1xf32>
    %72 = arith.addf %68, %71 : vector<64x1xf32>
    %73 = math.rsqrt %72 : vector<64x1xf32>
    %74 = vector.broadcast %73 : vector<64x1xf32> to vector<64x32xf32>
    %75 = arith.mulf %70, %74 : vector<64x32xf32>
    %76 = vector.broadcast %56 : vector<1x32xf32> to vector<64x32xf32>
    %77 = arith.mulf %75, %76 : vector<64x32xf32>
    %78 = vector.broadcast %57 : vector<1x32xf32> to vector<64x32xf32>
    %79 = arith.addf %77, %78 : vector<64x32xf32>
    %c144 = arith.constant 144 : index
    %c0_21 = arith.constant 0 : index
    %80 = vector.load %arg2[%c144, %c0_21] : memref<304x128xf32, #tpu.memory_space<vmem>>, vector<32x128xf32>
    %c5 = arith.constant 5 : index
    %c0_22 = arith.constant 0 : index
    %81 = vector.load %arg2[%c5, %c0_22] : memref<304x128xf32, #tpu.memory_space<vmem>>, vector<1x128xf32>
    %c176 = arith.constant 176 : index
    %c0_23 = arith.constant 0 : index
    %82 = vector.load %arg2[%c176, %c0_23] : memref<304x128xf32, #tpu.memory_space<vmem>>, vector<128x32xf32>
    %c6 = arith.constant 6 : index
    %c0_24 = arith.constant 0 : index
    %83 = vector.load %arg2[%c6, %c0_24] : memref<304x128xf32, #tpu.memory_space<vmem>>, vector<1x32xf32>
    %cst_25 = arith.constant dense<0.000000e+00> : vector<64x128xf32>
    %84 = tpu.matmul %79, %80, %cst_25 {dimension_numbers = #tpu.dot_dimension_numbers<[1], [0], [0], [1], [0, 0, 1, 1], [], []>} : vector<64x32xf32>, vector<32x128xf32>, vector<64x128xf32> -> vector<64x128xf32>
    %85 = vector.broadcast %81 : vector<1x128xf32> to vector<64x128xf32>
    %86 = arith.addf %84, %85 : vector<64x128xf32>
    %cst_26 = arith.constant 0.000000e+00 : f32
    %87 = vector.broadcast %cst_26 : f32 to vector<64x128xf32>
    %88 = arith.maximumf %86, %87 : vector<64x128xf32>
    %cst_27 = arith.constant dense<0.000000e+00> : vector<64x32xf32>
    %89 = tpu.matmul %88, %82, %cst_27 {dimension_numbers = #tpu.dot_dimension_numbers<[1], [0], [0], [1], [0, 0, 1, 1], [], []>} : vector<64x128xf32>, vector<128x32xf32>, vector<64x32xf32> -> vector<64x32xf32>
    %90 = vector.broadcast %83 : vector<1x32xf32> to vector<64x32xf32>
    %91 = arith.addf %89, %90 : vector<64x32xf32>
    %92 = arith.addf %79, %91 : vector<64x32xf32>
    %c7 = arith.constant 7 : index
    %c0_28 = arith.constant 0 : index
    %93 = vector.load %arg2[%c7, %c0_28] : memref<304x128xf32, #tpu.memory_space<vmem>>, vector<1x32xf32>
    %c8 = arith.constant 8 : index
    %c0_29 = arith.constant 0 : index
    %94 = vector.load %arg2[%c8, %c0_29] : memref<304x128xf32, #tpu.memory_space<vmem>>, vector<1x32xf32>
    %cst_30 = arith.constant dense<0.000000e+00> : vector<64xf32>
    %95 = vector.multi_reduction <add>, %92, %cst_30 [1] : vector<64x32xf32> to vector<64xf32>
    %96 = vector.shape_cast %95 : vector<64xf32> to vector<64x1xf32>
    %cst_31 = arith.constant 3.200000e+01 : f32
    %97 = vector.broadcast %cst_31 : f32 to vector<64x1xf32>
    %98 = arith.divf %96, %97 : vector<64x1xf32>
    %99 = vector.broadcast %98 : vector<64x1xf32> to vector<64x32xf32>
    %100 = arith.subf %92, %99 : vector<64x32xf32>
    %101 = arith.mulf %100, %100 : vector<64x32xf32>
    %cst_32 = arith.constant dense<0.000000e+00> : vector<64xf32>
    %102 = vector.multi_reduction <add>, %101, %cst_32 [1] : vector<64x32xf32> to vector<64xf32>
    %103 = vector.shape_cast %102 : vector<64xf32> to vector<64x1xf32>
    %cst_33 = arith.constant 3.200000e+01 : f32
    %104 = vector.broadcast %cst_33 : f32 to vector<64x1xf32>
    %105 = arith.divf %103, %104 : vector<64x1xf32>
    %106 = vector.broadcast %98 : vector<64x1xf32> to vector<64x32xf32>
    %107 = arith.subf %92, %106 : vector<64x32xf32>
    %cst_34 = arith.constant 9.99999974E-6 : f32
    %108 = vector.broadcast %cst_34 : f32 to vector<64x1xf32>
    %109 = arith.addf %105, %108 : vector<64x1xf32>
    %110 = math.rsqrt %109 : vector<64x1xf32>
    %111 = vector.broadcast %110 : vector<64x1xf32> to vector<64x32xf32>
    %112 = arith.mulf %107, %111 : vector<64x32xf32>
    %113 = vector.broadcast %93 : vector<1x32xf32> to vector<64x32xf32>
    %114 = arith.mulf %112, %113 : vector<64x32xf32>
    %115 = vector.broadcast %94 : vector<1x32xf32> to vector<64x32xf32>
    %116 = arith.addf %114, %115 : vector<64x32xf32>
    %c9 = arith.constant 9 : index
    %c0_35 = arith.constant 0 : index
    %117 = vector.load %arg2[%c9, %c0_35] : memref<304x128xf32, #tpu.memory_space<vmem>>, vector<1x32xf32>
    %c10 = arith.constant 10 : index
    %c0_36 = arith.constant 0 : index
    %118 = vector.load %arg2[%c10, %c0_36] : memref<304x128xf32, #tpu.memory_space<vmem>>, vector<1x1xf32>
    %119 = vector.broadcast %117 : vector<1x32xf32> to vector<64x32xf32>
    %120 = arith.mulf %116, %119 : vector<64x32xf32>
    %cst_37 = arith.constant dense<0.000000e+00> : vector<64xf32>
    %121 = vector.multi_reduction <add>, %120, %cst_37 [1] : vector<64x32xf32> to vector<64xf32>
    %122 = vector.shape_cast %121 : vector<64xf32> to vector<64x1xf32>
    %123 = vector.broadcast %118 : vector<1x1xf32> to vector<64x1xf32>
    %124 = arith.addf %122, %123 : vector<64x1xf32>
    %cst_38 = arith.constant 0.000000e+00 : f32
    %125 = vector.broadcast %cst_38 : f32 to vector<64x1xf32>
    %126 = arith.maximumf %124, %125 : vector<64x1xf32>
    %127 = vector.shape_cast %126 : vector<64x1xf32> to vector<64x1xf32>
    %128 = vector.broadcast %127 : vector<64x1xf32> to vector<64x128xf32>
    %c0_39 = arith.constant 0 : index
    %c0_40 = arith.constant 0 : index
    %129 = vector.load %arg3[%c0_39, %c0_40] : memref<64x128xf32, #tpu.memory_space<vmem>>, vector<64x128xf32>
    tpu.vector_store %arg3[%c0_39, %c0_40], %128 {strides = array<i32>} : memref<64x128xf32, #tpu.memory_space<vmem>>, vector<64x128xf32>,
    return
  }
  func.func @transform_0(%arg0: i32) -> (i32, i32) {
    %c0_i32 = arith.constant 0 : i32
    %c0_i32_0 = arith.constant 0 : i32
    return %arg0, %c0_i32 : i32, i32
  }
  func.func @transform_1(%arg0: i32) -> (i32, i32) {
    %c0_i32 = arith.constant 0 : i32
    %c0_i32_0 = arith.constant 0 : i32
    %c0_i32_1 = arith.constant 0 : i32
    return %c0_i32, %c0_i32_0 : i32, i32
  }
  func.func @transform_2(%arg0: i32) -> (i32, i32) {
    %c0_i32 = arith.constant 0 : i32
    %c0_i32_0 = arith.constant 0 : i32
    return %arg0, %c0_i32 : i32, i32
  }
}

</mosaic_0001>

<bundles_post_ra>
// kernel: tpu_custom_call.1
= control target key start
LH: loop header
LB: loop body
LE: loop exit
PB: predicated region body
PF: predicated region fallthrough
CT: control target
= control target key end

     0   :  { %7 = vsyncpa [#allocation3], 0  ;;  %s9261_s0 = inlined_call_operand.vmem [shape: f32[128,1], index: 0, kind: input, shape index: {}]   ;;  %s9262_s1 = inlined_call_operand.hbm [shape: f32[304,128], index: 1, kind: input, shape index: {}]   ;;  %s9263_s2 = inlined_call_operand.hbm [shape: f32[128,128], index: 2, kind: output, shape index: {}]  }
   0x1   :  { %8 = vsyncpa [#allocation4], 0 }
   0x2   :  { %10 = vsyncpa [#allocation4 + $0x1], 0  ;;  %s7975_s9 = smov 0   ;;  %s7977_s10 = smov 0  }
   0x3   :  { %s7979_s11 = smov 0   ;;  %s7981_s12 = smov 0  }
   0x4 LB: > { %s7996_s13 = sadd.s32 4294967295, %s7942_s12   ;;  %s6836_s14 = sadd.s32 4294967294, %s7942_s12   ;;  %s7942_s12 = sphi %s7981_s12, %s9330_s12   ;;  %s7938_s11 = sphi %s7979_s11, %s9329_s11   ;;  %s7934_s10 = sphi %s7977_s10, %s9328_s10   ;;  %s7930_s9 = sphi %s7975_s9, %s9327_s9  }
   0x5   : > { %s8000_s15 = sadd.s32 1, %s7942_s12   ;;  %s70_s16 = sadd.s32 1, %s7938_s11 }
   0x6   : > { %s67_s17 = ssub.s32 %s7942_s12, %s8000_s15  ;;  %p80_p0 = scmp.ne.s32.totalorder %s7938_s11, %s7934_s10 }
   0x7   : > { %p68_p1 = scmp.eq.s32.totalorder %s67_s17, 0  ;;  %p81_p2 = scmp.eq.s32.totalorder %s7996_s13, 1 }
   0x8   : > { %p86_p3 = scmp.ne.s32.totalorder %s7934_s10, %s7930_s9  ;;  %p87_p4 = scmp.eq.s32.totalorder %s6836_s14, 1 }
   0x9   : > { %s8011_s18 = scalar_select %p68_p1, %s7938_s11, %s70_s16  }
   0xa   : > { %p8013_p5 = por %p81_p2, %p80_p0  ;;  %p8017_p6 = por %p87_p4, %p86_p3 }
   0xb   : > { %p6837_p7 = scmp.ge.s32.totalorder %s7942_s12, 1  ;;  %p94_p8 = scmp.lt.s32.totalorder %s7942_s12, 3 }
   0xc   : > { %s9277_s19 = scalar_select %p8013_p5, 1, 0 }
   0xd   : > { %s9278_s20 = scalar_select %p8017_p6, 1, 0 }
   0xe   : > { %p9264_p9 = scmp.eq.s32.totalorder %s7996_s13, 0  ;;  %p8024_p10 = pnand %p6837_p7, %p94_p8 }
   0xf   : > { %s7944_s22 = smov [#allocation2]   ;;  %s7848_s27 = scalar_lea.hbm %s9262_s1, 4864 }
  0x10   : > { %s9279_s21 = scalar_select %p8024_p10, 1, 0 }
  0x11   : > { %s106_s23 = sshll.u32 %s7944_s22, 4  ;;  %p7628_p11 = pneg %p8024_p10  ;;  %s107_s23 = int_to_ptr.vmem [resolvable:$true] %s106_s23 }
  0x12   : > { %p7849_p13 = scmp.ne.s32.totalorder %s9262_s1, %s7848_s27  ;;  %p7855_p3 = scmp.lt.u32.totalorder %s7848_s27, %s9262_s1 }
  0x13   : > { %p8032_p12 = pnand %p9264_p9, %p7628_p11 }
  0x15   : > { %p7850_p0 = pneg %p8032_p12 }
  0x17   : > { %p7851_p1 = pnand %p7850_p0, %p7849_p13 }
  0x19   : > { %p7852_p2 = pneg %p7851_p1 }
  0x1b   : > { %p7857_p4 = pnand %p7855_p3, %p7852_p2 }
  0x1d   : > { %7860 = shalt.err (!%p7857_p4)
}
  0x1e   : > { %s7861_s4 = scalar_lea.vmem %s107_s23, 4864  ;;  %p7869_p9 = scmp.lt.s32.totalorder %s107_s23, %s107_s23 }
  0x1f   : > { %p7862_p7 = scmp.ne.s32.totalorder %s107_s23, %s7861_s4  ;;  %p7870_p6 = scmp.lt.s32.totalorder %s7861_s4, %s7861_s4 }
  0x21   : > { %p7864_p8 = pnand %p7862_p7, %p7850_p0  ;;  %p7871_p5 = por %p7870_p6, %p7869_p9 }
  0x23   : > { %p7865_p11 = pneg %p7864_p8 }
  0x25   : > { %p7872_p10 = pnand %p7871_p5, %p7865_p11 }
  0x27   : > { %7875 = shalt.err (!%p7872_p10)
}
  0x28   : > { %s7945_s5 = smov 128   ;;  %s7946_s6 = smov 8  }
  0x29   : > { %7631 = dma.hbm_to_vmem [thread:$0]  (!%p8032_p12), %s9262_s1, 4864, %s107_s23, [#allocation3], %s7945_s5, %s7945_s5, %s7946_s6  }
  0x2a   : > { %p9281_p13 = scmp.ne.s32.totalorder %s9279_s21, 0 }
  0x2c   : > { %131 = sbr.rel (%p9281_p13) target bundleno = 3216 (0xc90), region = 28 }
  0x33   : > { %p9282_p1 = scmp.eq.s32.totalorder %s7996_s13, 0 }
  0x35   : > { %7921 = dma.done.wait (%p9282_p1), [#allocation3], 4864   ;;  %p9283_p0 = pmov %p9282_p1 }
  0x36   : > { %s6843_s14 = sshll.u32 %s7996_s13, 3  ;;  %v7947_v0 = vmov 0   ;;  %v237_v5 = vld [vmem:[#allocation2 + $0x50] sm:$0xff]  ;;  %v238_v6 = vld [vmem:[#allocation2 + $0x58] sm:$0xff]  ;;  %v239_v8 = vld [vmem:[#allocation2 + $0x60] sm:$0xff]  ;;  %vm246_vm0 = vcmask 261120  }
  0x37   : > { %7923 = vsyncadd (%p9283_p0), [#allocation3], 4294962432  ;;  %7687 = vset.pattern.permute.xlu1 %v7947_v0  ;;  %7686 = vset.pattern.permute.xlu0 %v7947_v0  ;;  %p154_p5 = scmp.lt.s32.totalorder %s6843_s14, 15  ;;  %v7562_v7 = vpack.c.bf16 %v238_v6, %v237_v5  ;;  %v240_v9 = vld [vmem:[#allocation2 + $0x68] sm:$0xff]  ;;  %v6845_v15 = vld [vmem:[#allocation2] ss:$0 sm:$0xff] }
  0x38   : > { %v7566_v10 = vpack.c.bf16 %v240_v9, %v239_v8  ;;  %v169_v18 = vld [vmem:[#allocation2 + $0x10] sm:$0xff]  ;;  %v171_v19 = vld [vmem:[#allocation2 + $0x20] sm:$0xff]  ;;  %v172_v24 = vld [vmem:[#allocation2 + $0x28] sm:$0xff]  ;;  %s7948_s21 = smov 96   ;;  %s7949_s24 = smov 120   ;;  %vm7953_vm1 = vmmov 0  }
  0x39   : > { %s9332_s14 = smov (!%p154_p5, %s6843_s14), 15  ;;  %7563 = vmatprep.subr.bf16.mxu0 %v7562_v7  ;;  %7618 = vmatprep.subr.bf16.mxu1 %v7562_v7  ;;  %v170_v26 = vld [vmem:[#allocation2 + $0x18] sm:$0xff]  ;;  %v173_v34 = vld [vmem:[#allocation2 + $0x30] sm:$0xff]  ;;  %v176_v40 = vld [vmem:[#allocation2 + $0x48] sm:$0xff]  ;;  %s7950_s25 = smov 112   ;;  %vm712_vm2 = vcmask 64512  }
  0x3a   : > { %s6844_s16 = sshll.u32 %s9332_s14, 3  ;;  %7565 = vmatpush3.bf16.msra.mxu0 %v7562_v7  ;;  %7620 = vmatpush3.bf16.msra.mxu1 %v7562_v7  ;;  %v174_v32 = vld [vmem:[#allocation2 + $0x38] sm:$0xff]  ;;  %v175_v42 = vld [vmem:[#allocation2 + $0x40] sm:$0xff]  ;;  %s7951_s26 = smov 104   ;;  %vm5946_vm3 = vcmask 195584   ;;  %vm5937_vm4 = vcmask 130048  }
  0x3b   : > { %s157_s23 = scalar_lea.vmem %s9261_s0, %s6844_s16  ;;  %7567 = vmatprep.subr.bf16.mxu0 %v7566_v10  ;;  %7619 = vmatprep.subr.bf16.mxu1 %v7566_v10  ;;  %v6846_v48 = vld [vmem:[#allocation2 + $0x1] ss:$0 sm:$0xff]  ;;  %s7954_s27 = smov 64  }
  0x3c   : > { %v162_v1 = vld [vmem:[%s157_s23 + $0x10] sm:$0xff]  ;;  %v160_v2 = vld [vmem:[%s157_s23] sm:$0xff]  ;;  %v163_v3 = vld [vmem:[%s157_s23 + $0x18] sm:$0xff]  ;;  %s7955_s28 = smov 8   ;;  %s7956_s29 = smov 16  }
  0x3d   : > { %189 = vperm.xlu1 %7687, %v162_v1   ;;  %179 = vperm.xlu0 %7686, %v160_v2   ;;  %v161_v4 = vld [vmem:[%s157_s23 + $0x8] sm:$0xff]  ;;  %v164_v12 = vld [vmem:[%s157_s23 + $0x20] sm:$0xff]  ;;  %v167_v13 = vld [vmem:[%s157_s23 + $0x38] sm:$0xff]  ;;  %s7957_s30 = smov 24   ;;  %s150_s3 = sand.u32 1, %s7934_s10  }
  0x3e   : > { %v165_v11 = vld [vmem:[%s157_s23 + $0x28] sm:$0xff]  ;;  %v166_v14 = vld [vmem:[%s157_s23 + $0x30] sm:$0xff]  ;;  %7569 = vmatpush3.bf16.msra.mxu0 %v7566_v10  ;;  %7621 = vmatpush3.bf16.msra.mxu1 %v7566_v10  ;;  %s6842_s4 = sshll.u32 %s150_s3, 6  ;;  %s6949_s7 = sshll.u32 %s7996_s13, 10 }
  0x3f   : > { %s152_s5 = scalar_lea.vmem [#allocation5], %s6842_s4  ;;  %s9217_s16 = scalar_lea.hbm %s9263_s2, %s6949_s7 }
  0x40   : > { %s6762_s6 = sshll.u32 %s152_s5, 4  ;;  %s9219_s17 = scalar_lea.sflag [#allocation4], %s150_s3  ;;  %s9212_s6 = int_to_ptr.vmem [resolvable:$true] %s6762_s6 }
  0x41   : > { %194 = vperm.xlu1 %7687, %v163_v3   ;;  %184 = vperm.xlu0 %7686, %v161_v4   ;;  %v9267_v3 = vmov 0.0   ;;  %s7876_s22 = scalar_lea.vmem %s9212_s6, 1024  ;;  %p9325_p9 = scmp.ne.s32.totalorder %s9277_s19, 0 }
  0x42   : > { %7158 = vmatprep.subr.mxu1 %v9267_v3  ;;  %7188 = vmatprep.subr.mxu0 %v9267_v3  ;;  %p7877_p6 = scmp.ne.s32.totalorder %s9212_s6, %s7876_s22  ;;  %s7958_s13 = smov [#allocation5]  }
  0x43   : > { %s7880_s23 = sshll.u32 %s7958_s13, 4  ;;  %s7881_s23 = int_to_ptr.vmem [resolvable:$false] %s7880_s23 }
  0x44   : > { %p7878_p10 = pnand %p7877_p6, %p9325_p9  ;;  %p7883_p2 = scmp.lt.s32.totalorder %s9212_s6, %s7881_s23 }
  0x45   : > { %204 = vperm.xlu1 %7687, %v165_v11   ;;  %199 = vperm.xlu0 %7686, %v164_v12  }
  0x46   : > { %p7879_p12 = pneg %p7878_p10 }
  0x49   : > { %214 = vperm.xlu1 %7687, %v167_v13   ;;  %209 = vperm.xlu0 %7686, %v166_v14  }
  0xbc   : > { %v190_v16 = vpop.permute.xlu1 %189  ;;  %v180_v17 = vpop.permute.xlu0 %179 }
  0xbd   : > { %v223_v20 = vmul.f32 %v6845_v15, %v190_v16  ;;  %v221_v21 = vmul.f32 %v6845_v15, %v180_v17 }
  0xbf   : > { %v8062_v22 = vadd.f32 %v221_v21, %v169_v18  ;;  %v8064_v23 = vadd.f32 %v223_v20, %v171_v19 }
  0xc0   : > { %v195_v25 = vpop.permute.xlu1 %194  ;;  %v185_v27 = vpop.permute.xlu0 %184 }
  0xc1   : > { %9284 = vst [vmem:[#allocation8_spill] sm:$0xff] %v8062_v22  ;;  %9285 = vst [vmem:[#allocation9_spill] sm:$0xff] %v8064_v23  ;;  %v224_v28 = vmul.f32 %v6845_v15, %v195_v25  ;;  %v222_v29 = vmul.f32 %v6845_v15, %v185_v27  ;;  %7146 = vmatprep.mubr.msk.f32.mxu0 %vm246_vm0, %v8062_v22  ;;  %7149 = vmatprep.mubr.msk.f32.mxu1 %vm246_vm0, %v8064_v23 }
  0xc3   : > { %v8070_v30 = vadd.f32 %v224_v28, %v172_v24  ;;  %v8072_v31 = vadd.f32 %v222_v29, %v170_v26 }
  0xc4   : > { %v205_v33 = vpop.permute.xlu1 %204  ;;  %v200_v35 = vpop.permute.xlu0 %199 }
  0xc5   : > { %9286 = vst [vmem:[#allocation10_spill] sm:$0xff] %v8070_v30  ;;  %9287 = vst [vmem:[#allocation11_spill] sm:$0xff] %v8072_v31  ;;  %v226_v36 = vmul.f32 %v6845_v15, %v205_v33  ;;  %v225_v37 = vmul.f32 %v6845_v15, %v200_v35  ;;  %7147 = vmatmul.mubr.msk.f32.vlgmr.msra.gmra.mrb[0].mxu0 %vm246_vm0, %v8072_v31  ;;  %7150 = vmatmul.mubr.msk.f32.vlgmr.msra.gmra.mrb[0].mxu1 %vm246_vm0, %v8070_v30 }
  0xc6   : > { %7190 = vmatprep.mubr.msk.f32.mxu0 %vm7953_vm1, %v9267_v3 }
  0xc7   : > { %v8078_v38 = vadd.f32 %v226_v36, %v174_v32  ;;  %v8080_v39 = vadd.f32 %v225_v37, %v173_v34 }
  0xc8   : > { %v215_v41 = vpop.permute.xlu1 %214  ;;  %v210_v43 = vpop.permute.xlu0 %209 }
  0xc9   : > { %9288 = vst [vmem:[#allocation12_spill] sm:$0xff] %v8078_v38  ;;  %9289 = vst [vmem:[#allocation13_spill] sm:$0xff] %v8080_v39  ;;  %v228_v44 = vmul.f32 %v6845_v15, %v215_v41  ;;  %v227_v45 = vmul.f32 %v6845_v15, %v210_v43  ;;  %7152 = vmatprep.mubr.msk.f32.mxu1 %vm246_vm0, %v8080_v39 }
  0xca   : > { %7153 = vmatmul.mubr.msk.f32.gmra.mrb[2].mxu1 %vm246_vm0, %v8078_v38 }
  0xcb   : > { %v8086_v46 = vadd.f32 %v228_v44, %v176_v40  ;;  %v8088_v47 = vadd.f32 %v227_v45, %v175_v42 }
  0xcd   : > { %9290 = vst [vmem:[#allocation14_spill] sm:$0xff] %v8086_v46  ;;  %9291 = vst [vmem:[#allocation15_spill] sm:$0xff] %v8088_v47  ;;  %7155 = vmatprep.mubr.msk.f32.mxu1 %vm246_vm0, %v8088_v47 }
  0xce   : > { %7156 = vmatmul.mubr.msk.f32.gmra.mrb[4].mxu1 %vm246_vm0, %v8086_v46 }
  0xcf   : > { %7160 = vmatprep.mubr.msk.f32.mxu1 %vm7953_vm1, %v9267_v3 }
 0x198   : > { %v7148_v49 = vpop.f32.mrb[0].mxu0  ;;  %v7151_v50 = vpop.f32.mrb[0].mxu1 }
 0x199   : > { %v8094_v51 = vadd.f32 %v7148_v49, %v6846_v48  ;;  %v337_v52 = vpop.f32.mrb[1].mxu0  ;;  %v347_v53 = vpop.f32.mrb[1].mxu1  ;;  %v8102_v55 = vadd.f32 %v7151_v50, %v6846_v48 }
 0x19a   : > { %v8096_v54 = vadd.f32 %v6846_v48, %v337_v52  ;;  %v8104_v57 = vadd.f32 %v6846_v48, %v347_v53 }
 0x19b   : > { %386 = vrot.lane.b32.xlu1 %v8094_v51, %s7948_s21 }
 0x19c   : > { %384 = vrot.lane.b32.xlu0 %v8096_v54, %s7948_s21 }
 0x19d   : > { %v7154_v56 = vpop.f32.mrb[2].mxu1 }
 0x19e   : > { %v357_v58 = vpop.f32.mrb[3].mxu1  ;;  %v8126_v61 = vadd.f32 %v7154_v56, %v6846_v48 }
 0x19f   : > { %390 = vrot.lane.b32.xlu1 %v8102_v55, %s7948_s21  ;;  %v8131_v62 = vadd.f32 %v6846_v48, %v357_v58 }
 0x1a0   : > { %388 = vrot.lane.b32.xlu0 %v8104_v57, %s7948_s21 }
 0x1a1   : > { %v7157_v59 = vpop.f32.mrb[4].mxu1 }
 0x1a2   : > { %v367_v60 = vpop.f32.mrb[5].mxu1  ;;  %v8148_v63 = vadd.f32 %v7157_v59, %v6846_v48 }
 0x1a3   : > { %666 = vrot.lane.b32.xlu1 %v8094_v51, %s7949_s24  ;;  %v8153_v0 = vadd.f32 %v6846_v48, %v367_v60 }
 0x1a4   : > { %664 = vrot.lane.b32.xlu0 %v8096_v54, %s7949_s24 }
 0x1a7   : > { %670 = vrot.lane.b32.xlu1 %v8102_v55, %s7949_s24 }
 0x1a8   : > { %680 = vrot.lane.b32.xlu0 %v8096_v54, %s7950_s25 }
 0x1ab   : > { %682 = vrot.lane.b32.xlu1 %v8094_v51, %s7950_s25 }
 0x1ac   : > { %684 = vrot.lane.b32.xlu0 %v8104_v57, %s7950_s25 }
 0x1af   : > { %686 = vrot.lane.b32.xlu1 %v8102_v55, %s7950_s25 }
 0x1b0   : > { %696 = vrot.lane.b32.xlu0 %v8096_v54, %s7951_s26 }
 0x1b3   : > { %698 = vrot.lane.b32.xlu1 %v8094_v51, %s7951_s26 }
 0x1b4   : > { %700 = vrot.lane.b32.xlu0 %v8104_v57, %s7951_s26 }
 0x1b7   : > { %702 = vrot.lane.b32.xlu1 %v8102_v55, %s7951_s26 }
 0x1b8   : > { %690 = vrot.lane.b32.xlu0 %v8126_v61, %s7950_s25 }
 0x1bb   : > { %668 = vrot.lane.b32.xlu1 %v8104_v57, %s7949_s24 }
 0x1bc   : > { %392 = vrot.lane.b32.xlu0 %v8131_v62, %s7948_s21 }
 0x1bf   : > { %394 = vrot.lane.b32.xlu1 %v8126_v61, %s7948_s21 }
 0x1c0   : > { %672 = vrot.lane.b32.xlu0 %v8131_v62, %s7949_s24 }
 0x1c3   : > { %674 = vrot.lane.b32.xlu1 %v8126_v61, %s7949_s24 }
 0x1c4   : > { %688 = vrot.lane.b32.xlu0 %v8131_v62, %s7950_s25 }
 0x1c7   : > { %706 = vrot.lane.b32.xlu1 %v8126_v61, %s7951_s26 }
 0x1c8   : > { %704 = vrot.lane.b32.xlu0 %v8131_v62, %s7951_s26 }
 0x1cb   : > { %398 = vrot.lane.b32.xlu1 %v8148_v63, %s7948_s21 }
 0x1cc   : > { %694 = vrot.lane.b32.xlu0 %v8148_v63, %s7950_s25 }
 0x1cf   : > { %678 = vrot.lane.b32.xlu1 %v8148_v63, %s7949_s24 }
 0x1d0   : > { %396 = vrot.lane.b32.xlu0 %v8153_v0, %s7948_s21  ;;  %s7882_s21 = scalar_lea.vmem %s7881_s23, 2048 }
 0x1d1   : > { %p7884_p3 = scmp.lt.s32.totalorder %s7882_s21, %s7876_s22 }
 0x1d3   : > { %676 = vrot.lane.b32.xlu1 %v8153_v0, %s7949_s24  ;;  %p7885_p4 = por %p7884_p3, %p7883_p2 }
 0x1d4   : > { %692 = vrot.lane.b32.xlu0 %v8153_v0, %s7950_s25 }
 0x1d5   : > { %p7886_p7 = pnand %p7885_p4, %p7879_p12 }
 0x20d   : > { %v387_v1 = vpop.permute.xlu1 %386 }
 0x20e   : > { %440 = vxpose.xlu1.b32.start.end [1/1] (short) (narrow) %v387_v1, 32  ;;  %v385_v2 = vpop.permute.xlu0 %384 }
 0x20f   : > { %408 = vxpose.xlu0.b32.start.end [1/1] (short) (narrow) %v385_v2, 32 }
 0x211   : > { %v391_v4 = vpop.permute.xlu1 %390 }
 0x212   : > { %v389_v5 = vpop.permute.xlu0 %388 }
 0x215   : > { %v8168_v6 = vpop.permute.xlu1 %666 }
 0x216   : > { %v8170_v7 = vpop.permute.xlu0 %664 }
 0x219   : > { %v8172_v8 = vpop.permute.xlu1 %670 }
 0x21a   : > { %v8174_v9 = vpop.permute.xlu0 %680 }
 0x21b   : > { %504 = vxpose.xlu1.b32.start.end [1/1] (short) (narrow) %v391_v4, 32 }
 0x21c   : > { %472 = vxpose.xlu0.b32.start.end [1/1] (short) (narrow) %v389_v5, 32 }
 0x21d   : > { %v8176_v10 = vpop.permute.xlu1 %682 }
 0x21e   : > { %v8178_v11 = vpop.permute.xlu0 %684 }
 0x221   : > { %v8180_v12 = vpop.permute.xlu1 %686 }
 0x222   : > { %v8182_v13 = vpop.permute.xlu0 %696 }
 0x225   : > { %v8184_v14 = vpop.permute.xlu1 %698 }
 0x226   : > { %v8186_v15 = vpop.permute.xlu0 %700 }
 0x229   : > { %v8188_v16 = vpop.permute.xlu1 %702 }
 0x22a   : > { %v8190_v17 = vpop.permute.xlu0 %690 }
 0x22d   : > { %v8192_v18 = vpop.permute.xlu1 %668 }
 0x22e   : > { %v393_v19 = vpop.permute.xlu0 %392 }
 0x22f   : > { %536 = vxpose.xlu0.b32.start.end [1/1] (short) (narrow) %v393_v19, 32 }
 0x231   : > { %v395_v20 = vpop.permute.xlu1 %394 }
 0x232   : > { %568 = vxpose.xlu1.b32.start.end [1/1] (short) (narrow) %v395_v20, 32  ;;  %v8194_v21 = vpop.permute.xlu0 %672 }
 0x235   : > { %v8196_v24 = vpop.permute.xlu1 %674 }
 0x236   : > { %v8198_v25 = vpop.permute.xlu0 %688 }
 0x239   : > { %v8200_v26 = vpop.permute.xlu1 %706 }
 0x23a   : > { %v8202_v27 = vpop.permute.xlu0 %704 }
 0x23d   : > { %v399_v28 = vpop.permute.xlu1 %398 }
 0x23e   : > { %v8204_v29 = vpop.permute.xlu0 %694 }
 0x23f   : > { %632 = vxpose.xlu1.b32.start.end [1/1] (short) (narrow) %v399_v28, 32 }
 0x241   : > { %v8226_v33 = vpop.permute.xlu1 %678 }
 0x242   : > { %v397_v32 = vpop.permute.xlu0 %396 }
 0x243   : > { %600 = vxpose.xlu0.b32.start.end [1/1] (short) (narrow) %v397_v32, 32 }
 0x245   : > { %v8232_v34 = vpop.permute.xlu1 %676 }
 0x246   : > { %v8238_v35 = vpop.permute.xlu0 %692 }
 0x269   : > { %710 = vrot.lane.b32.xlu1 %v8148_v63, %s7951_s26 }
 0x26d   : > { %3401 = vrot.lane.b32.xlu1 %v8096_v54, %s7954_s27 }
 0x271   : > { %3553 = vrot.lane.b32.xlu1 %v8104_v57, %s7954_s27 }
 0x275   : > { %3705 = vrot.lane.b32.xlu1 %v8131_v62, %s7954_s27 }
 0x278   : > { %708 = vrot.lane.b32.xlu0 %v8153_v0, %s7951_s26 }
 0x279   : > { %3857 = vrot.lane.b32.xlu1 %v8153_v0, %s7954_s27 }
 0x27c   : > { %3477 = vrot.lane.b32.xlu0 %v8094_v51, %s7954_s27 }
 0x27d   : > { %4009 = vrot.lane.b32.xlu1 %v8170_v7, %s7954_s27 }
 0x280   : > { %3629 = vrot.lane.b32.xlu0 %v8102_v55, %s7954_s27 }
 0x281   : > { %4161 = vrot.lane.b32.xlu1 %v8192_v18, %s7954_s27 }
 0x284   : > { %3781 = vrot.lane.b32.xlu0 %v8126_v61, %s7954_s27 }
 0x285   : > { %4313 = vrot.lane.b32.xlu1 %v8194_v21, %s7954_s27 }
 0x288   : > { %3933 = vrot.lane.b32.xlu0 %v8148_v63, %s7954_s27 }
 0x289   : > { %4465 = vrot.lane.b32.xlu1 %v8232_v34, %s7954_s27 }
 0x28c   : > { %4085 = vrot.lane.b32.xlu0 %v8168_v6, %s7954_s27 }
 0x28d   : > { %4617 = vrot.lane.b32.xlu1 %v8174_v9, %s7954_s27 }
 0x28e   : > { %v456_v36 = vpop.trf.xlu1 }
 0x28f   : > { %v424_v37 = vpop.trf.xlu0 }
 0x290   : > { %4237 = vrot.lane.b32.xlu0 %v8172_v8, %s7954_s27  ;;  %7159 = vmatpush3.msra.mxu1 %v424_v37 }
 0x291   : > { %7161 = vmatmul.mubr.msk.f32.vlgmr.msra.gmra.mrb[6].mxu1 %vm712_vm2, %v8096_v54  ;;  %7163 = vmatprep.subr.mxu1 %v9267_v3 }
 0x292   : > { %7164 = vmatpush3.msra.mxu1 %v456_v36  ;;  %7165 = vmatprep.mubr.msk.f32.mxu1 %vm7953_vm1, %v9267_v3  ;;  %v457_v40 = vpop.trf.xlu1 }
 0x293   : > { %v425_v41 = vpop.trf.xlu0  ;;  %7168 = vmatprep.subr.mxu1 %v9267_v3 }
 0x294   : > { %4389 = vrot.lane.b32.xlu0 %v8196_v24, %s7954_s27 }
 0x295   : > { %7166 = vmatmul.mubr.msk.f32.vlgmr.msra.gmra.mrb[8].mxu1 %vm712_vm2, %v8094_v51 }
 0x296   : > { %v8256_v42 = vpop.trf.xlu1  ;;  %7170 = vmatprep.mubr.msk.f32.mxu1 %vm7953_vm1, %v9267_v3 }
 0x297   : > { %v8260_v43 = vpop.trf.xlu0 }
 0x298   : > { %4541 = vrot.lane.b32.xlu0 %v8226_v33, %s7954_s27 }
 0x29a   : > { %v8264_v44 = vpop.trf.xlu1 }
 0x29b   : > { %v8266_v45 = vpop.trf.xlu0 }
 0x29c   : > { %4693 = vrot.lane.b32.xlu0 %v8176_v10, %s7954_s27 }
 0x29e   : > { %v520_v48 = vpop.trf.xlu1 }
 0x29f   : > { %v488_v49 = vpop.trf.xlu0 }
 0x2a0   : > { %7169 = vmatpush3.msra.mxu1 %v488_v49 }
 0x2a1   : > { %7171 = vmatmul.mubr.msk.f32.vlgmr.msra.gmra.mrb[10].mxu1 %vm712_vm2, %v8104_v57  ;;  %7173 = vmatprep.subr.mxu1 %v9267_v3 }
 0x2a2   : > { %7174 = vmatpush3.msra.mxu1 %v520_v48  ;;  %7175 = vmatprep.mubr.msk.f32.mxu1 %vm7953_vm1, %v9267_v3  ;;  %v521_v50 = vpop.trf.xlu1 }
 0x2a3   : > { %v489_v51 = vpop.trf.xlu0  ;;  %7178 = vmatprep.subr.mxu1 %v9267_v3 }
 0x2a5   : > { %7176 = vmatmul.mubr.msk.f32.vlgmr.msra.gmra.mrb[12].mxu1 %vm712_vm2, %v8102_v55 }
 0x2a6   : > { %v8278_v52 = vpop.trf.xlu1  ;;  %7180 = vmatprep.mubr.msk.f32.mxu1 %vm7953_vm1, %v9267_v3 }
 0x2a7   : > { %v8282_v53 = vpop.trf.xlu0 }
 0x2aa   : > { %v8286_v56 = vpop.trf.xlu1 }
 0x2ab   : > { %v8284_v54 = vpop.trf.xlu0 }
 0x2af   : > { %v552_v57 = vpop.trf.xlu0 }
 0x2b0   : > { %7179 = vmatpush3.msra.mxu1 %v552_v57 }
 0x2b1   : > { %7181 = vmatmul.mubr.msk.f32.vlgmr.msra.gmra.mrb[14].mxu1 %vm712_vm2, %v8131_v62  ;;  %7183 = vmatprep.subr.mxu1 %v9267_v3 }
 0x2b2   : > { %v584_v58 = vpop.trf.xlu1  ;;  %7185 = vmatprep.mubr.msk.f32.mxu1 %vm7953_vm1, %v9267_v3 }
 0x2b3   : > { %7184 = vmatpush3.msra.mxu1 %v584_v58  ;;  %v553_v55 = vpop.trf.xlu0 }
 0x2b4   : > { %7193 = vmatprep.subr.mxu1 %v9267_v3 }
 0x2b5   : > { %7186 = vmatmul.mubr.msk.f32.vlgmr.msra.gmra.mrb[16].mxu1 %vm712_vm2, %v8126_v61 }
 0x2b6   : > { %v585_v59 = vpop.trf.xlu1  ;;  %7195 = vmatprep.mubr.msk.f32.mxu1 %vm7953_vm1, %v9267_v3 }
 0x2b7   : > { %v8298_v60 = vpop.trf.xlu0 }
 0x2ba   : > { %v586_v62 = vpop.trf.xlu1 }
 0x2bb   : > { %v8300_v1 = vpop.trf.xlu0 }
 0x2be   : > { %v8302_v2 = vpop.trf.xlu1 }
 0x2c2   : > { %v648_v4 = vpop.trf.xlu1 }
 0x2c3   : > { %7194 = vmatpush3.msra.mxu1 %v648_v4  ;;  %v616_v5 = vpop.trf.xlu0 }
 0x2c4   : > { %7189 = vmatpush3.msra.mxu0 %v616_v5  ;;  %7196 = vmatmul.mubr.msk.f32.vlgmr.msra.gmra.mrb[18].mxu1 %vm712_vm2, %v8148_v63 }
 0x2c5   : > { %7203 = vmatprep.subr.mxu1 %v9267_v3  ;;  %7191 = vmatmul.mubr.msk.f32.vlgmr.msra.gmra.mrb[2].mxu0 %vm712_vm2, %v8153_v0 }
 0x2c6   : > { %7198 = vmatprep.subr.mxu0 %v9267_v3  ;;  %7204 = vmatpush3.msra.mxu1 %v457_v40  ;;  %v649_v63 = vpop.trf.xlu1 }
 0x2c7   : > { %7199 = vmatpush3.msra.mxu0 %v425_v41  ;;  %7205 = vmatprep.mubr.msk.f32.mxu1 %vm7953_vm1, %v9267_v3  ;;  %v617_v61 = vpop.trf.xlu0 }
 0x2c8   : > { %7213 = vmatprep.subr.mxu1 %v9267_v3  ;;  %7200 = vmatprep.mubr.msk.f32.mxu0 %vm7953_vm1, %v9267_v3 }
 0x2c9   : > { %7206 = vmatmul.mubr.msk.f32.vlgmr.msra.gmra.mrb[20].mxu1 %vm712_vm2, %v8168_v6  ;;  %7208 = vmatprep.subr.mxu0 %v9267_v3 }
 0x2ca   : > { %7214 = vmatpush3.msra.mxu1 %v521_v50  ;;  %7201 = vmatmul.mubr.msk.f32.vlgmr.msra.gmra.mrb[4].mxu0 %vm712_vm2, %v8170_v7  ;;  %v650_v6 = vpop.trf.xlu1 }
 0x2cb   : > { %7209 = vmatpush3.msra.mxu0 %v489_v51  ;;  %7215 = vmatprep.mubr.msk.f32.mxu1 %vm7953_vm1, %v9267_v3  ;;  %v618_v0 = vpop.trf.xlu0 }
 0x2cc   : > { %7223 = vmatprep.subr.mxu1 %v9267_v3  ;;  %7210 = vmatprep.mubr.msk.f32.mxu0 %vm7953_vm1, %v9267_v3 }
 0x2cd   : > { %7216 = vmatmul.mubr.msk.f32.vlgmr.msra.gmra.mrb[22].mxu1 %vm712_vm2, %v8172_v8  ;;  %7218 = vmatprep.subr.mxu0 %v9267_v3 }
 0x2ce   : > { %7224 = vmatpush3.msra.mxu1 %v585_v59  ;;  %7211 = vmatmul.mubr.msk.f32.vlgmr.msra.gmra.mrb[6].mxu0 %vm712_vm2, %v8192_v18  ;;  %v651_v8 = vpop.trf.xlu1 }
 0x2cf   : > { %7219 = vmatpush3.msra.mxu0 %v553_v55  ;;  %7225 = vmatprep.mubr.msk.f32.mxu1 %vm7953_vm1, %v9267_v3  ;;  %v619_v7 = vpop.trf.xlu0 }
 0x2d0   : > { %7220 = vmatprep.mubr.msk.f32.mxu0 %vm7953_vm1, %v9267_v3  ;;  %7233 = vmatprep.subr.mxu1 %v9267_v3 }
 0x2d1   : > { %7226 = vmatmul.mubr.msk.f32.vlgmr.msra.gmra.mrb[24].mxu1 %vm712_vm2, %v8196_v24  ;;  %7228 = vmatprep.subr.mxu0 %v9267_v3 }
 0x2d2   : > { %7221 = vmatmul.mubr.msk.f32.vlgmr.msra.gmra.mrb[8].mxu0 %vm712_vm2, %v8194_v21  ;;  %7234 = vmatpush3.msra.mxu1 %v649_v63 }
 0x2d3   : > { %7229 = vmatpush3.msra.mxu0 %v617_v61  ;;  %7235 = vmatprep.mubr.msk.f32.mxu1 %vm7953_vm1, %v9267_v3 }
 0x2d4   : > { %7243 = vmatprep.subr.mxu1 %v9267_v3  ;;  %7230 = vmatprep.mubr.msk.f32.mxu0 %vm7953_vm1, %v9267_v3 }
 0x2d5   : > { %7236 = vmatmul.mubr.msk.f32.vlgmr.msra.gmra.mrb[26].mxu1 %vm712_vm2, %v8226_v33  ;;  %7238 = vmatprep.subr.mxu0 %v9267_v3 }
 0x2d6   : > { %7244 = vmatpush3.msra.mxu1 %v8256_v42  ;;  %7231 = vmatmul.mubr.msk.f32.vlgmr.msra.gmra.mrb[10].mxu0 %vm712_vm2, %v8232_v34 }
 0x2d7   : > { %7239 = vmatpush3.msra.mxu0 %v8260_v43  ;;  %7245 = vmatprep.mubr.msk.f32.mxu1 %vm7953_vm1, %v9267_v3 }
 0x2d8   : > { %7253 = vmatprep.subr.mxu1 %v9267_v3  ;;  %7240 = vmatprep.mubr.msk.f32.mxu0 %vm7953_vm1, %v9267_v3 }
 0x2d9   : > { %7246 = vmatmul.mubr.msk.f32.vlgmr.msra.gmra.mrb[28].mxu1 %vm712_vm2, %v8176_v10  ;;  %7248 = vmatprep.subr.mxu0 %v9267_v3 }
 0x2da   : > { %7254 = vmatpush3.msra.mxu1 %v8278_v52  ;;  %7241 = vmatmul.mubr.msk.f32.vlgmr.msra.gmra.mrb[12].mxu0 %vm712_vm2, %v8174_v9 }
 0x2db   : > { %7249 = vmatpush3.msra.mxu0 %v8282_v53  ;;  %7255 = vmatprep.mubr.msk.f32.mxu1 %vm7953_vm1, %v9267_v3  ;;  %v8425_v10 = vpop.permute.xlu1 %710 }
 0x2dc   : > { %7263 = vmatprep.subr.mxu1 %v9267_v3  ;;  %7250 = vmatprep.mubr.msk.f32.mxu0 %vm7953_vm1, %v9267_v3 }
 0x2dd   : > { %7256 = vmatmul.mubr.msk.f32.vlgmr.msra.gmra.mrb[30].mxu1 %vm712_vm2, %v8180_v12  ;;  %7258 = vmatprep.subr.mxu0 %v9267_v3 }
 0x2de   : > { %7264 = vmatpush3.msra.mxu1 %v586_v62  ;;  %7251 = vmatmul.mubr.msk.f32.vlgmr.msra.gmra.mrb[14].mxu0 %vm712_vm2, %v8178_v11 }
 0x2df   : > { %7259 = vmatpush3.msra.mxu0 %v8298_v60  ;;  %7265 = vmatprep.mubr.msk.f32.mxu1 %vm7953_vm1, %v9267_v3  ;;  %v3402_v19 = vpop.permute.xlu1 %3401 }
 0x2e0   : > { %7260 = vmatprep.mubr.msk.f32.mxu0 %vm7953_vm1, %v9267_v3  ;;  %7273 = vmatprep.subr.mxu1 %v9267_v3 }
 0x2e1   : > { %7266 = vmatmul.mubr.msk.f32.vlgmr.msra.gmra.mrb[32].mxu1 %vm712_vm2, %v8190_v17  ;;  %7268 = vmatprep.subr.mxu0 %v9267_v3 }
 0x2e2   : > { %7261 = vmatmul.mubr.msk.f32.vlgmr.msra.gmra.mrb[16].mxu0 %vm712_vm2, %v8198_v25  ;;  %7274 = vmatpush3.msra.mxu1 %v650_v6 }
 0x2e3   : > { %7269 = vmatpush3.msra.mxu0 %v618_v0  ;;  %7275 = vmatprep.mubr.msk.f32.mxu1 %vm7953_vm1, %v9267_v3 }
 0x2e4   : > { %7283 = vmatprep.subr.mxu1 %v9267_v3  ;;  %7270 = vmatprep.mubr.msk.f32.mxu0 %vm7953_vm1, %v9267_v3 }
 0x2e5   : > { %7276 = vmatmul.mubr.msk.f32.vlgmr.msra.gmra.mrb[34].mxu1 %vm712_vm2, %v8204_v29  ;;  %7278 = vmatprep.subr.mxu0 %v9267_v3 }
 0x2e6   : > { %7284 = vmatpush3.msra.mxu1 %v8264_v44  ;;  %7271 = vmatmul.mubr.msk.f32.vlgmr.msra.gmra.mrb[18].mxu0 %vm712_vm2, %v8238_v35 }
 0x2e7   : > { %7279 = vmatpush3.msra.mxu0 %v8266_v45  ;;  %7285 = vmatprep.mubr.msk.f32.mxu1 %vm7953_vm1, %v9267_v3 }
 0x2e8   : > { %7293 = vmatprep.subr.mxu1 %v9267_v3  ;;  %7280 = vmatprep.mubr.msk.f32.mxu0 %vm7953_vm1, %v9267_v3 }
 0x2e9   : > { %7286 = vmatmul.mubr.msk.f32.vlgmr.msra.gmra.mrb[36].mxu1 %vm712_vm2, %v8184_v14  ;;  %7288 = vmatprep.subr.mxu0 %v9267_v3 }
 0x2ea   : > { %7294 = vmatpush3.msra.mxu1 %v8286_v56  ;;  %7281 = vmatmul.mubr.msk.f32.vlgmr.msra.gmra.mrb[20].mxu0 %vm712_vm2, %v8182_v13  ;;  %v8420_v9 = vpop.permute.xlu0 %708 }
 0x2eb   : > { %7289 = vmatpush3.msra.mxu0 %v8284_v54  ;;  %7295 = vmatprep.mubr.msk.f32.mxu1 %vm7953_vm1, %v9267_v3 }
 0x2ec   : > { %7303 = vmatprep.subr.mxu1 %v9267_v3  ;;  %7290 = vmatprep.mubr.msk.f32.mxu0 %vm7953_vm1, %v9267_v3 }
 0x2ed   : > { %7296 = vmatmul.mubr.msk.f32.vlgmr.msra.gmra.mrb[38].mxu1 %vm712_vm2, %v8188_v16  ;;  %7298 = vmatprep.subr.mxu0 %v9267_v3 }
 0x2ee   : > { %7304 = vmatpush3.msra.mxu1 %v8302_v2  ;;  %7291 = vmatmul.mubr.msk.f32.vlgmr.msra.gmra.mrb[22].mxu0 %vm712_vm2, %v8186_v15  ;;  %v3478_v18 = vpop.permute.xlu0 %3477 }
 0x2ef   : > { %7299 = vmatpush3.msra.mxu0 %v8300_v1  ;;  %7305 = vmatprep.mubr.msk.f32.mxu1 %vm7953_vm1, %v9267_v3 }
 0x2f0   : > { %7300 = vmatprep.mubr.msk.f32.mxu0 %vm7953_vm1, %v9267_v3  ;;  %7313 = vmatprep.subr.mxu1 %v9267_v3 }
 0x2f1   : > { %7306 = vmatmul.mubr.msk.f32.vlgmr.msra.gmra.mrb[40].mxu1 %vm712_vm2, %v8200_v26  ;;  %7308 = vmatprep.subr.mxu0 %v9267_v3 }
 0x2f2   : > { %7301 = vmatmul.mubr.msk.f32.vlgmr.msra.gmra.mrb[24].mxu0 %vm712_vm2, %v8202_v27  ;;  %7314 = vmatpush3.msra.mxu1 %v651_v8 }
 0x2f3   : > { %7309 = vmatpush3.msra.mxu0 %v619_v7  ;;  %7315 = vmatprep.mubr.msk.f32.mxu1 %vm7953_vm1, %v9267_v3 }
 0x2f4   : > { %7323 = vmatprep.subr.mxu1 %v9267_v3  ;;  %7310 = vmatprep.mubr.msk.f32.mxu0 %vm7953_vm1, %v9267_v3 }
 0x2f5   : > { %7316 = vmatmul.mubr.msk.f32.vlgmr.msra.gmra.mrb[42].mxu1 %vm712_vm2, %v8425_v10  ;;  %7318 = vmatprep.subr.mxu0 %v9267_v3 }
 0x2f6   : > { %7324 = vmatpush3.msra.mxu1 %v3478_v18  ;;  %7311 = vmatmul.mubr.msk.f32.vlgmr.msra.gmra.mrb[26].mxu0 %vm712_vm2, %v8420_v9 }
 0x2f7   : > { %7319 = vmatpush3.msra.mxu0 %v3402_v19  ;;  %7320 = vmatprep.mubr.msk.f32.mxu0 %vm7953_vm1, %v9267_v3 }
 0x2f8   : > { %7328 = vmatprep.subr.mxu0 %v9267_v3  ;;  %7325 = vmatprep.mubr.msk.f32.mxu1 %vm7953_vm1, %v9267_v3 }
 0x2f9   : > { %7333 = vmatprep.subr.mxu1 %v9267_v3 }
 0x364   : > { %v781_v20 = vpop.f32.mrb[6].mxu1 }
 0x365   : > { %v8451_v21 = vmul.f32 0.35355338, %v781_v20  ;;  %v7162_v24 = vpop.f32.mrb[7].mxu1 }
 0x367   : > { %v3049_v28 = vsel %vm712_vm2, %v8451_v21, -inf }
 0x368   : > { %3050 = vmax.xlane.f32.xlu0 %v3049_v28  ;;  %v853_v32 = vpop.f32.mrb[8].mxu1 }
 0x369   : > { %v8455_v33 = vmul.f32 0.35355338, %v853_v32  ;;  %v7167_v34 = vpop.f32.mrb[9].mxu1 }
 0x36b   : > { %v3052_v36 = vsel %vm712_vm2, %v8455_v33, -inf }
 0x36c   : > { %3053 = vmax.xlane.f32.xlu1 %v3052_v36 }
 0x374   : > { %v925_v37 = vpop.f32.mrb[10].mxu1 }
 0x375   : > { %v8459_v40 = vmul.f32 0.35355338, %v925_v37  ;;  %v7172_v41 = vpop.f32.mrb[11].mxu1 }
 0x377   : > { %v3055_v42 = vsel %vm712_vm2, %v8459_v40, -inf }
 0x378   : > { %3056 = vmax.xlane.f32.xlu0 %v3055_v42  ;;  %v997_v43 = vpop.f32.mrb[12].mxu1 }
 0x379   : > { %v8463_v44 = vmul.f32 0.35355338, %v997_v43  ;;  %v7177_v45 = vpop.f32.mrb[13].mxu1 }
 0x37b   : > { %v3058_v48 = vsel %vm712_vm2, %v8463_v44, -inf }
 0x37c   : > { %3059 = vmax.xlane.f32.xlu0 %v3058_v48 }
 0x384   : > { %v1069_v49 = vpop.f32.mrb[14].mxu1 }
 0x385   : > { %v7182_v50 = vpop.f32.mrb[15].mxu1  ;;  %v8485_v7 = vmul.f32 0.35355338, %v1069_v49 }
 0x387   : > { %v3061_v37 = vsel %vm712_vm2, %v8485_v7, -inf }
 0x388   : > { %v1141_v51 = vpop.f32.mrb[16].mxu1 }
 0x389   : > { %v8467_v52 = vmul.f32 0.35355338, %v1141_v51  ;;  %v7187_v53 = vpop.f32.mrb[17].mxu1 }
 0x38b   : > { %v3064_v54 = vsel %vm712_vm2, %v8467_v52, -inf }
 0x38c   : > { %3065 = vmax.xlane.f32.xlu0 %v3064_v54 }
 0x397   : > { %v1285_v56 = vpop.f32.mrb[18].mxu1 }
 0x398   : > { %v8471_v57 = vmul.f32 0.35355338, %v1285_v56  ;;  %v1213_v58 = vpop.f32.mrb[2].mxu0  ;;  %v7197_v55 = vpop.f32.mrb[19].mxu1 }
 0x399   : > { %v8473_v59 = vmul.f32 0.35355338, %v1213_v58  ;;  %v7192_v60 = vpop.f32.mrb[3].mxu0 }
 0x39a   : > { %v3070_v62 = vsel %vm712_vm2, %v8471_v57, -inf }
 0x39b   : > { %3071 = vmax.xlane.f32.xlu0 %v3070_v62  ;;  %v3067_v1 = vsel %vm712_vm2, %v8473_v59, -inf }
 0x39c   : > { %v1429_v2 = vpop.f32.mrb[20].mxu1  ;;  %3068 = vmax.xlane.f32.xlu1 %v3067_v1 }
 0x39d   : > { %v8479_v4 = vmul.f32 0.35355338, %v1429_v2  ;;  %v7207_v5 = vpop.f32.mrb[21].mxu1  ;;  %v1357_v61 = vpop.f32.mrb[4].mxu0 }
 0x39e   : > { %v8481_v63 = vmul.f32 0.35355338, %v1357_v61  ;;  %v7202_v0 = vpop.f32.mrb[5].mxu0 }
 0x39f   : > { %v3076_v6 = vsel %vm712_vm2, %v8479_v4, -inf }
 0x3a0   : > { %3077 = vmax.xlane.f32.xlu0 %v3076_v6  ;;  %v1573_v8 = vpop.f32.mrb[22].mxu1  ;;  %v3073_v18 = vsel %vm712_vm2, %v8481_v63, -inf }
 0x3a1   : > { %v8489_v19 = vmul.f32 0.35355338, %v1573_v8  ;;  %v7217_v20 = vpop.f32.mrb[23].mxu1  ;;  %3074 = vmax.xlane.f32.xlu1 %v3073_v18  ;;  %v1501_v24 = vpop.f32.mrb[6].mxu0 }
 0x3a2   : > { %v7212_v28 = vpop.f32.mrb[7].mxu0  ;;  %v8493_v34 = vmul.f32 0.35355338, %v1501_v24 }
 0x3a3   : > { %v3082_v32 = vsel %vm712_vm2, %v8489_v19, -inf }
 0x3a4   : > { %3083 = vmax.xlane.f32.xlu0 %v3082_v32  ;;  %v1717_v36 = vpop.f32.mrb[24].mxu1  ;;  %v3079_v51 = vsel %vm712_vm2, %v8493_v34, -inf }
 0x3a5   : > { %v8497_v41 = vmul.f32 0.35355338, %v1717_v36  ;;  %v7227_v42 = vpop.f32.mrb[25].mxu1  ;;  %3062 = vmax.xlane.f32.xlu1 %v3061_v37  ;;  %v1645_v43 = vpop.f32.mrb[8].mxu0 }
 0x3a6   : > { %v7222_v45 = vpop.f32.mrb[9].mxu0  ;;  %v8501_v49 = vmul.f32 0.35355338, %v1645_v43 }
 0x3a7   : > { %v3088_v48 = vsel %vm712_vm2, %v8497_v41, -inf }
 0x3a8   : > { %3089 = vmax.xlane.f32.xlu0 %v3088_v48  ;;  %v1861_v50 = vpop.f32.mrb[26].mxu1  ;;  %v3085_v1 = vsel %vm712_vm2, %v8501_v49, -inf }
 0x3a9   : > { %v8505_v53 = vmul.f32 0.35355338, %v1861_v50  ;;  %v7237_v54 = vpop.f32.mrb[27].mxu1  ;;  %3080 = vmax.xlane.f32.xlu1 %v3079_v51  ;;  %v1789_v56 = vpop.f32.mrb[10].mxu0 }
 0x3aa   : > { %v7232_v58 = vpop.f32.mrb[11].mxu0  ;;  %v8509_v60 = vmul.f32 0.35355338, %v1789_v56 }
 0x3ab   : > { %v3094_v55 = vsel %vm712_vm2, %v8505_v53, -inf }
 0x3ac   : > { %3095 = vmax.xlane.f32.xlu0 %v3094_v55  ;;  %v2005_v62 = vpop.f32.mrb[28].mxu1  ;;  %v3091_v20 = vsel %vm712_vm2, %v8509_v60, -inf }
 0x3ad   : > { %v8513_v2 = vmul.f32 0.35355338, %v2005_v62  ;;  %v7247_v5 = vpop.f32.mrb[29].mxu1  ;;  %3086 = vmax.xlane.f32.xlu1 %v3085_v1  ;;  %v1933_v61 = vpop.f32.mrb[12].mxu0 }
 0x3ae   : > { %v7242_v0 = vpop.f32.mrb[13].mxu0  ;;  %v8517_v8 = vmul.f32 0.35355338, %v1933_v61 }
 0x3af   : > { %v3100_v6 = vsel %vm712_vm2, %v8513_v2, -inf }
 0x3b0   : > { %3101 = vmax.xlane.f32.xlu0 %v3100_v6  ;;  %v2149_v18 = vpop.f32.mrb[30].mxu1  ;;  %v3097_v45 = vsel %vm712_vm2, %v8517_v8, -inf }
 0x3b1   : > { %v8521_v24 = vmul.f32 0.35355338, %v2149_v18  ;;  %v7257_v28 = vpop.f32.mrb[31].mxu1  ;;  %3092 = vmax.xlane.f32.xlu1 %v3091_v20  ;;  %v2077_v32 = vpop.f32.mrb[14].mxu0 }
 0x3b2   : > { %v7252_v36 = vpop.f32.mrb[15].mxu0  ;;  %v8525_v42 = vmul.f32 0.35355338, %v2077_v32 }
 0x3b3   : > { %v3106_v37 = vsel %vm712_vm2, %v8521_v24, -inf }
 0x3b4   : > { %3107 = vmax.xlane.f32.xlu0 %v3106_v37  ;;  %v2293_v43 = vpop.f32.mrb[32].mxu1  ;;  %v3103_v62 = vsel %vm712_vm2, %v8525_v42, -inf }
 0x3b5   : > { %v8529_v48 = vmul.f32 0.35355338, %v2293_v43  ;;  %v7267_v50 = vpop.f32.mrb[33].mxu1  ;;  %3098 = vmax.xlane.f32.xlu1 %v3097_v45  ;;  %v2221_v51 = vpop.f32.mrb[16].mxu0 }
 0x3b6   : > { %v7262_v54 = vpop.f32.mrb[17].mxu0  ;;  %v8533_v58 = vmul.f32 0.35355338, %v2221_v51 }
 0x3b7   : > { %v3112_v56 = vsel %vm712_vm2, %v8529_v48, -inf }
 0x3b8   : > { %3113 = vmax.xlane.f32.xlu0 %v3112_v56  ;;  %v2437_v55 = vpop.f32.mrb[34].mxu1  ;;  %v3109_v28 = vsel %vm712_vm2, %v8533_v58, -inf }
 0x3b9   : > { %v8537_v1 = vmul.f32 0.35355338, %v2437_v55  ;;  %v7277_v5 = vpop.f32.mrb[35].mxu1  ;;  %3104 = vmax.xlane.f32.xlu1 %v3103_v62  ;;  %v2365_v61 = vpop.f32.mrb[18].mxu0 }
 0x3ba   : > { %v7272_v0 = vpop.f32.mrb[19].mxu0  ;;  %v8541_v18 = vmul.f32 0.35355338, %v2365_v61 }
 0x3bb   : > { %v3118_v6 = vsel %vm712_vm2, %v8537_v1, -inf }
 0x3bc   : > { %3119 = vmax.xlane.f32.xlu0 %v3118_v6  ;;  %v2581_v20 = vpop.f32.mrb[36].mxu1  ;;  %v3115_v54 = vsel %vm712_vm2, %v8541_v18, -inf }
 0x3bd   : > { %v8545_v32 = vmul.f32 0.35355338, %v2581_v20  ;;  %v7287_v36 = vpop.f32.mrb[37].mxu1  ;;  %3110 = vmax.xlane.f32.xlu1 %v3109_v28  ;;  %v2509_v37 = vpop.f32.mrb[20].mxu0 }
 0x3be   : > { %v7282_v43 = vpop.f32.mrb[21].mxu0  ;;  %v8549_v50 = vmul.f32 0.35355338, %v2509_v37 }
 0x3bf   : > { %v3124_v45 = vsel %vm712_vm2, %v8545_v32, -inf }
 0x3c0   : > { %3125 = vmax.xlane.f32.xlu0 %v3124_v45  ;;  %v2725_v51 = vpop.f32.mrb[38].mxu1  ;;  %v3121_v20 = vsel %vm712_vm2, %v8549_v50, -inf  ;;  %v8563_v45 = vpop.permute.xlu0 %3629 }
 0x3c1   : > { %v8553_v56 = vmul.f32 0.35355338, %v2725_v51  ;;  %v7297_v55 = vpop.f32.mrb[39].mxu1  ;;  %3116 = vmax.xlane.f32.xlu1 %v3115_v54  ;;  %v2653_v62 = vpop.f32.mrb[22].mxu0 }
 0x3c2   : > { %v7292_v5 = vpop.f32.mrb[23].mxu0  ;;  %v8557_v0 = vmul.f32 0.35355338, %v2653_v62 }
 0x3c3   : > { %v3130_v61 = vsel %vm712_vm2, %v8553_v56, -inf }
 0x3c4   : > { %3131 = vmax.xlane.f32.xlu0 %v3130_v61  ;;  %v2869_v6 = vpop.f32.mrb[40].mxu1  ;;  %v3127_v62 = vsel %vm712_vm2, %v8557_v0, -inf }
 0x3c5   : > { %v8561_v28 = vmul.f32 0.35355338, %v2869_v6  ;;  %v7307_v36 = vpop.f32.mrb[41].mxu1  ;;  %3122 = vmax.xlane.f32.xlu1 %v3121_v20  ;;  %v2797_v37 = vpop.f32.mrb[24].mxu0 }
 0x3c6   : > { %v7302_v43 = vpop.f32.mrb[25].mxu0  ;;  %v8567_v54 = vmul.f32 0.35355338, %v2797_v37  ;;  %v8573_v36 = vpop.permute.xlu1 %3553 }
 0x3c7   : > { %v3136_v51 = vsel %vm712_vm2, %v8561_v28, -inf }
 0x3c8   : > { %3137 = vmax.xlane.f32.xlu0 %v3136_v51  ;;  %v3013_v55 = vpop.f32.mrb[42].mxu1  ;;  %v3133_v37 = vsel %vm712_vm2, %v8567_v54, -inf  ;;  %v8581_v51 = vpop.permute.xlu0 %3781 }
 0x3c9   : > { %v8571_v5 = vmul.f32 0.35355338, %v3013_v55  ;;  %v7317_v61 = vpop.f32.mrb[43].mxu1  ;;  %3128 = vmax.xlane.f32.xlu1 %v3127_v62  ;;  %v2941_v6 = vpop.f32.mrb[26].mxu0 }
 0x3ca   : > { %v7312_v20 = vpop.f32.mrb[27].mxu0  ;;  %v8577_v3 = vmul.f32 0.35355338, %v2941_v6  ;;  %v8585_v62 = vpop.permute.xlu1 %3705 }
 0x3cb   : > { %v3142_v43 = vsel %vm712_vm2, %v8571_v5, -inf }
 0x3cc   : > { %3143 = vmax.xlane.f32.xlu0 %v3142_v43  ;;  %v3139_v55 = vsel %vm712_vm2, %v8577_v3, -inf  ;;  %v8587_v61 = vpop.permute.xlu0 %3933 }
 0x3cd   : > { %3134 = vmax.xlane.f32.xlu1 %v3133_v37  ;;  %9292 = vst [vmem:[#allocation16_spill] sm:$0xff] %v8587_v61 }
 0x3ce   : > { %v8589_v20 = vpop.permute.xlu1 %3857 }
 0x3cf   : > { %9293 = vst [vmem:[#allocation17_spill] sm:$0xff] %v8589_v20 }
 0x3d0   : > { %v8591_v46 = vpop.permute.xlu0 %4085 }
 0x3d1   : > { %3140 = vmax.xlane.f32.xlu1 %v3139_v55  ;;  %9294 = vst [vmem:[#allocation18_spill] sm:$0xff] %v8591_v46 }
 0x3d2   : > { %v8593_v6 = vpop.permute.xlu1 %4009 }
 0x3d3   : > { %9295 = vst [vmem:[#allocation19_spill] sm:$0xff] %v8593_v6 }
 0x3d4   : > { %v8595_v43 = vpop.permute.xlu0 %4237 }
 0x3d5   : > { %9296 = vst [vmem:[#allocation20_spill] sm:$0xff] %v8595_v43 }
 0x3d6   : > { %v8597_v47 = vpop.permute.xlu1 %4161 }
 0x3d7   : > { %9297 = vst [vmem:[#allocation21_spill] sm:$0xff] %v8597_v47 }
 0x3d8   : > { %v8599_v38 = vpop.permute.xlu0 %4389 }
 0x3d9   : > { %9298 = vst [vmem:[#allocation22_spill] sm:$0xff] %v8599_v38 }
 0x3da   : > { %v8601_v37 = vpop.permute.xlu1 %4313 }
 0x3db   : > { %9299 = vst [vmem:[#allocation23_spill] sm:$0xff] %v8601_v37 }
 0x3dc   : > { %v8603_v39 = vpop.permute.xlu0 %4541 }
 0x3dd   : > { %9300 = vst [vmem:[#allocation24_spill] sm:$0xff] %v8603_v39 }
 0x3de   : > { %v8605_v30 = vpop.permute.xlu1 %4465 }
 0x3df   : > { %9301 = vst [vmem:[#allocation25_spill] sm:$0xff] %v8605_v30 }
 0x3e0   : > { %v8607_v55 = vpop.permute.xlu0 %4693 }
 0x3e1   : > { %9302 = vst [vmem:[#allocation26_spill] sm:$0xff] %v8607_v55 }
 0x3e2   : > { %v8609_v23 = vpop.permute.xlu1 %4617 }
 0x3e3   : > { %9303 = vst [vmem:[#allocation27_spill] sm:$0xff] %v8609_v23 }
 0x3f5   : > { %v3051_v22 = vpop.xlane.xlu0 %3050 }
 0x3f6   : > { %v3145_v31 = vsub.f32 %v8451_v21, %v3051_v22 }
 0x3f8   : > { %v3177_v6 = vmul.f32 1.442695, %v3145_v31 }
 0x3f9   : > { %v3054_v20 = vpop.xlane.xlu1 %3053 }
 0x3fa   : > { %7688 = vpow2.f32 %v3177_v6  ;;  %v3146_v47 = vsub.f32 %v8455_v33, %v3054_v20 }
 0x3fc   : > { %v3179_v43 = vmul.f32 1.442695, %v3146_v47 }
 0x3fe   : > { %7690 = vpow2.f32 %v3179_v43 }
 0x404   : > { %v8613_v38 = vpop.eup %7688 }
 0x405   : > { %v3057_v37 = vpop.xlane.xlu0 %3056  ;;  %v3241_v30 = vsel %vm712_vm2, %v8613_v38, 0.0 }
 0x406   : > { %v3147_v55 = vsub.f32 %v8459_v40, %v3057_v37  ;;  %3242 = vadd.xlane.f32.xlu1 %v3241_v30 }
 0x408   : > { %v8618_v23 = vpop.eup %7690  ;;  %v3181_v39 = vmul.f32 1.442695, %v3147_v55 }
 0x409   : > { %v3060_v22 = vpop.xlane.xlu0 %3059  ;;  %v3244_v31 = vsel %vm712_vm2, %v8618_v23, 0.0 }
 0x40a   : > { %7692 = vpow2.f32 %v3181_v39  ;;  %v3148_v47 = vsub.f32 %v8463_v44, %v3060_v22  ;;  %3245 = vadd.xlane.f32.xlu0 %v3244_v31 }
 0x40c   : > { %v3183_v21 = vmul.f32 1.442695, %v3148_v47 }
 0x40e   : > { %7694 = vpow2.f32 %v3183_v21 }
 0x414   : > { %v8623_v33 = vpop.eup %7692 }
 0x415   : > { %v3247_v20 = vsel %vm712_vm2, %v8623_v33, 0.0 }
 0x416   : > { %3248 = vadd.xlane.f32.xlu1 %v3247_v20 }
 0x418   : > { %v8627_v30 = vpop.eup %7694 }
 0x419   : > { %v3066_v40 = vpop.xlane.xlu0 %3065  ;;  %v3250_v6 = vsel %vm712_vm2, %v8627_v30, 0.0 }
 0x41a   : > { %v3150_v43 = vsub.f32 %v8467_v52, %v3066_v40  ;;  %3251 = vadd.xlane.f32.xlu0 %v3250_v6 }
 0x41c   : > { %v3187_v39 = vmul.f32 1.442695, %v3150_v43 }
 0x41e   : > { %7696 = vpow2.f32 %v3187_v39 }
 0x428   : > { %v8632_v44 = vpop.eup %7696  ;;  %v3072_v37 = vpop.xlane.xlu0 %3071 }
 0x429   : > { %v3152_v55 = vsub.f32 %v8471_v57, %v3072_v37  ;;  %v3069_v22 = vpop.xlane.xlu1 %3068  ;;  %v3256_v31 = vsel %vm712_vm2, %v8632_v44, 0.0 }
 0x42a   : > { %v3151_v47 = vsub.f32 %v8473_v59, %v3069_v22  ;;  %3257 = vadd.xlane.f32.xlu0 %v3256_v31 }
 0x42b   : > { %v3191_v21 = vmul.f32 1.442695, %v3152_v55 }
 0x42c   : > { %v3189_v20 = vmul.f32 1.442695, %v3151_v47 }
 0x42d   : > { %7698 = vpow2.f32 %v3191_v21  ;;  %v3078_v46 = vpop.xlane.xlu0 %3077 }
 0x42e   : > { %7700 = vpow2.f32 %v3189_v20  ;;  %v3154_v52 = vsub.f32 %v8479_v4, %v3078_v46  ;;  %v3075_v40 = vpop.xlane.xlu1 %3074 }
 0x42f   : > { %v3153_v6 = vsub.f32 %v8481_v63, %v3075_v40 }
 0x430   : > { %v3195_v43 = vmul.f32 1.442695, %v3154_v52 }
 0x431   : > { %v3193_v39 = vmul.f32 1.442695, %v3153_v6  ;;  %v3084_v57 = vpop.xlane.xlu0 %3083 }
 0x432   : > { %7702 = vpow2.f32 %v3195_v43  ;;  %v3156_v37 = vsub.f32 %v8489_v19, %v3084_v57  ;;  %v3063_v61 = vpop.xlane.xlu1 %3062 }
 0x433   : > { %7704 = vpow2.f32 %v3193_v39  ;;  %v3149_v59 = vsub.f32 %v8485_v7, %v3063_v61 }
 0x434   : > { %v3199_v55 = vmul.f32 1.442695, %v3156_v37 }
 0x435   : > { %v3185_v22 = vmul.f32 1.442695, %v3149_v59  ;;  %v3090_v31 = vpop.xlane.xlu0 %3089 }
 0x436   : > { %7706 = vpow2.f32 %v3199_v55  ;;  %v3158_v47 = vsub.f32 %v8497_v41, %v3090_v31  ;;  %v3081_v46 = vpop.xlane.xlu1 %3080 }
 0x437   : > { %v8643_v4 = vpop.eup %7698  ;;  %7708 = vpow2.f32 %v3185_v22  ;;  %v3155_v63 = vsub.f32 %v8493_v34, %v3081_v46 }
 0x438   : > { %v8646_v21 = vpop.eup %7700  ;;  %v3203_v20 = vmul.f32 1.442695, %v3158_v47  ;;  %v3262_v19 = vsel %vm712_vm2, %v8643_v4, 0.0 }
 0x439   : > { %v3197_v52 = vmul.f32 1.442695, %v3155_v63  ;;  %v3096_v7 = vpop.xlane.xlu0 %3095  ;;  %3263 = vadd.xlane.f32.xlu0 %v3262_v19  ;;  %v3259_v61 = vsel %vm712_vm2, %v8646_v21, 0.0 }
 0x43a   : > { %7710 = vpow2.f32 %v3203_v20  ;;  %v3160_v41 = vsub.f32 %v8505_v53, %v3096_v7  ;;  %v3087_v40 = vpop.xlane.xlu1 %3086  ;;  %3260 = vadd.xlane.f32.xlu1 %v3259_v61 }
 0x43b   : > { %7712 = vpow2.f32 %v3197_v52  ;;  %v3157_v34 = vsub.f32 %v8501_v49, %v3087_v40 }
 0x43c   : > { %v8654_v6 = vpop.eup %7702  ;;  %v3207_v43 = vmul.f32 1.442695, %v3160_v41 }
 0x43d   : > { %v8656_v39 = vpop.eup %7704  ;;  %v3201_v57 = vmul.f32 1.442695, %v3157_v34  ;;  %v3102_v37 = vpop.xlane.xlu0 %3101  ;;  %v3268_v59 = vsel %vm712_vm2, %v8654_v6, 0.0 }
 0x43e   : > { %7714 = vpow2.f32 %v3207_v43  ;;  %v3162_v55 = vsub.f32 %v8513_v2, %v3102_v37  ;;  %v3093_v22 = vpop.xlane.xlu1 %3092  ;;  %3269 = vadd.xlane.f32.xlu0 %v3268_v59  ;;  %v3265_v53 = vsel %vm712_vm2, %v8656_v39, 0.0 }
 0x43f   : > { %7716 = vpow2.f32 %v3201_v57  ;;  %v3159_v49 = vsub.f32 %v8509_v60, %v3093_v22  ;;  %3266 = vadd.xlane.f32.xlu1 %v3265_v53 }
 0x440   : > { %v8664_v31 = vpop.eup %7706  ;;  %v3211_v47 = vmul.f32 1.442695, %v3162_v55 }
 0x441   : > { %v8666_v46 = vpop.eup %7708  ;;  %v3205_v63 = vmul.f32 1.442695, %v3159_v49  ;;  %v3108_v20 = vpop.xlane.xlu0 %3107  ;;  %v3274_v19 = vsel %vm712_vm2, %v8664_v31, 0.0 }
 0x442   : > { %7718 = vpow2.f32 %v3211_v47  ;;  %v3164_v2 = vsub.f32 %v8521_v24, %v3108_v20  ;;  %v3099_v52 = vpop.xlane.xlu1 %3098  ;;  %3275 = vadd.xlane.f32.xlu0 %v3274_v19  ;;  %v3253_v7 = vsel %vm712_vm2, %v8666_v46, 0.0 }
 0x443   : > { %7720 = vpow2.f32 %v3205_v63  ;;  %v3161_v60 = vsub.f32 %v8517_v8, %v3099_v52  ;;  %3254 = vadd.xlane.f32.xlu1 %v3253_v7 }
 0x444   : > { %v8674_v61 = vpop.eup %7710  ;;  %v3215_v41 = vmul.f32 1.442695, %v3164_v2 }
 0x445   : > { %v8676_v40 = vpop.eup %7712  ;;  %v3209_v34 = vmul.f32 1.442695, %v3161_v60  ;;  %v3114_v43 = vpop.xlane.xlu0 %3113  ;;  %v3280_v57 = vsel %vm712_vm2, %v8674_v61, 0.0 }
 0x446   : > { %7722 = vpow2.f32 %v3215_v41  ;;  %v3166_v24 = vsub.f32 %v8529_v48, %v3114_v43  ;;  %v3105_v37 = vpop.xlane.xlu1 %3104  ;;  %3281 = vadd.xlane.f32.xlu0 %v3280_v57  ;;  %v3271_v59 = vsel %vm712_vm2, %v8676_v40, 0.0 }
 0x447   : > { %7724 = vpow2.f32 %v3209_v34  ;;  %v3163_v8 = vsub.f32 %v8525_v42, %v3105_v37  ;;  %3272 = vadd.xlane.f32.xlu1 %v3271_v59 }
 0x448   : > { %v8684_v55 = vpop.eup %7714  ;;  %v3219_v22 = vmul.f32 1.442695, %v3166_v24 }
 0x449   : > { %v8686_v53 = vpop.eup %7716  ;;  %v3213_v49 = vmul.f32 1.442695, %v3163_v8  ;;  %v3120_v47 = vpop.xlane.xlu0 %3119  ;;  %v3286_v63 = vsel %vm712_vm2, %v8684_v55, 0.0 }
 0x44a   : > { %7726 = vpow2.f32 %v3219_v22  ;;  %v3168_v48 = vsub.f32 %v8537_v1, %v3120_v47  ;;  %v3111_v20 = vpop.xlane.xlu1 %3110  ;;  %3287 = vadd.xlane.f32.xlu0 %v3286_v63  ;;  %v3277_v19 = vsel %vm712_vm2, %v8686_v53, 0.0 }
 0x44b   : > { %7728 = vpow2.f32 %v3213_v49  ;;  %v3165_v42 = vsub.f32 %v8533_v58, %v3111_v20  ;;  %3278 = vadd.xlane.f32.xlu1 %v3277_v19 }
 0x44c   : > { %v8694_v2 = vpop.eup %7718  ;;  %v3223_v52 = vmul.f32 1.442695, %v3168_v48 }
 0x44d   : > { %v8696_v7 = vpop.eup %7720  ;;  %v3217_v60 = vmul.f32 1.442695, %v3165_v42  ;;  %v3126_v41 = vpop.xlane.xlu0 %3125  ;;  %v3292_v34 = vsel %vm712_vm2, %v8694_v2, 0.0 }
 0x44e   : > { %7730 = vpow2.f32 %v3223_v52  ;;  %v3170_v1 = vsub.f32 %v8545_v32, %v3126_v41  ;;  %v3117_v43 = vpop.xlane.xlu1 %3116  ;;  %3293 = vadd.xlane.f32.xlu0 %v3292_v34  ;;  %v3283_v57 = vsel %vm712_vm2, %v8696_v7, 0.0 }
 0x44f   : > { %7732 = vpow2.f32 %v3217_v60  ;;  %v3167_v58 = vsub.f32 %v8541_v18, %v3117_v43  ;;  %3284 = vadd.xlane.f32.xlu1 %v3283_v57 }
 0x450   : > { %v8704_v24 = vpop.eup %7722  ;;  %v3227_v37 = vmul.f32 1.442695, %v3170_v1 }
 0x451   : > { %v8706_v59 = vpop.eup %7724  ;;  %v3221_v8 = vmul.f32 1.442695, %v3167_v58  ;;  %v3132_v22 = vpop.xlane.xlu0 %3131  ;;  %v3298_v49 = vsel %vm712_vm2, %v8704_v24, 0.0 }
 0x452   : > { %7734 = vpow2.f32 %v3227_v37  ;;  %v3172_v32 = vsub.f32 %v8553_v56, %v3132_v22  ;;  %v3123_v47 = vpop.xlane.xlu1 %3122  ;;  %3299 = vadd.xlane.f32.xlu0 %v3298_v49  ;;  %v3289_v63 = vsel %vm712_vm2, %v8706_v59, 0.0 }
 0x453   : > { %7736 = vpow2.f32 %v3221_v8  ;;  %v3169_v18 = vsub.f32 %v8549_v50, %v3123_v47  ;;  %3290 = vadd.xlane.f32.xlu1 %v3289_v63 }
 0x454   : > { %v8714_v48 = vpop.eup %7726  ;;  %v3231_v20 = vmul.f32 1.442695, %v3172_v32 }
 0x455   : > { %v8716_v19 = vpop.eup %7728  ;;  %v3225_v42 = vmul.f32 1.442695, %v3169_v18  ;;  %v3138_v52 = vpop.xlane.xlu0 %3137  ;;  %v3304_v60 = vsel %vm712_vm2, %v8714_v48, 0.0 }
 0x456   : > { %7738 = vpow2.f32 %v3231_v20  ;;  %v3174_v56 = vsub.f32 %v8561_v28, %v3138_v52  ;;  %v3129_v41 = vpop.xlane.xlu1 %3128  ;;  %3305 = vadd.xlane.f32.xlu0 %v3304_v60  ;;  %v3295_v34 = vsel %vm712_vm2, %v8716_v19, 0.0 }
 0x457   : > { %7740 = vpow2.f32 %v3225_v42  ;;  %v3171_v50 = vsub.f32 %v8557_v0, %v3129_v41  ;;  %3296 = vadd.xlane.f32.xlu1 %v3295_v34 }
 0x458   : > { %v8724_v1 = vpop.eup %7730  ;;  %v3235_v43 = vmul.f32 1.442695, %v3174_v56 }
 0x459   : > { %v8726_v57 = vpop.eup %7732  ;;  %v3229_v58 = vmul.f32 1.442695, %v3171_v50  ;;  %v3144_v37 = vpop.xlane.xlu0 %3143  ;;  %v3310_v8 = vsel %vm712_vm2, %v8724_v1, 0.0 }
 0x45a   : > { %7742 = vpow2.f32 %v3235_v43  ;;  %v3176_v28 = vsub.f32 %v8571_v5, %v3144_v37  ;;  %v3135_v22 = vpop.xlane.xlu1 %3134  ;;  %3311 = vadd.xlane.f32.xlu0 %v3310_v8  ;;  %v3301_v49 = vsel %vm712_vm2, %v8726_v57, 0.0 }
 0x45b   : > { %7744 = vpow2.f32 %v3229_v58  ;;  %v3173_v0 = vsub.f32 %v8567_v54, %v3135_v22  ;;  %3302 = vadd.xlane.f32.xlu1 %v3301_v49 }
 0x45c   : > { %v8734_v32 = vpop.eup %7734  ;;  %v3239_v47 = vmul.f32 1.442695, %v3176_v28 }
 0x45d   : > { %v8736_v63 = vpop.eup %7736  ;;  %v3233_v18 = vmul.f32 1.442695, %v3173_v0  ;;  %v3316_v20 = vsel %vm712_vm2, %v8734_v32, 0.0 }
 0x45e   : > { %7746 = vpow2.f32 %v3239_v47  ;;  %v3141_v5 = vpop.xlane.xlu1 %3140  ;;  %3317 = vadd.xlane.f32.xlu0 %v3316_v20  ;;  %v3307_v42 = vsel %vm712_vm2, %v8736_v63, 0.0 }
 0x45f   : > { %7748 = vpow2.f32 %v3233_v18  ;;  %v3175_v52 = vsub.f32 %v8577_v3, %v3141_v5  ;;  %3308 = vadd.xlane.f32.xlu1 %v3307_v42  ;;  %v9306_v42 = vld [vmem:[#allocation18_spill] sm:$0xff] }
 0x460   : > { %v8743_v54 = vpop.eup %7738 }
 0x461   : > { %v8745_v60 = vpop.eup %7740  ;;  %v3237_v56 = vmul.f32 1.442695, %v3175_v52  ;;  %v3322_v41 = vsel %vm712_vm2, %v8743_v54, 0.0 }
 0x462   : > { %3323 = vadd.xlane.f32.xlu0 %v3322_v41  ;;  %v3313_v34 = vsel %vm712_vm2, %v8745_v60, 0.0 }
 0x463   : > { %7750 = vpow2.f32 %v3237_v56  ;;  %3314 = vadd.xlane.f32.xlu1 %v3313_v34 }
 0x464   : > { %v8751_v50 = vpop.eup %7742 }
 0x465   : > { %v8753_v43 = vpop.eup %7744  ;;  %v3328_v3 = vsel %vm712_vm2, %v8751_v50, 0.0 }
 0x466   : > { %3329 = vadd.xlane.f32.xlu0 %v3328_v3  ;;  %v3319_v58 = vsel %vm712_vm2, %v8753_v43, 0.0  ;;  %v9307_v3 = vld [vmem:[#allocation20_spill] sm:$0xff] }
 0x467   : > { %3320 = vadd.xlane.f32.xlu1 %v3319_v58 }
 0x468   : > { %v8759_v37 = vpop.eup %7746 }
 0x469   : > { %v8761_v8 = vpop.eup %7748  ;;  %v3334_v28 = vsel %vm712_vm2, %v8759_v37, 0.0 }
 0x46a   : > { %3335 = vadd.xlane.f32.xlu0 %v3334_v28  ;;  %v3325_v22 = vsel %vm712_vm2, %v8761_v8, 0.0 }
 0x46b   : > { %3326 = vadd.xlane.f32.xlu1 %v3325_v22 }
 0x46d   : > { %v8767_v49 = vpop.eup %7750 }
 0x46e   : > { %v3331_v0 = vsel %vm712_vm2, %v8767_v49, 0.0 }
 0x46f   : > { %3332 = vadd.xlane.f32.xlu1 %v3331_v0 }
 0x480   : > { %4769 = vrot.lane.b32.xlu1 %v8178_v11, %s7954_s27  ;;  %4845 = vrot.lane.b32.xlu0 %v8180_v12, %s7954_s27 }
 0x484   : > { %4921 = vrot.lane.b32.xlu1 %v8198_v25, %s7954_s27  ;;  %5073 = vrot.lane.b32.xlu0 %v8238_v35, %s7954_s27 }
 0x488   : > { %4997 = vrot.lane.b32.xlu1 %v8190_v17, %s7954_s27  ;;  %5225 = vrot.lane.b32.xlu0 %v8182_v13, %s7954_s27 }
 0x48c   : > { %5149 = vrot.lane.b32.xlu1 %v8204_v29, %s7954_s27  ;;  %5377 = vrot.lane.b32.xlu0 %v8186_v15, %s7954_s27 }
 0x490   : > { %5301 = vrot.lane.b32.xlu1 %v8184_v14, %s7954_s27  ;;  %5529 = vrot.lane.b32.xlu0 %v8202_v27, %s7954_s27 }
 0x493   : > { %v3243_v11 = vpop.xlane.xlu1 %3242 }
 0x494   : > { %7752 = vrcp.f32 %v3243_v11  ;;  %5453 = vrot.lane.b32.xlu1 %v8188_v16, %s7954_s27  ;;  %5681 = vrot.lane.b32.xlu0 %v8420_v9, %s7954_s27  ;;  %v9304_v16 = vmov 0.0  }
 0x497   : > { %v3246_v12 = vpop.xlane.xlu0 %3245 }
 0x498   : > { %5605 = vrot.lane.b32.xlu1 %v8200_v26, %s7954_s27  ;;  %7754 = vrcp.f32 %v3246_v12 }
 0x49c   : > { %5757 = vrot.lane.b32.xlu1 %v8425_v10, %s7954_s27 }
 0x49e   : > { %v7753_v13 = vpop.eup %7752 }
 0x49f   : > { %v3369_v14 = vmul.f32 %v7753_v13, %v8613_v38  ;;  %v9308_v13 = vld [vmem:[#allocation22_spill] sm:$0xff] }
 0x4a1   : > { %7321 = vmatmul.mubr.msk.f32.vlgmr.msra.gmra.mrb[28].mxu0 %vm712_vm2, %v3369_v14  ;;  %v9309_v14 = vld [vmem:[#allocation17_spill] sm:$0xff] }
 0x4a2   : > { %v7755_v15 = vpop.eup %7754  ;;  %7329 = vmatpush3.msra.mxu0 %v8573_v36  ;;  %7330 = vmatprep.mubr.msk.f32.mxu0 %vm7953_vm1, %v9304_v16 }
 0x4a3   : > { %v3249_v17 = vpop.xlane.xlu1 %3248  ;;  %v3370_v25 = vmul.f32 %v7755_v15, %v8618_v23  ;;  %7338 = vmatprep.subr.mxu0 %v9304_v16 }
 0x4a4   : > { %7756 = vrcp.f32 %v3249_v17 }
 0x4a5   : > { %7326 = vmatmul.mubr.msk.f32.vlgmr.msra.gmra.mrb[44].mxu1 %vm712_vm2, %v3370_v25 }
 0x4a6   : > { %7334 = vmatpush3.msra.mxu1 %v8563_v45  ;;  %7335 = vmatprep.mubr.msk.f32.mxu1 %vm7953_vm1, %v9304_v16  ;;  %v9305_v45 = vld [vmem:[#allocation16_spill] sm:$0xff] }
 0x4a7   : > { %v3252_v38 = vpop.xlane.xlu0 %3251  ;;  %7343 = vmatprep.subr.mxu1 %v9304_v16 }
 0x4a8   : > { %7758 = vrcp.f32 %v3252_v38 }
 0x4ae   : > { %v7757_v26 = vpop.eup %7756 }
 0x4af   : > { %v3371_v27 = vmul.f32 %v7757_v26, %v8623_v33  ;;  %v9310_v26 = vld [vmem:[#allocation24_spill] sm:$0xff] }
 0x4b1   : > { %7331 = vmatmul.mubr.msk.f32.vlgmr.msra.gmra.mrb[30].mxu0 %vm712_vm2, %v3371_v27 }
 0x4b2   : > { %v7759_v23 = vpop.eup %7758  ;;  %7339 = vmatpush3.msra.mxu0 %v8585_v62  ;;  %7340 = vmatprep.mubr.msk.f32.mxu0 %vm7953_vm1, %v9304_v16 }
 0x4b3   : > { %v3372_v29 = vmul.f32 %v7759_v23, %v8627_v30  ;;  %7348 = vmatprep.subr.mxu0 %v9304_v16 }
 0x4b5   : > { %7336 = vmatmul.mubr.msk.f32.vlgmr.msra.gmra.mrb[46].mxu1 %vm712_vm2, %v3372_v29 }
 0x4b6   : > { %7344 = vmatpush3.msra.mxu1 %v8581_v51  ;;  %7345 = vmatprep.mubr.msk.f32.mxu1 %vm7953_vm1, %v9304_v16 }
 0x4b7   : > { %v3258_v35 = vpop.xlane.xlu0 %3257  ;;  %7353 = vmatprep.subr.mxu1 %v9304_v16 }
 0x4b8   : > { %7760 = vrcp.f32 %v3258_v35 }
 0x4c2   : > { %v7761_v9 = vpop.eup %7760 }
 0x4c3   : > { %v3374_v10 = vmul.f32 %v7761_v9, %v8632_v44 }
 0x4c5   : > { %7346 = vmatmul.mubr.msk.f32.vlgmr.msra.gmra.mrb[48].mxu1 %vm712_vm2, %v3374_v10  ;;  %v9312_v10 = vld [vmem:[#allocation26_spill] sm:$0xff] }
 0x4c6   : > { %7354 = vmatpush3.msra.mxu1 %v9305_v45  ;;  %v3264_v36 = vpop.xlane.xlu0 %3263  ;;  %7355 = vmatprep.mubr.msk.f32.mxu1 %vm7953_vm1, %v9304_v16 }
 0x4c7   : > { %7762 = vrcp.f32 %v3264_v36  ;;  %v3261_v51 = vpop.xlane.xlu1 %3260  ;;  %7363 = vmatprep.subr.mxu1 %v9304_v16 }
 0x4cb   : > { %v3270_v62 = vpop.xlane.xlu0 %3269 }
 0x4cc   : > { %7764 = vrcp.f32 %v3270_v62  ;;  %v3267_v33 = vpop.xlane.xlu1 %3266 }
 0x4cf   : > { %v3276_v30 = vpop.xlane.xlu0 %3275 }
 0x4d0   : > { %7766 = vrcp.f32 %v3276_v30  ;;  %v3255_v47 = vpop.xlane.xlu1 %3254 }
 0x4d1   : > { %v7763_v18 = vpop.eup %7762  ;;  %7768 = vrcp.f32 %v3255_v47 }
 0x4d2   : > { %v3376_v44 = vmul.f32 %v7763_v18, %v8643_v4  ;;  %7770 = vrcp.f32 %v3261_v51  ;;  %v9315_v18 = vld [vmem:[#allocation25_spill] sm:$0xff] }
 0x4d3   : > { %v3282_v20 = vpop.xlane.xlu0 %3281 }
 0x4d4   : > { %7772 = vrcp.f32 %v3282_v20  ;;  %v3273_v5 = vpop.xlane.xlu1 %3272  ;;  %7356 = vmatmul.mubr.msk.f32.vlgmr.msra.gmra.mrb[50].mxu1 %vm712_vm2, %v3376_v44 }
 0x4d5   : > { %7364 = vmatpush3.msra.mxu1 %v9306_v42  ;;  %7365 = vmatprep.mubr.msk.f32.mxu1 %vm7953_vm1, %v9304_v16  ;;  %7774 = vrcp.f32 %v3267_v33  ;;  %v9314_v33 = vld [vmem:[#allocation23_spill] sm:$0xff] }
 0x4d6   : > { %v7765_v52 = vpop.eup %7764  ;;  %7373 = vmatprep.subr.mxu1 %v9304_v16 }
 0x4d7   : > { %v3288_v56 = vpop.xlane.xlu0 %3287  ;;  %v3378_v41 = vmul.f32 %v7765_v52, %v8654_v6 }
 0x4d8   : > { %7776 = vrcp.f32 %v3288_v56  ;;  %v3279_v4 = vpop.xlane.xlu1 %3278 }
 0x4d9   : > { %7366 = vmatmul.mubr.msk.f32.vlgmr.msra.gmra.mrb[52].mxu1 %vm712_vm2, %v3378_v41  ;;  %7778 = vrcp.f32 %v3273_v5 }
 0x4da   : > { %v7767_v34 = vpop.eup %7766  ;;  %7374 = vmatpush3.msra.mxu1 %v9307_v3  ;;  %7375 = vmatprep.mubr.msk.f32.mxu1 %vm7953_vm1, %v9304_v16 }
 0x4db   : > { %v7769_v58 = vpop.eup %7768  ;;  %v3294_v28 = vpop.xlane.xlu0 %3293  ;;  %7383 = vmatprep.subr.mxu1 %v9304_v16  ;;  %v3380_v22 = vmul.f32 %v7767_v34, %v8664_v31 }
 0x4dc   : > { %7780 = vrcp.f32 %v3294_v28  ;;  %v3285_v0 = vpop.xlane.xlu1 %3284  ;;  %v3373_v6 = vmul.f32 %v7769_v58, %v8666_v46  ;;  %v7771_v11 = vpop.eup %7770 }
 0x4dd   : > { %7376 = vmatmul.mubr.msk.f32.vlgmr.msra.gmra.mrb[54].mxu1 %vm712_vm2, %v3380_v22  ;;  %7782 = vrcp.f32 %v3279_v4  ;;  %v3375_v46 = vmul.f32 %v7771_v11, %v8646_v21 }
 0x4de   : > { %v7773_v12 = vpop.eup %7772  ;;  %7384 = vmatpush3.msra.mxu1 %v9308_v13  ;;  %7341 = vmatmul.mubr.msk.f32.vlgmr.msra.gmra.mrb[32].mxu0 %vm712_vm2, %v3373_v6  ;;  %7784 = vrcp.f32 %v3285_v0 }
 0x4df   : > { %7349 = vmatpush3.msra.mxu0 %v9309_v14  ;;  %v3300_v15 = vpop.xlane.xlu0 %3299  ;;  %7385 = vmatprep.mubr.msk.f32.mxu1 %vm7953_vm1, %v9304_v16  ;;  %v3382_v31 = vmul.f32 %v7773_v12, %v8674_v61  ;;  %v7775_v25 = vpop.eup %7774  ;;  %v9311_v61 = vld [vmem:[#allocation19_spill] sm:$0xff] }
 0x4e0   : > { %v3291_v17 = vpop.xlane.xlu1 %3290  ;;  %7393 = vmatprep.subr.mxu1 %v9304_v16  ;;  %7350 = vmatprep.mubr.msk.f32.mxu0 %vm7953_vm1, %v9304_v16  ;;  %v3377_v29 = vmul.f32 %v7775_v25, %v8656_v39 }
 0x4e1   : > { %7358 = vmatprep.subr.mxu0 %v9304_v16  ;;  %7386 = vmatmul.mubr.msk.f32.vlgmr.msra.gmra.mrb[56].mxu1 %vm712_vm2, %v3382_v31  ;;  %7786 = vrcp.f32 %v3291_v17 }
 0x4e2   : > { %v7777_v38 = vpop.eup %7776  ;;  %7394 = vmatpush3.msra.mxu1 %v9310_v26  ;;  %7351 = vmatmul.mubr.msk.f32.vlgmr.msra.gmra.mrb[34].mxu0 %vm712_vm2, %v3375_v46  ;;  %7788 = vrcp.f32 %v3300_v15 }
 0x4e3   : > { %7359 = vmatpush3.msra.mxu0 %v9311_v61  ;;  %v3306_v27 = vpop.xlane.xlu0 %3305  ;;  %7395 = vmatprep.mubr.msk.f32.mxu1 %vm7953_vm1, %v9304_v16  ;;  %v3384_v23 = vmul.f32 %v7777_v38, %v8684_v55  ;;  %v7779_v35 = vpop.eup %7778  ;;  %v9313_v55 = vld [vmem:[#allocation21_spill] sm:$0xff] }
 0x4e4   : > { %v3297_v21 = vpop.xlane.xlu1 %3296  ;;  %7403 = vmatprep.subr.mxu1 %v9304_v16  ;;  %7360 = vmatprep.mubr.msk.f32.mxu0 %vm7953_vm1, %v9304_v16  ;;  %v3379_v51 = vmul.f32 %v7779_v35, %v8676_v40 }
 0x4e5   : > { %7368 = vmatprep.subr.mxu0 %v9304_v16  ;;  %7396 = vmatmul.mubr.msk.f32.vlgmr.msra.gmra.mrb[58].mxu1 %vm712_vm2, %v3384_v23  ;;  %7790 = vrcp.f32 %v3297_v21 }
 0x4e6   : > { %v7781_v9 = vpop.eup %7780  ;;  %7404 = vmatpush3.msra.mxu1 %v9312_v10  ;;  %7361 = vmatmul.mubr.msk.f32.vlgmr.msra.gmra.mrb[36].mxu0 %vm712_vm2, %v3377_v29 }
 0x4e7   : > { %7369 = vmatpush3.msra.mxu0 %v9313_v55  ;;  %v3312_v45 = vpop.xlane.xlu0 %3311  ;;  %7405 = vmatprep.mubr.msk.f32.mxu1 %vm7953_vm1, %v9304_v16  ;;  %v3386_v36 = vmul.f32 %v7781_v9, %v8694_v2  ;;  %v7783_v62 = vpop.eup %7782 }
 0x4e8   : > { %v3303_v39 = vpop.xlane.xlu1 %3302  ;;  %7370 = vmatprep.mubr.msk.f32.mxu0 %vm7953_vm1, %v9304_v16  ;;  %7378 = vmatprep.subr.mxu0 %v9304_v16  ;;  %v3381_v40 = vmul.f32 %v7783_v62, %v8686_v53  ;;  %v7785_v47 = vpop.eup %7784  ;;  %v9316_v53 = vld [vmem:[#allocation27_spill] sm:$0xff] }
 0x4e9   : > { %7406 = vmatmul.mubr.msk.f32.vlgmr.msra.gmra.mrb[60].mxu1 %vm712_vm2, %v3386_v36  ;;  %7413 = vmatprep.subr.mxu1 %v9304_v16  ;;  %v3383_v5 = vmul.f32 %v7785_v47, %v8696_v7  ;;  %7792 = vrcp.f32 %v3303_v39 }
 0x4ea   : > { %7371 = vmatmul.mubr.msk.f32.vlgmr.msra.gmra.mrb[38].mxu0 %vm712_vm2, %v3379_v51  ;;  %7415 = vmatprep.mubr.msk.f32.mxu1 %vm7953_vm1, %v9304_v16  ;;  %7794 = vrcp.f32 %v3306_v27 }
 0x4eb   : > { %7379 = vmatpush3.msra.mxu0 %v9314_v33  ;;  %v3318_v2 = vpop.xlane.xlu0 %3317  ;;  %7380 = vmatprep.mubr.msk.f32.mxu0 %vm7953_vm1, %v9304_v16  ;;  %v7787_v42 = vpop.eup %7786 }
 0x4ec   : > { %v3309_v30 = vpop.xlane.xlu1 %3308  ;;  %7388 = vmatprep.subr.mxu0 %v9304_v16  ;;  %v3385_v41 = vmul.f32 %v7787_v42, %v8706_v59  ;;  %v7789_v7 = vpop.eup %7788 }
 0x4ed   : > { %v3388_v3 = vmul.f32 %v7789_v7, %v8704_v24  ;;  %7796 = vrcp.f32 %v3309_v30 }
 0x4ee   : > { %7381 = vmatmul.mubr.msk.f32.vlgmr.msra.gmra.mrb[40].mxu0 %vm712_vm2, %v3381_v40  ;;  %7798 = vrcp.f32 %v3312_v45 }
 0x4ef   : > { %7389 = vmatpush3.msra.mxu0 %v9315_v18  ;;  %v3324_v44 = vpop.xlane.xlu0 %3323  ;;  %7390 = vmatprep.mubr.msk.f32.mxu0 %vm7953_vm1, %v9304_v16  ;;  %v7791_v59 = vpop.eup %7790 }
 0x4f0   : > { %v3315_v20 = vpop.xlane.xlu1 %3314  ;;  %7398 = vmatprep.subr.mxu0 %v9304_v16  ;;  %v3387_v6 = vmul.f32 %v7791_v59, %v8716_v19 }
 0x4f1   : > { %7800 = vrcp.f32 %v3315_v20 }
 0x4f2   : > { %7391 = vmatmul.mubr.msk.f32.vlgmr.msra.gmra.mrb[42].mxu0 %vm712_vm2, %v3383_v5  ;;  %7802 = vrcp.f32 %v3318_v2 }
 0x4f3   : > { %7399 = vmatpush3.msra.mxu0 %v9316_v53  ;;  %v3330_v52 = vpop.xlane.xlu0 %3329  ;;  %7400 = vmatprep.mubr.msk.f32.mxu0 %vm7953_vm1, %v9304_v16  ;;  %v7793_v11 = vpop.eup %7792 }
 0x4f4   : > { %v3321_v56 = vpop.xlane.xlu1 %3320  ;;  %7408 = vmatprep.subr.mxu0 %v9304_v16  ;;  %v7795_v24 = vpop.eup %7794  ;;  %v3389_v14 = vmul.f32 %v7793_v11, %v8726_v57 }
 0x4f5   : > { %7804 = vrcp.f32 %v3321_v56  ;;  %v3390_v31 = vmul.f32 %v7795_v24, %v8714_v48 }
 0x4f6   : > { %7401 = vmatmul.mubr.msk.f32.vlgmr.msra.gmra.mrb[44].mxu0 %vm712_vm2, %v3385_v41  ;;  %7806 = vrcp.f32 %v3324_v44 }
 0x4f7   : > { %v8901_v4 = vpop.xlane.xlu0 %3335  ;;  %7410 = vmatprep.mubr.msk.f32.mxu0 %vm7953_vm1, %v9304_v16  ;;  %v7797_v15 = vpop.eup %7796 }
 0x4f8   : > { %v3327_v34 = vpop.xlane.xlu1 %3326  ;;  %v7799_v19 = vpop.eup %7798  ;;  %v3391_v17 = vmul.f32 %v7797_v15, %v8736_v63 }
 0x4f9   : > { %7808 = vrcp.f32 %v3327_v34  ;;  %v3392_v48 = vmul.f32 %v7799_v19, %v8724_v1 }
 0x4fa   : > { %7810 = vrcp.f32 %v3330_v52 }
 0x4fb   : > { %v4846_v58 = vpop.permute.xlu0 %4845  ;;  %v7801_v57 = vpop.eup %7800 }
 0x4fc   : > { %v3333_v28 = vpop.xlane.xlu1 %3332  ;;  %7414 = vmatpush3.msra.mxu1 %v4846_v58  ;;  %v7803_v38 = vpop.eup %7802  ;;  %v3393_v63 = vmul.f32 %v7801_v57, %v8745_v60 }
 0x4fd   : > { %7416 = vmatmul.mubr.msk.f32.vlgmr.msra.gmra.mrb[62].mxu1 %vm712_vm2, %v3388_v3  ;;  %7423 = vmatprep.subr.mxu1 %v9304_v16  ;;  %7812 = vrcp.f32 %v3333_v28  ;;  %v3394_v60 = vmul.f32 %v7803_v38, %v8734_v32  ;;  %v5957_v38 = vld [vmem:[#allocation2 + $0x80] sm:$0xff] }
 0x4fe   : > { %7425 = vmatprep.mubr.msk.f32.mxu1 %vm7953_vm1, %v9304_v16  ;;  %7814 = vrcp.f32 %v8901_v4 }
 0x4ff   : > { %v5074_v22 = vpop.permute.xlu0 %5073  ;;  %v7805_v61 = vpop.eup %7804 }
 0x500   : > { %v4770_v0 = vpop.permute.xlu1 %4769  ;;  %v7807_v1 = vpop.eup %7806  ;;  %v3395_v27 = vmul.f32 %v7805_v61, %v8753_v43 }
 0x501   : > { %7409 = vmatpush3.msra.mxu0 %v4770_v0  ;;  %v3396_v43 = vmul.f32 %v7807_v1, %v8743_v54 }
 0x502   : > { %7411 = vmatmul.mubr.msk.f32.vlgmr.msra.gmra.mrb[46].mxu0 %vm712_vm2, %v3387_v6  ;;  %7418 = vmatprep.subr.mxu0 %v9304_v16 }
 0x503   : > { %7420 = vmatprep.mubr.msk.f32.mxu0 %vm7953_vm1, %v9304_v16  ;;  %v5226_v12 = vpop.permute.xlu0 %5225  ;;  %v7809_v29 = vpop.eup %7808 }
 0x504   : > { %v4922_v13 = vpop.permute.xlu1 %4921  ;;  %v7811_v32 = vpop.eup %7810  ;;  %v3397_v35 = vmul.f32 %v7809_v29, %v8761_v8 }
 0x505   : > { %7419 = vmatpush3.msra.mxu0 %v4922_v13  ;;  %v3398_v54 = vmul.f32 %v7811_v32, %v8751_v50 }
 0x506   : > { %7421 = vmatmul.mubr.msk.f32.vlgmr.msra.gmra.mrb[48].mxu0 %vm712_vm2, %v3389_v14  ;;  %7428 = vmatprep.subr.mxu0 %v9304_v16 }
 0x507   : > { %7429 = vmatpush3.msra.mxu0 %v5074_v22  ;;  %7430 = vmatprep.mubr.msk.f32.mxu0 %vm7953_vm1, %v9304_v16  ;;  %v5378_v25 = vpop.permute.xlu0 %5377  ;;  %v7813_v10 = vpop.eup %7812 }
 0x508   : > { %v4998_v46 = vpop.permute.xlu1 %4997  ;;  %7438 = vmatprep.subr.mxu0 %v9304_v16  ;;  %v3399_v8 = vmul.f32 %v7813_v10, %v8767_v49  ;;  %v7815_v36 = vpop.eup %7814 }
 0x509   : > { %7424 = vmatpush3.msra.mxu1 %v4998_v46  ;;  %v3400_v50 = vmul.f32 %v7815_v36, %v8759_v37  ;;  %v5956_v46 = vld [vmem:[#allocation2 + $0x78] sm:$0xff] }
 0x50a   : > { %7426 = vmatmul.mubr.msk.f32.vlgmr.msra.gmra.mrb[64].mxu1 %vm712_vm2, %v3390_v31  ;;  %7431 = vmatmul.mubr.msk.f32.vlgmr.msra.gmra.mrb[50].mxu0 %vm712_vm2, %v3391_v17  ;;  %v5955_v17 = vld [vmem:[#allocation2 + $0x70] sm:$0xff] }
 0x50b   : > { %7439 = vmatpush3.msra.mxu0 %v5226_v12  ;;  %7433 = vmatprep.subr.mxu1 %v9304_v16  ;;  %v5530_v23 = vpop.permute.xlu0 %5529 }
 0x50c   : > { %v5150_v26 = vpop.permute.xlu1 %5149  ;;  %7435 = vmatprep.mubr.msk.f32.mxu1 %vm7953_vm1, %v9304_v16  ;;  %7440 = vmatprep.mubr.msk.f32.mxu0 %vm7953_vm1, %v9304_v16 }
 0x50d   : > { %7434 = vmatpush3.msra.mxu1 %v5150_v26  ;;  %7448 = vmatprep.subr.mxu0 %v9304_v16 }
 0x50e   : > { %7436 = vmatmul.mubr.msk.f32.vlgmr.msra.gmra.mrb[66].mxu1 %vm712_vm2, %v3392_v48  ;;  %7441 = vmatmul.mubr.msk.f32.vlgmr.msra.gmra.mrb[52].mxu0 %vm712_vm2, %v3393_v63  ;;  %v5958_v48 = vld [vmem:[#allocation2 + $0x88] sm:$0xff] }
 0x50f   : > { %7449 = vmatpush3.msra.mxu0 %v5378_v25  ;;  %7443 = vmatprep.subr.mxu1 %v9304_v16  ;;  %v5682_v55 = vpop.permute.xlu0 %5681  ;;  %v7570_v25 = vpack.c.bf16 %v5956_v46, %v5955_v17  ;;  %v7574_v26 = vpack.c.bf16 %v5958_v48, %v5957_v38 }
 0x510   : > { %v5302_v21 = vpop.permute.xlu1 %5301  ;;  %7445 = vmatprep.mubr.msk.f32.mxu1 %vm7953_vm1, %v9304_v16  ;;  %7450 = vmatprep.mubr.msk.f32.mxu0 %vm7953_vm1, %v9304_v16 }
 0x511   : > { %7444 = vmatpush3.msra.mxu1 %v5302_v21  ;;  %7458 = vmatprep.subr.mxu0 %v9304_v16 }
 0x512   : > { %7446 = vmatmul.mubr.msk.f32.vlgmr.msra.gmra.mrb[68].mxu1 %vm712_vm2, %v3394_v60  ;;  %7451 = vmatmul.mubr.msk.f32.vlgmr.msra.gmra.mrb[54].mxu0 %vm712_vm2, %v3395_v27 }
 0x513   : > { %7459 = vmatpush3.msra.mxu0 %v5530_v23  ;;  %7453 = vmatprep.subr.mxu1 %v9304_v16 }
 0x514   : > { %v5454_v9 = vpop.permute.xlu1 %5453  ;;  %7455 = vmatprep.mubr.msk.f32.mxu1 %vm7953_vm1, %v9304_v16  ;;  %7460 = vmatprep.mubr.msk.f32.mxu0 %vm7953_vm1, %v9304_v16 }
 0x515   : > { %7454 = vmatpush3.msra.mxu1 %v5454_v9  ;;  %7468 = vmatprep.subr.mxu0 %v9304_v16 }
 0x516   : > { %7456 = vmatmul.mubr.msk.f32.vlgmr.msra.gmra.mrb[70].mxu1 %vm712_vm2, %v3396_v43  ;;  %7461 = vmatmul.mubr.msk.f32.vlgmr.msra.gmra.mrb[56].mxu0 %vm712_vm2, %v3397_v35 }
 0x517   : > { %7469 = vmatpush3.msra.mxu0 %v5682_v55  ;;  %7463 = vmatprep.subr.mxu1 %v9304_v16 }
 0x518   : > { %v5606_v45 = vpop.permute.xlu1 %5605  ;;  %7465 = vmatprep.mubr.msk.f32.mxu1 %vm7953_vm1, %v9304_v16  ;;  %7470 = vmatprep.mubr.msk.f32.mxu0 %vm7953_vm1, %v9304_v16 }
 0x519   : > { %7464 = vmatpush3.msra.mxu1 %v5606_v45  ;;  %7571 = vmatprep.subr.bf16.mxu0 %v7570_v25 }
 0x51a   : > { %7466 = vmatmul.mubr.msk.f32.vlgmr.msra.gmra.mrb[72].mxu1 %vm712_vm2, %v3398_v54  ;;  %7471 = vmatmul.mubr.msk.f32.vlgmr.msra.gmra.mrb[58].mxu0 %vm712_vm2, %v3399_v8 }
 0x51b   : > { %7473 = vmatprep.subr.mxu1 %v9304_v16  ;;  %7475 = vmatprep.mubr.msk.f32.mxu1 %vm7953_vm1, %v9304_v16 }
 0x51c   : > { %v5758_v49 = vpop.permute.xlu1 %5757  ;;  %7573 = vmatpush3.bf16.msra.mxu0 %v7570_v25 }
 0x51d   : > { %7474 = vmatpush3.msra.mxu1 %v5758_v49  ;;  %7575 = vmatprep.subr.bf16.mxu0 %v7574_v26 }
 0x51e   : > { %7476 = vmatmul.mubr.msk.f32.vlgmr.msra.gmra.mrb[74].mxu1 %vm712_vm2, %v3400_v50 }
 0x520   : > { %7577 = vmatpush3.bf16.msra.mxu0 %v7574_v26 }
 0x574   : > { %v8970_v39 = vpop.f32.mrb[28].mxu0 }
 0x575   : > { %v7322_v51 = vpop.f32.mrb[29].mxu0 }
 0x578   : > { %v8972_v62 = vpop.f32.mrb[44].mxu1 }
 0x579   : > { %v7327_v33 = vpop.f32.mrb[45].mxu1 }
 0x584   : > { %v8974_v2 = vpop.f32.mrb[30].mxu0 }
 0x585   : > { %v7332_v30 = vpop.f32.mrb[31].mxu0 }
 0x588   : > { %v8976_v40 = vpop.f32.mrb[46].mxu1 }
 0x589   : > { %v7337_v47 = vpop.f32.mrb[47].mxu1 }
 0x598   : > { %v8978_v18 = vpop.f32.mrb[48].mxu1 }
 0x599   : > { %v7347_v16 = vpop.f32.mrb[49].mxu1 }
 0x5a7   : > { %v8980_v37 = vpop.f32.mrb[50].mxu1 }
 0x5a8   : > { %v7357_v44 = vpop.f32.mrb[51].mxu1 }
 0x5ac   : > { %v4157_v20 = vpop.f32.mrb[52].mxu1 }
 0x5ad   : > { %5843 = vrot.lane.b32.xlu1 %v4157_v20, %s7955_s28  ;;  %v7367_v5 = vpop.f32.mrb[53].mxu1 }
 0x5b0   : > { %v4309_v42 = vpop.f32.mrb[54].mxu1 }
 0x5b1   : > { %v8983_v53 = vpop.f32.mrb[32].mxu0  ;;  %5847 = vrot.lane.b32.xlu1 %v4309_v42, %s7955_s28  ;;  %v7377_v52 = vpop.f32.mrb[55].mxu1 }
 0x5b2   : > { %v7342_v56 = vpop.f32.mrb[33].mxu0 }
 0x5b4   : > { %v4461_v41 = vpop.f32.mrb[56].mxu1 }
 0x5b5   : > { %v8986_v4 = vpop.f32.mrb[34].mxu0  ;;  %5851 = vrot.lane.b32.xlu1 %v4461_v41, %s7955_s28  ;;  %v7387_v7 = vpop.f32.mrb[57].mxu1 }
 0x5b6   : > { %v7352_v34 = vpop.f32.mrb[35].mxu0 }
 0x5b8   : > { %v4613_v3 = vpop.f32.mrb[58].mxu1 }
 0x5b9   : > { %v4081_v58 = vpop.f32.mrb[36].mxu0  ;;  %5855 = vrot.lane.b32.xlu1 %v4613_v3, %s7955_s28  ;;  %v7397_v28 = vpop.f32.mrb[59].mxu1 }
 0x5ba   : > { %v7362_v59 = vpop.f32.mrb[37].mxu0  ;;  %5841 = vrot.lane.b32.xlu0 %v4081_v58, %s7955_s28 }
 0x5bc   : > { %v4765_v22 = vpop.f32.mrb[60].mxu1 }
 0x5bd   : > { %v4233_v0 = vpop.f32.mrb[38].mxu0  ;;  %5875 = vrot.lane.b32.xlu1 %v4765_v22, %s7956_s29  ;;  %v7407_v6 = vpop.f32.mrb[61].mxu1 }
 0x5be   : > { %v7372_v11 = vpop.f32.mrb[39].mxu0  ;;  %5845 = vrot.lane.b32.xlu0 %v4233_v0, %s7955_s28 }
 0x5c1   : > { %v4385_v24 = vpop.f32.mrb[40].mxu0 }
 0x5c2   : > { %v7382_v12 = vpop.f32.mrb[41].mxu0  ;;  %5849 = vrot.lane.b32.xlu0 %v4385_v24, %s7955_s28 }
 0x5c5   : > { %v4537_v13 = vpop.f32.mrb[42].mxu0 }
 0x5c6   : > { %v7392_v14 = vpop.f32.mrb[43].mxu0  ;;  %5853 = vrot.lane.b32.xlu0 %v4537_v13, %s7955_s28 }
 0x5c9   : > { %v4689_v15 = vpop.f32.mrb[44].mxu0 }
 0x5ca   : > { %v7402_v19 = vpop.f32.mrb[45].mxu0  ;;  %5873 = vrot.lane.b32.xlu0 %v4689_v15, %s7956_s29 }
 0x5d0   : > { %v4917_v31 = vpop.f32.mrb[62].mxu1 }
 0x5d1   : > { %5879 = vrot.lane.b32.xlu1 %v4917_v31, %s7956_s29  ;;  %v7417_v57 = vpop.f32.mrb[63].mxu1 }
 0x5d5   : > { %v4841_v63 = vpop.f32.mrb[46].mxu0 }
 0x5d6   : > { %v7412_v61 = vpop.f32.mrb[47].mxu0  ;;  %5877 = vrot.lane.b32.xlu0 %v4841_v63, %s7956_s29 }
 0x5d9   : > { %v4993_v1 = vpop.f32.mrb[48].mxu0 }
 0x5da   : > { %v7422_v60 = vpop.f32.mrb[49].mxu0  ;;  %5881 = vrot.lane.b32.xlu0 %v4993_v1, %s7956_s29 }
 0x5dd   : > { %v5069_v27 = vpop.f32.mrb[64].mxu1  ;;  %v5145_v23 = vpop.f32.mrb[50].mxu0 }
 0x5de   : > { %5883 = vrot.lane.b32.xlu1 %v5069_v27, %s7956_s29  ;;  %v7427_v21 = vpop.f32.mrb[65].mxu1  ;;  %5885 = vrot.lane.b32.xlu0 %v5145_v23, %s7956_s29  ;;  %v7432_v29 = vpop.f32.mrb[51].mxu0 }
 0x5e1   : > { %v5221_v32 = vpop.f32.mrb[66].mxu1  ;;  %v5297_v43 = vpop.f32.mrb[52].mxu0 }
 0x5e2   : > { %5887 = vrot.lane.b32.xlu1 %v5221_v32, %s7956_s29  ;;  %v7437_v35 = vpop.f32.mrb[67].mxu1  ;;  %5905 = vrot.lane.b32.xlu0 %v5297_v43, %s7957_s30  ;;  %v7442_v9 = vpop.f32.mrb[53].mxu0 }
 0x5e3   : > { %v6919_v9 = vld [vmem:[#allocation2 + $0x2] ss:$0 sm:$0xff] }
 0x5e5   : > { %v5373_v10 = vpop.f32.mrb[68].mxu1  ;;  %v5449_v55 = vpop.f32.mrb[54].mxu0 }
 0x5e6   : > { %5907 = vrot.lane.b32.xlu1 %v5373_v10, %s7957_s30  ;;  %v7447_v54 = vpop.f32.mrb[69].mxu1  ;;  %5909 = vrot.lane.b32.xlu0 %v5449_v55, %s7957_s30  ;;  %v7452_v8 = vpop.f32.mrb[55].mxu0 }
 0x5e9   : > { %v5525_v45 = vpop.f32.mrb[70].mxu1  ;;  %v5601_v36 = vpop.f32.mrb[56].mxu0 }
 0x5ea   : > { %5911 = vrot.lane.b32.xlu1 %v5525_v45, %s7957_s30  ;;  %v7457_v50 = vpop.f32.mrb[71].mxu1  ;;  %5913 = vrot.lane.b32.xlu0 %v5601_v36, %s7957_s30  ;;  %v7462_v49 = vpop.f32.mrb[57].mxu0  ;;  %v9317_v45 = vld [vmem:[#allocation11_spill] sm:$0xff] }
 0x5eb   : > { %v9318_v50 = vld [vmem:[#allocation8_spill] sm:$0xff] }
 0x5ed   : > { %v5677_v51 = vpop.f32.mrb[72].mxu1  ;;  %v5753_v33 = vpop.f32.mrb[58].mxu0 }
 0x5ee   : > { %5915 = vrot.lane.b32.xlu1 %v5677_v51, %s7957_s30  ;;  %v7467_v30 = vpop.f32.mrb[73].mxu1  ;;  %5917 = vrot.lane.b32.xlu0 %v5753_v33, %s7957_s30  ;;  %v7472_v47 = vpop.f32.mrb[59].mxu0 }
 0x5f1   : > { %v5829_v16 = vpop.f32.mrb[74].mxu1 }
 0x5f2   : > { %5919 = vrot.lane.b32.xlu1 %v5829_v16, %s7957_s30  ;;  %v7477_v44 = vpop.f32.mrb[75].mxu1 }
 0x5f3   : > { %v9319_v44 = vld [vmem:[#allocation9_spill] sm:$0xff] }
 0x61f   : > { %v5844_v5 = vpop.permute.xlu1 %5843 }
 0x620   : > { %v5930_v15 = vsel %vm712_vm2, %v8972_v62, %v5844_v5 }
 0x623   : > { %v5848_v52 = vpop.permute.xlu1 %5847 }
 0x624   : > { %v5932_v38 = vsel %vm712_vm2, %v8976_v40, %v5848_v52 }
 0x627   : > { %v5852_v41 = vpop.permute.xlu1 %5851 }
 0x628   : > { %v5934_v40 = vsel %vm712_vm2, %v8978_v18, %v5852_v41 }
 0x62b   : > { %v5856_v34 = vpop.permute.xlu1 %5855 }
 0x62c   : > { %v5842_v20 = vpop.permute.xlu0 %5841  ;;  %v5936_v18 = vsel %vm712_vm2, %v8980_v37, %v5856_v34 }
 0x62d   : > { %v5929_v11 = vsel %vm712_vm2, %v8970_v39, %v5842_v20 }
 0x62f   : > { %v5876_v58 = vpop.permute.xlu1 %5875 }
 0x630   : > { %v5846_v42 = vpop.permute.xlu0 %5845  ;;  %v5939_v31 = vsel %vm5937_vm4, %v5930_v15, %v5876_v58  ;;  %v9324_v15 = vld [vmem:[#allocation14_spill] sm:$0xff] }
 0x631   : > { %v5931_v19 = vsel %vm712_vm2, %v8974_v2, %v5846_v42  ;;  %v9320_v42 = vld [vmem:[#allocation10_spill] sm:$0xff] }
 0x634   : > { %v5850_v56 = vpop.permute.xlu0 %5849 }
 0x635   : > { %v5933_v62 = vsel %vm712_vm2, %v8983_v53, %v5850_v56 }
 0x638   : > { %v5854_v7 = vpop.permute.xlu0 %5853 }
 0x639   : > { %v5935_v53 = vsel %vm712_vm2, %v8986_v4, %v5854_v7 }
 0x63c   : > { %v5874_v3 = vpop.permute.xlu0 %5873 }
 0x63d   : > { %v5938_v24 = vsel %vm5937_vm4, %v5929_v11, %v5874_v3  ;;  %v9321_v3 = vld [vmem:[#allocation13_spill] sm:$0xff] }
 0x643   : > { %v5880_v59 = vpop.permute.xlu1 %5879 }
 0x644   : > { %v5941_v2 = vsel %vm5937_vm4, %v5932_v38, %v5880_v59 }
 0x648   : > { %v5878_v28 = vpop.permute.xlu0 %5877 }
 0x649   : > { %v5940_v17 = vsel %vm5937_vm4, %v5931_v19, %v5878_v28 }
 0x64c   : > { %v5882_v22 = vpop.permute.xlu0 %5881 }
 0x64d   : > { %v5942_v48 = vsel %vm5937_vm4, %v5933_v62, %v5882_v22 }
 0x650   : > { %v5884_v0 = vpop.permute.xlu1 %5883  ;;  %v5886_v6 = vpop.permute.xlu0 %5885 }
 0x651   : > { %v5943_v60 = vsel %vm5937_vm4, %v5934_v40, %v5884_v0  ;;  %v5944_v27 = vsel %vm5937_vm4, %v5935_v53, %v5886_v6  ;;  %v9322_v0 = vld [vmem:[#allocation12_spill] sm:$0xff] }
 0x654   : > { %v5888_v12 = vpop.permute.xlu1 %5887  ;;  %v5906_v13 = vpop.permute.xlu0 %5905 }
 0x655   : > { %v5947_v14 = vsel %vm5946_vm3, %v5938_v24, %v5906_v13  ;;  %v5945_v4 = vsel %vm5937_vm4, %v5936_v18, %v5888_v12  ;;  %v9323_v13 = vld [vmem:[#allocation15_spill] sm:$0xff] }
 0x656   : > { %7486 = vmatprep.mubr.msk.f32.mxu0 %vm246_vm0, %v5947_v14 }
 0x658   : > { %v5908_v39 = vpop.permute.xlu1 %5907  ;;  %v5910_v46 = vpop.permute.xlu0 %5909 }
 0x659   : > { %v5948_v57 = vsel %vm5946_vm3, %v5939_v31, %v5908_v39  ;;  %v5949_v25 = vsel %vm5946_vm3, %v5940_v17, %v5910_v46 }
 0x65a   : > { %7487 = vmatmul.mubr.msk.f32.vlgmr.msra.gmra.mrb[60].mxu0 %vm246_vm0, %v5948_v57 }
 0x65b   : > { %7489 = vmatprep.mubr.msk.f32.mxu0 %vm246_vm0, %v5949_v25 }
 0x65c   : > { %v5912_v63 = vpop.permute.xlu1 %5911  ;;  %v5914_v26 = vpop.permute.xlu0 %5913 }
 0x65d   : > { %v5950_v61 = vsel %vm5946_vm3, %v5941_v2, %v5912_v63  ;;  %v5951_v1 = vsel %vm5946_vm3, %v5942_v48, %v5914_v26 }
 0x65e   : > { %7490 = vmatmul.mubr.msk.f32.gmra.mrb[62].mxu0 %vm246_vm0, %v5950_v61 }
 0x65f   : > { %7492 = vmatprep.mubr.msk.f32.mxu0 %vm246_vm0, %v5951_v1 }
 0x660   : > { %v5916_v23 = vpop.permute.xlu1 %5915  ;;  %v5918_v21 = vpop.permute.xlu0 %5917 }
 0x661   : > { %v5952_v29 = vsel %vm5946_vm3, %v5943_v60, %v5916_v23  ;;  %v5953_v32 = vsel %vm5946_vm3, %v5944_v27, %v5918_v21 }
 0x662   : > { %7493 = vmatmul.mubr.msk.f32.gmra.mrb[64].mxu0 %vm246_vm0, %v5952_v29 }
 0x663   : > { %7495 = vmatprep.mubr.msk.f32.mxu0 %vm246_vm0, %v5953_v32 }
 0x664   : > { %v5920_v43 = vpop.permute.xlu1 %5919 }
 0x665   : > { %v5954_v35 = vsel %vm5946_vm3, %v5945_v4, %v5920_v43 }
 0x666   : > { %7496 = vmatmul.mubr.msk.f32.gmra.mrb[66].mxu0 %vm246_vm0, %v5954_v35 }
 0x72d   : > { %v7488_v10 = vpop.f32.mrb[60].mxu0 }
 0x72e   : > { %v6060_v55 = vadd.f32 %v7488_v10, %v6919_v9  ;;  %v6054_v54 = vpop.f32.mrb[61].mxu0 }
 0x72f   : > { %v6055_v8 = vadd.f32 %v6919_v9, %v6054_v54 }
 0x730   : > { %v6094_v36 = vadd.f32 %v6060_v55, %v9317_v45 }
 0x731   : > { %v6093_v49 = vadd.f32 %v6055_v8, %v9318_v50  ;;  %v7491_v51 = vpop.f32.mrb[62].mxu0 }
 0x732   : > { %v6070_v37 = vadd.f32 %v7491_v51, %v6919_v9  ;;  %v6064_v33 = vpop.f32.mrb[63].mxu0  ;;  %v6106_v30 = vsel %vm246_vm0, %v6094_v36, 0.0 }
 0x733   : > { %v6065_v47 = vadd.f32 %v6919_v9, %v6064_v33  ;;  %6107 = vadd.xlane.f32.xlu1 %v6106_v30  ;;  %v6103_v16 = vsel %vm246_vm0, %v6093_v49, 0.0 }
 0x734   : > { %6104 = vadd.xlane.f32.xlu0 %v6103_v16  ;;  %v6096_v52 = vadd.f32 %v6070_v37, %v9320_v42  ;;  %v6233_v42 = vld [vmem:[#allocation2 + $0x98] sm:$0xff] }
 0x735   : > { %v6095_v20 = vadd.f32 %v6065_v47, %v9319_v44  ;;  %v7494_v5 = vpop.f32.mrb[64].mxu0 }
 0x736   : > { %v6074_v56 = vpop.f32.mrb[65].mxu0  ;;  %v6080_v41 = vadd.f32 %v7494_v5, %v6919_v9  ;;  %v6112_v22 = vsel %vm246_vm0, %v6096_v52, 0.0  ;;  %v6232_v5 = vld [vmem:[#allocation2 + $0x90] sm:$0xff] }
 0x737   : > { %v6075_v7 = vadd.f32 %v6919_v9, %v6074_v56  ;;  %v6109_v34 = vsel %vm246_vm0, %v6095_v20, 0.0  ;;  %v6234_v56 = vld [vmem:[#allocation2 + $0xa0] sm:$0xff] }
 0x738   : > { %6110 = vadd.xlane.f32.xlu0 %v6109_v34  ;;  %v6098_v6 = vadd.f32 %v6080_v41, %v9322_v0  ;;  %v6235_v41 = vld [vmem:[#allocation2 + $0xa8] sm:$0xff]  ;;  %v6237_v34 = vld [vmem:[#allocation2 + $0xb0] sm:$0xff] }
 0x739   : > { %v6097_v58 = vadd.f32 %v6075_v7, %v9321_v3  ;;  %v7497_v28 = vpop.f32.mrb[66].mxu0  ;;  %v7582_v7 = vpack.c.bf16 %v6235_v41, %v6234_v56  ;;  %v6238_v3 = vld [vmem:[#allocation2 + $0xb8] sm:$0xff]  ;;  %v6241_v0 = vld [vmem:[#allocation2 + $0xd0] sm:$0xff] }
 0x73a   : > { %v6084_v59 = vpop.f32.mrb[67].mxu0  ;;  %v6090_v11 = vadd.f32 %v7497_v28, %v6919_v9  ;;  %v6118_v31 = vsel %vm246_vm0, %v6098_v6, 0.0  ;;  %v7586_v28 = vpack.c.bf16 %v6238_v3, %v6237_v34 }
 0x73b   : > { %v6085_v24 = vadd.f32 %v6919_v9, %v6084_v59  ;;  %v6115_v12 = vsel %vm246_vm0, %v6097_v58, 0.0  ;;  %v6240_v59 = vld [vmem:[#allocation2 + $0xc8] sm:$0xff] }
 0x73c   : > { %6113 = vadd.xlane.f32.xlu0 %v6112_v22  ;;  %6116 = vadd.xlane.f32.xlu1 %v6115_v12  ;;  %v6100_v19 = vadd.f32 %v6090_v11, %v9324_v15  ;;  %v6244_v12 = vld [vmem:[#allocation2 + $0xe8] sm:$0xff]  ;;  %v6246_v15 = vld [vmem:[#allocation2 + $0xf8] sm:$0xff] }
 0x73d   : > { %v6099_v14 = vadd.f32 %v6085_v24, %v9323_v13  ;;  %7587 = vmatprep.subr.bf16.mxu0 %v7586_v28  ;;  %v6243_v24 = vld [vmem:[#allocation2 + $0xe0] sm:$0xff] }
 0x73e   : > { %v6124_v39 = vsel %vm246_vm0, %v6100_v19, 0.0  ;;  %7589 = vmatpush3.bf16.msra.mxu0 %v7586_v28  ;;  %v7598_v13 = vpack.c.bf16 %v6244_v12, %v6243_v24 }
 0x73f   : > { %v6121_v17 = vsel %vm246_vm0, %v6099_v14, 0.0 }
 0x740   : > { %6119 = vadd.xlane.f32.xlu0 %v6118_v31  ;;  %6122 = vadd.xlane.f32.xlu1 %v6121_v17  ;;  %v6247_v31 = vld [vmem:[#allocation2 + $0x100] sm:$0xff]  ;;  %v6248_v17 = vld [vmem:[#allocation2 + $0x108] sm:$0xff] }
 0x744   : > { %6125 = vadd.xlane.f32.xlu0 %v6124_v39  ;;  %v7606_v39 = vpack.c.bf16 %v6248_v17, %v6247_v31  ;;  %v6251_v17 = vld [vmem:[#allocation2 + $0x120] sm:$0xff] }
 0x7c0   : > { %v6108_v46 = vpop.xlane.xlu1 %6107 }
 0x7c1   : > { %v6129_v57 = vmul.f32 0.03125, %v6108_v46  ;;  %v6105_v25 = vpop.xlane.xlu0 %6104  ;;  %v6249_v46 = vld [vmem:[#allocation2 + $0x110] sm:$0xff] }
 0x7c2   : > { %v6128_v38 = vmul.f32 0.03125, %v6105_v25 }
 0x7c3   : > { %v9058_v62 = vsub.f32 %v6094_v36, %v6129_v57  ;;  %v6250_v57 = vld [vmem:[#allocation2 + $0x118] sm:$0xff] }
 0x7c4   : > { %v9060_v2 = vsub.f32 %v6093_v49, %v6128_v38  ;;  %v7610_v25 = vpack.c.bf16 %v6250_v57, %v6249_v46 }
 0x7c5   : > { %v6111_v48 = vpop.xlane.xlu0 %6110  ;;  %v6145_v63 = vmul.f32 %v9058_v62, %v9058_v62 }
 0x7c6   : > { %v6130_v26 = vmul.f32 0.03125, %v6111_v48  ;;  %v6144_v61 = vmul.f32 %v9060_v2, %v9060_v2 }
 0x7c7   : > { %v6155_v1 = vsel %vm246_vm0, %v6145_v63, 0.0 }
 0x7c8   : > { %v9067_v40 = vsub.f32 %v6095_v20, %v6130_v26  ;;  %6156 = vadd.xlane.f32.xlu0 %v6155_v1  ;;  %v6152_v53 = vsel %vm246_vm0, %v6144_v61, 0.0 }
 0x7c9   : > { %v6117_v60 = vpop.xlane.xlu1 %6116  ;;  %6153 = vadd.xlane.f32.xlu1 %v6152_v53  ;;  %v6114_v27 = vpop.xlane.xlu0 %6113 }
 0x7ca   : > { %v6132_v23 = vmul.f32 0.03125, %v6117_v60  ;;  %v6131_v21 = vmul.f32 0.03125, %v6114_v27  ;;  %v6146_v29 = vmul.f32 %v9067_v40, %v9067_v40 }
 0x7cc   : > { %v9072_v32 = vsub.f32 %v6097_v58, %v6132_v23  ;;  %v9074_v18 = vsub.f32 %v6096_v52, %v6131_v21  ;;  %v6158_v4 = vsel %vm246_vm0, %v6146_v29, 0.0  ;;  %v7578_v52 = vpack.c.bf16 %v6233_v42, %v6232_v5  ;;  %v6239_v58 = vld [vmem:[#allocation2 + $0xc0] sm:$0xff] }
 0x7cd   : > { %v6123_v43 = vpop.xlane.xlu1 %6122  ;;  %6159 = vadd.xlane.f32.xlu1 %v6158_v4  ;;  %v6120_v35 = vpop.xlane.xlu0 %6119  ;;  %v7590_v22 = vpack.c.bf16 %v6240_v59, %v6239_v58 }
 0x7ce   : > { %v6134_v9 = vmul.f32 0.03125, %v6123_v43  ;;  %v6133_v10 = vmul.f32 0.03125, %v6120_v35  ;;  %v6148_v55 = vmul.f32 %v9072_v32, %v9072_v32  ;;  %v6147_v54 = vmul.f32 %v9074_v18, %v9074_v18  ;;  %7579 = vmatprep.subr.bf16.mxu1 %v7578_v52 }
 0x7cf   : > { %7581 = vmatpush3.bf16.msra.mxu1 %v7578_v52  ;;  %7591 = vmatprep.subr.bf16.mxu0 %v7590_v22 }
 0x7d0   : > { %v9081_v8 = vsub.f32 %v6099_v14, %v6134_v9  ;;  %v9083_v45 = vsub.f32 %v6098_v6, %v6133_v10  ;;  %v6164_v36 = vsel %vm246_vm0, %v6148_v55, 0.0  ;;  %v6161_v50 = vsel %vm246_vm0, %v6147_v54, 0.0  ;;  %7583 = vmatprep.subr.bf16.mxu1 %v7582_v7  ;;  %v6242_v6 = vld [vmem:[#allocation2 + $0xd8] sm:$0xff]  ;;  %7593 = vmatpush3.bf16.msra.mxu0 %v7590_v22  ;;  %v6245_v14 = vld [vmem:[#allocation2 + $0xf0] sm:$0xff] }
 0x7d1   : > { %6165 = vadd.xlane.f32.xlu1 %v6164_v36  ;;  %6162 = vadd.xlane.f32.xlu0 %v6161_v50  ;;  %v6126_v49 = vpop.xlane.xlu0 %6125  ;;  %v7594_v11 = vpack.c.bf16 %v6242_v6, %v6241_v0  ;;  %v6928_v50 = vld [vmem:[#allocation2 + $0x3] ss:$0 sm:$0xff] }
 0x7d2   : > { %v6135_v51 = vmul.f32 0.03125, %v6126_v49  ;;  %v6150_v37 = vmul.f32 %v9081_v8, %v9081_v8  ;;  %v6149_v33 = vmul.f32 %v9083_v45, %v9083_v45 }
 0x7d3   : > { %7585 = vmatpush3.bf16.msra.mxu1 %v7582_v7  ;;  %7595 = vmatprep.subr.bf16.mxu0 %v7594_v11 }
 0x7d4   : > { %v9091_v30 = vsub.f32 %v6100_v19, %v6135_v51  ;;  %v6170_v47 = vsel %vm246_vm0, %v6150_v37, 0.0  ;;  %v6167_v16 = vsel %vm246_vm0, %v6149_v33, 0.0  ;;  %7597 = vmatpush3.bf16.msra.mxu0 %v7594_v11  ;;  %v7602_v19 = vpack.c.bf16 %v6246_v15, %v6245_v14 }
 0x7d5   : > { %6171 = vadd.xlane.f32.xlu1 %v6170_v47  ;;  %6168 = vadd.xlane.f32.xlu0 %v6167_v16 }
 0x7d6   : > { %v6151_v44 = vmul.f32 %v9091_v30, %v9091_v30  ;;  %7599 = vmatprep.subr.bf16.mxu0 %v7598_v13 }
 0x7d8   : > { %v6173_v20 = vsel %vm246_vm0, %v6151_v44, 0.0  ;;  %7601 = vmatpush3.bf16.msra.mxu0 %v7598_v13 }
 0x7d9   : > { %6174 = vadd.xlane.f32.xlu0 %v6173_v20  ;;  %7603 = vmatprep.subr.bf16.mxu0 %v7602_v19  ;;  %v6929_v20 = vld [vmem:[#allocation2 + $0x4] ss:$0 sm:$0xff] }
 0x7dc   : > { %7605 = vmatpush3.bf16.msra.mxu0 %v7602_v19 }
 0x7dd   : > { %7607 = vmatprep.subr.bf16.mxu0 %v7606_v39 }
 0x7e0   : > { %7609 = vmatpush3.bf16.msra.mxu0 %v7606_v39  ;;  %v6252_v39 = vld [vmem:[#allocation2 + $0x128] sm:$0xff] }
 0x7e1   : > { %7611 = vmatprep.subr.bf16.mxu0 %v7610_v25  ;;  %v7614_v46 = vpack.c.bf16 %v6252_v39, %v6251_v17 }
 0x7e4   : > { %7613 = vmatpush3.bf16.msra.mxu0 %v7610_v25 }
 0x7e5   : > { %7615 = vmatprep.subr.bf16.mxu0 %v7614_v46 }
 0x7e8   : > { %7617 = vmatpush3.bf16.msra.mxu0 %v7614_v46 }
 0x855   : > { %v6157_v38 = vpop.xlane.xlu0 %6156 }
 0x856   : > { %v6177_v48 = vmul.f32 0.03125, %v6157_v38  ;;  %v6154_v63 = vpop.xlane.xlu1 %6153 }
 0x857   : > { %v6176_v26 = vmul.f32 0.03125, %v6154_v63 }
 0x858   : > { %v6185_v61 = vadd.f32 1e-05, %v6177_v48 }
 0x859   : > { %v6184_v1 = vadd.f32 1e-05, %v6176_v26 }
 0x85a   : > { %7816 = vrsqrt.f32 %v6185_v61  ;;  %v6160_v53 = vpop.xlane.xlu1 %6159 }
 0x85b   : > { %7818 = vrsqrt.f32 %v6184_v1  ;;  %v6178_v60 = vmul.f32 0.03125, %v6160_v53 }
 0x85d   : > { %v6186_v27 = vadd.f32 1e-05, %v6178_v60 }
 0x85e   : > { %v6166_v23 = vpop.xlane.xlu1 %6165  ;;  %v6163_v21 = vpop.xlane.xlu0 %6162 }
 0x85f   : > { %7820 = vrsqrt.f32 %v6186_v27  ;;  %v6180_v29 = vmul.f32 0.03125, %v6166_v23  ;;  %v6179_v4 = vmul.f32 0.03125, %v6163_v21 }
 0x861   : > { %v6188_v43 = vadd.f32 1e-05, %v6180_v29  ;;  %v6187_v35 = vadd.f32 1e-05, %v6179_v4 }
 0x862   : > { %v6172_v9 = vpop.xlane.xlu1 %6171  ;;  %v6169_v10 = vpop.xlane.xlu0 %6168 }
 0x863   : > { %7822 = vrsqrt.f32 %v6188_v43  ;;  %v6182_v55 = vmul.f32 0.03125, %v6172_v9  ;;  %v6181_v54 = vmul.f32 0.03125, %v6169_v10 }
 0x864   : > { %v7817_v36 = vpop.eup %7816  ;;  %7824 = vrsqrt.f32 %v6187_v35 }
 0x865   : > { %v7819_v49 = vpop.eup %7818  ;;  %v6201_v51 = vmul.f32 %v7817_v36, %v9058_v62  ;;  %v6190_v37 = vadd.f32 1e-05, %v6182_v55  ;;  %v6189_v33 = vadd.f32 1e-05, %v6181_v54 }
 0x866   : > { %v6175_v47 = vpop.xlane.xlu0 %6174  ;;  %v6200_v16 = vmul.f32 %v7819_v49, %v9060_v2 }
 0x867   : > { %7826 = vrsqrt.f32 %v6190_v37  ;;  %v6183_v44 = vmul.f32 0.03125, %v6175_v47  ;;  %v6213_v5 = vmul.f32 %v6928_v50, %v6201_v51  ;;  %v6939_v51 = vld [vmem:[#allocation2 + $0x6] ss:$0 sm:$0xff] }
 0x868   : > { %7828 = vrsqrt.f32 %v6189_v33  ;;  %v6212_v42 = vmul.f32 %v6928_v50, %v6200_v16 }
 0x869   : > { %v7821_v52 = vpop.eup %7820  ;;  %v6191_v56 = vadd.f32 1e-05, %v6183_v44  ;;  %v9103_v34 = vadd.f32 %v6929_v20, %v6213_v5 }
 0x86a   : > { %v9100_v41 = vadd.f32 %v6929_v20, %v6212_v42  ;;  %v6202_v7 = vmul.f32 %v7821_v52, %v9067_v40 }
 0x86b   : > { %7830 = vrsqrt.f32 %v6191_v56 }
 0x86c   : > { %7506 = vmatprep.mubr.msk.f32.mxu1 %vm246_vm0, %v9100_v41  ;;  %v6214_v62 = vmul.f32 %v6928_v50, %v6202_v7 }
 0x86d   : > { %v7823_v2 = vpop.eup %7822  ;;  %7507 = vmatmul.mubr.msk.f32.vlgmr.msra.gmra.mrb[76].mxu1 %vm246_vm0, %v9103_v34 }
 0x86e   : > { %v7825_v3 = vpop.eup %7824  ;;  %v9109_v58 = vadd.f32 %v6929_v20, %v6214_v62  ;;  %v6204_v28 = vmul.f32 %v7823_v2, %v9072_v32 }
 0x86f   : > { %v6203_v59 = vmul.f32 %v7825_v3, %v9074_v18 }
 0x870   : > { %7509 = vmatprep.mubr.msk.f32.mxu1 %vm246_vm0, %v9109_v58  ;;  %v6216_v40 = vmul.f32 %v6928_v50, %v6204_v28 }
 0x871   : > { %v7827_v22 = vpop.eup %7826  ;;  %v6215_v0 = vmul.f32 %v6928_v50, %v6203_v59 }
 0x872   : > { %v7829_v6 = vpop.eup %7828  ;;  %v9115_v11 = vadd.f32 %v6929_v20, %v6216_v40  ;;  %v6206_v24 = vmul.f32 %v7827_v22, %v9081_v8 }
 0x873   : > { %v9118_v12 = vadd.f32 %v6929_v20, %v6215_v0  ;;  %v6205_v13 = vmul.f32 %v7829_v6, %v9083_v45 }
 0x874   : > { %v6218_v14 = vmul.f32 %v6928_v50, %v6206_v24 }
 0x875   : > { %v7831_v15 = vpop.eup %7830  ;;  %7510 = vmatmul.mubr.msk.f32.gmra.mrb[78].mxu1 %vm246_vm0, %v9118_v12  ;;  %v6217_v32 = vmul.f32 %v6928_v50, %v6205_v13 }
 0x876   : > { %7512 = vmatprep.mubr.msk.f32.mxu1 %vm246_vm0, %v9115_v11  ;;  %v9125_v18 = vadd.f32 %v6929_v20, %v6218_v14  ;;  %v6207_v19 = vmul.f32 %v7831_v15, %v9091_v30  ;;  %v6930_v30 = vld [vmem:[#allocation2 + $0x5] ss:$0 sm:$0xff] }
 0x877   : > { %v9128_v31 = vadd.f32 %v6929_v20, %v6217_v32 }
 0x878   : > { %v6219_v8 = vmul.f32 %v6928_v50, %v6207_v19 }
 0x879   : > { %7513 = vmatmul.mubr.msk.f32.gmra.mrb[80].mxu1 %vm246_vm0, %v9128_v31 }
 0x87a   : > { %7515 = vmatprep.mubr.msk.f32.mxu1 %vm246_vm0, %v9125_v18  ;;  %v9134_v45 = vadd.f32 %v6929_v20, %v6219_v8 }
 0x87d   : > { %7516 = vmatmul.mubr.msk.f32.gmra.mrb[82].mxu1 %vm246_vm0, %v9134_v45 }
 0x940   : > { %v7508_v57 = vpop.f32.mrb[76].mxu1 }
 0x941   : > { %v6354_v25 = vadd.f32 %v7508_v57, %v6930_v30  ;;  %v6348_v38 = vpop.f32.mrb[77].mxu1 }
 0x942   : > { %v6349_v48 = vadd.f32 %v6930_v30, %v6348_v38 }
 0x943   : > { %v6388_v26 = vmax.f32 %v6354_v25, 0.0 }
 0x944   : > { %v6387_v63 = vmax.f32 %v6349_v48, 0.0 }
 0x946   : > { %7550 = vmatprep.mubr.f32.mxu0 %v6387_v63 }
 0x947   : > { %7551 = vmatmul.mubr.f32.vlgmr.msra.gmra.mrb[68].mxu0 %v6388_v26 }
 0x948   : > { %v7511_v61 = vpop.f32.mrb[78].mxu1 }
 0x949   : > { %v6364_v1 = vadd.f32 %v7511_v61, %v6930_v30  ;;  %v6358_v53 = vpop.f32.mrb[79].mxu1 }
 0x94a   : > { %v6359_v60 = vadd.f32 %v6930_v30, %v6358_v53 }
 0x94b   : > { %v6390_v21 = vmax.f32 %v6364_v1, 0.0 }
 0x94c   : > { %v6389_v27 = vmax.f32 %v6359_v60, 0.0  ;;  %v7514_v23 = vpop.f32.mrb[80].mxu1 }
 0x94d   : > { %v6374_v29 = vadd.f32 %v7514_v23, %v6930_v30  ;;  %v6368_v4 = vpop.f32.mrb[81].mxu1 }
 0x94e   : > { %v6369_v43 = vadd.f32 %v6930_v30, %v6368_v4  ;;  %7553 = vmatprep.mubr.f32.mxu0 %v6389_v27 }
 0x94f   : > { %7554 = vmatmul.mubr.f32.gmra.mrb[70].mxu0 %v6390_v21  ;;  %v6392_v10 = vmax.f32 %v6374_v29, 0.0 }
 0x950   : > { %v6391_v35 = vmax.f32 %v6369_v43, 0.0  ;;  %v7517_v9 = vpop.f32.mrb[82].mxu1 }
 0x951   : > { %v6384_v55 = vadd.f32 %v7517_v9, %v6930_v30  ;;  %v6378_v54 = vpop.f32.mrb[83].mxu1 }
 0x952   : > { %v6379_v36 = vadd.f32 %v6930_v30, %v6378_v54  ;;  %7556 = vmatprep.mubr.f32.mxu0 %v6391_v35 }
 0x953   : > { %7557 = vmatmul.mubr.f32.gmra.mrb[72].mxu0 %v6392_v10  ;;  %v6394_v49 = vmax.f32 %v6384_v55, 0.0 }
 0x954   : > { %v6393_v50 = vmax.f32 %v6379_v36, 0.0 }
 0x956   : > { %7559 = vmatprep.mubr.f32.mxu0 %v6393_v50 }
 0x957   : > { %7560 = vmatmul.mubr.f32.gmra.mrb[74].mxu0 %v6394_v49 }
 0xa1a   : > { %v7552_v37 = vpop.f32.mrb[68].mxu0 }
 0xa1b   : > { %v6471_v33 = vadd.f32 %v7552_v37, %v6939_v51  ;;  %v6465_v47 = vpop.f32.mrb[69].mxu0 }
 0xa1c   : > { %v6466_v16 = vadd.f32 %v6939_v51, %v6465_v47 }
 0xa1d   : > { %v6505_v44 = vadd.f32 %v6471_v33, %v9103_v34 }
 0xa1e   : > { %v6504_v20 = vadd.f32 %v6466_v16, %v9100_v41 }
 0xa1f   : > { %v6517_v5 = vsel %vm246_vm0, %v6505_v44, 0.0 }
 0xa20   : > { %6518 = vadd.xlane.f32.xlu0 %v6517_v5  ;;  %v6514_v42 = vsel %vm246_vm0, %v6504_v20, 0.0 }
 0xa21   : > { %6515 = vadd.xlane.f32.xlu1 %v6514_v42 }
 0xa22   : > { %v7555_v52 = vpop.f32.mrb[70].mxu0 }
 0xa23   : > { %v6481_v56 = vadd.f32 %v7555_v52, %v6939_v51  ;;  %v6475_v7 = vpop.f32.mrb[71].mxu0 }
 0xa24   : > { %v6476_v62 = vadd.f32 %v6939_v51, %v6475_v7 }
 0xa25   : > { %v6507_v2 = vadd.f32 %v6481_v56, %v9118_v12 }
 0xa26   : > { %v6506_v3 = vadd.f32 %v6476_v62, %v9109_v58  ;;  %v7558_v28 = vpop.f32.mrb[72].mxu0 }
 0xa27   : > { %v6491_v59 = vadd.f32 %v7558_v28, %v6939_v51  ;;  %v6485_v40 = vpop.f32.mrb[73].mxu0  ;;  %v6523_v34 = vsel %vm246_vm0, %v6507_v2, 0.0 }
 0xa28   : > { %v6486_v41 = vadd.f32 %v6939_v51, %v6485_v40  ;;  %6524 = vadd.xlane.f32.xlu0 %v6523_v34  ;;  %v6520_v22 = vsel %vm246_vm0, %v6506_v3, 0.0 }
 0xa29   : > { %v6509_v0 = vadd.f32 %v6491_v59, %v9128_v31  ;;  %6521 = vadd.xlane.f32.xlu1 %v6520_v22 }
 0xa2a   : > { %v6508_v6 = vadd.f32 %v6486_v41, %v9115_v11  ;;  %v7561_v24 = vpop.f32.mrb[74].mxu0 }
 0xa2b   : > { %v6501_v13 = vadd.f32 %v7561_v24, %v6939_v51  ;;  %v6495_v14 = vpop.f32.mrb[75].mxu0  ;;  %v6529_v12 = vsel %vm246_vm0, %v6509_v0, 0.0 }
 0xa2c   : > { %v6496_v58 = vadd.f32 %v6939_v51, %v6495_v14  ;;  %6530 = vadd.xlane.f32.xlu0 %v6529_v12  ;;  %v6526_v15 = vsel %vm246_vm0, %v6508_v6, 0.0 }
 0xa2d   : > { %v6511_v32 = vadd.f32 %v6501_v13, %v9134_v45  ;;  %6527 = vadd.xlane.f32.xlu1 %v6526_v15 }
 0xa2e   : > { %v6510_v19 = vadd.f32 %v6496_v58, %v9125_v18  ;;  %v6940_v58 = vld [vmem:[#allocation2 + $0x7] ss:$0 sm:$0xff] }
 0xa2f   : > { %v6535_v8 = vsel %vm246_vm0, %v6511_v32, 0.0 }
 0xa30   : > { %6536 = vadd.xlane.f32.xlu0 %v6535_v8  ;;  %v6532_v31 = vsel %vm246_vm0, %v6510_v19, 0.0 }
 0xa31   : > { %6533 = vadd.xlane.f32.xlu1 %v6532_v31 }
 0xaad   : > { %v6519_v11 = vpop.xlane.xlu0 %6518 }
 0xaae   : > { %v6539_v17 = vmul.f32 0.03125, %v6519_v11  ;;  %v6516_v39 = vpop.xlane.xlu1 %6515 }
 0xaaf   : > { %v6538_v46 = vmul.f32 0.03125, %v6516_v39 }
 0xab0   : > { %v9154_v30 = vsub.f32 %v6505_v44, %v6539_v17  ;;  %v6941_v17 = vld [vmem:[#allocation2 + $0x8] ss:$0 sm:$0xff] }
 0xab1   : > { %v9156_v57 = vsub.f32 %v6504_v20, %v6538_v46 }
 0xab2   : > { %v6555_v45 = vmul.f32 %v9154_v30, %v9154_v30 }
 0xab3   : > { %v6554_v18 = vmul.f32 %v9156_v57, %v9156_v57 }
 0xab4   : > { %v6565_v25 = vsel %vm246_vm0, %v6555_v45, 0.0 }
 0xab5   : > { %v6525_v38 = vpop.xlane.xlu0 %6524  ;;  %6566 = vadd.xlane.f32.xlu0 %v6565_v25  ;;  %v6562_v48 = vsel %vm246_vm0, %v6554_v18, 0.0  ;;  %v6942_v25 = vld [vmem:[#allocation2 + $0x9] ss:$0 sm:$0xff] }
 0xab6   : > { %v6541_v63 = vmul.f32 0.03125, %v6525_v38  ;;  %v6522_v26 = vpop.xlane.xlu1 %6521  ;;  %6563 = vadd.xlane.f32.xlu1 %v6562_v48 }
 0xab7   : > { %v6540_v61 = vmul.f32 0.03125, %v6522_v26 }
 0xab8   : > { %v9164_v1 = vsub.f32 %v6507_v2, %v6541_v63 }
 0xab9   : > { %v9166_v53 = vsub.f32 %v6506_v3, %v6540_v61  ;;  %v6531_v60 = vpop.xlane.xlu0 %6530 }
 0xaba   : > { %v6543_v27 = vmul.f32 0.03125, %v6531_v60  ;;  %v6528_v23 = vpop.xlane.xlu1 %6527  ;;  %v6557_v21 = vmul.f32 %v9164_v1, %v9164_v1 }
 0xabb   : > { %v6542_v29 = vmul.f32 0.03125, %v6528_v23  ;;  %v6556_v4 = vmul.f32 %v9166_v53, %v9166_v53 }
 0xabc   : > { %v9172_v43 = vsub.f32 %v6509_v0, %v6543_v27  ;;  %v6571_v35 = vsel %vm246_vm0, %v6557_v21, 0.0 }
 0xabd   : > { %v9175_v9 = vsub.f32 %v6508_v6, %v6542_v29  ;;  %6572 = vadd.xlane.f32.xlu0 %v6571_v35  ;;  %v6537_v10 = vpop.xlane.xlu0 %6536  ;;  %v6568_v55 = vsel %vm246_vm0, %v6556_v4, 0.0 }
 0xabe   : > { %v6545_v54 = vmul.f32 0.03125, %v6537_v10  ;;  %6569 = vadd.xlane.f32.xlu1 %v6568_v55  ;;  %v6534_v36 = vpop.xlane.xlu1 %6533  ;;  %v6559_v50 = vmul.f32 %v9172_v43, %v9172_v43 }
 0xabf   : > { %v6544_v49 = vmul.f32 0.03125, %v6534_v36  ;;  %v6558_v51 = vmul.f32 %v9175_v9, %v9175_v9 }
 0xac0   : > { %v9182_v37 = vsub.f32 %v6511_v32, %v6545_v54  ;;  %v6577_v33 = vsel %vm246_vm0, %v6559_v50, 0.0 }
 0xac1   : > { %v9185_v47 = vsub.f32 %v6510_v19, %v6544_v49  ;;  %6578 = vadd.xlane.f32.xlu0 %v6577_v33  ;;  %v6574_v16 = vsel %vm246_vm0, %v6558_v51, 0.0 }
 0xac2   : > { %6575 = vadd.xlane.f32.xlu1 %v6574_v16  ;;  %v6561_v44 = vmul.f32 %v9182_v37, %v9182_v37 }
 0xac3   : > { %v6560_v20 = vmul.f32 %v9185_v47, %v9185_v47 }
 0xac4   : > { %v6583_v5 = vsel %vm246_vm0, %v6561_v44, 0.0 }
 0xac5   : > { %6584 = vadd.xlane.f32.xlu0 %v6583_v5  ;;  %v6580_v42 = vsel %vm246_vm0, %v6560_v20, 0.0 }
 0xac6   : > { %6581 = vadd.xlane.f32.xlu1 %v6580_v42 }
 0xb42   : > { %v6567_v52 = vpop.xlane.xlu0 %6566 }
 0xb43   : > { %v6587_v56 = vmul.f32 0.03125, %v6567_v52  ;;  %v6564_v7 = vpop.xlane.xlu1 %6563 }
 0xb44   : > { %v6586_v62 = vmul.f32 0.03125, %v6564_v7 }
 0xb45   : > { %v6595_v2 = vadd.f32 1e-05, %v6587_v56 }
 0xb46   : > { %v6594_v3 = vadd.f32 1e-05, %v6586_v62 }
 0xb47   : > { %7832 = vrsqrt.f32 %v6595_v2 }
 0xb48   : > { %7834 = vrsqrt.f32 %v6594_v3 }
 0xb4a   : > { %v6573_v28 = vpop.xlane.xlu0 %6572 }
 0xb4b   : > { %v6589_v59 = vmul.f32 0.03125, %v6573_v28  ;;  %v6570_v40 = vpop.xlane.xlu1 %6569 }
 0xb4c   : > { %v6588_v34 = vmul.f32 0.03125, %v6570_v40 }
 0xb4d   : > { %v6597_v41 = vadd.f32 1e-05, %v6589_v59 }
 0xb4e   : > { %v6596_v22 = vadd.f32 1e-05, %v6588_v34  ;;  %v6579_v0 = vpop.xlane.xlu0 %6578 }
 0xb4f   : > { %7836 = vrsqrt.f32 %v6597_v41  ;;  %v6591_v6 = vmul.f32 0.03125, %v6579_v0  ;;  %v6576_v24 = vpop.xlane.xlu1 %6575 }
 0xb50   : > { %7838 = vrsqrt.f32 %v6596_v22  ;;  %v6590_v13 = vmul.f32 0.03125, %v6576_v24  ;;  %v6943_v22 = vld [vmem:[#allocation2 + $0xa] ss:$0 sm:$0xff] }
 0xb51   : > { %v7833_v14 = vpop.eup %7832  ;;  %v6599_v12 = vadd.f32 1e-05, %v6591_v6 }
 0xb52   : > { %v7835_v15 = vpop.eup %7834  ;;  %v6598_v32 = vadd.f32 1e-05, %v6590_v13  ;;  %v6585_v19 = vpop.xlane.xlu0 %6584  ;;  %v6611_v8 = vmul.f32 %v7833_v14, %v9154_v30 }
 0xb53   : > { %7840 = vrsqrt.f32 %v6599_v12  ;;  %v6593_v31 = vmul.f32 0.03125, %v6585_v19  ;;  %v6582_v11 = vpop.xlane.xlu1 %6581  ;;  %v6610_v39 = vmul.f32 %v7835_v15, %v9156_v57 }
 0xb54   : > { %7842 = vrsqrt.f32 %v6598_v32  ;;  %v6592_v46 = vmul.f32 0.03125, %v6582_v11  ;;  %v6623_v45 = vmul.f32 %v6940_v58, %v6611_v8 }
 0xb55   : > { %v6601_v18 = vadd.f32 1e-05, %v6593_v31  ;;  %v6622_v38 = vmul.f32 %v6940_v58, %v6610_v39 }
 0xb56   : > { %v6600_v48 = vadd.f32 1e-05, %v6592_v46  ;;  %v6635_v63 = vadd.f32 %v6941_v17, %v6623_v45 }
 0xb57   : > { %7844 = vrsqrt.f32 %v6601_v18  ;;  %v6634_v26 = vadd.f32 %v6941_v17, %v6622_v38 }
 0xb58   : > { %7846 = vrsqrt.f32 %v6600_v48  ;;  %v6649_v61 = vmul.f32 %v6942_v25, %v6635_v63 }
 0xb59   : > { %v7837_v60 = vpop.eup %7836  ;;  %v6648_v30 = vmul.f32 %v6942_v25, %v6634_v26 }
 0xb5a   : > { %v7839_v27 = vpop.eup %7838  ;;  %v6659_v23 = vsel %vm246_vm0, %v6649_v61, 0.0  ;;  %v6613_v21 = vmul.f32 %v7837_v60, %v9164_v1 }
 0xb5b   : > { %6660 = vadd.xlane.f32.xlu0 %v6659_v23  ;;  %v6656_v57 = vsel %vm246_vm0, %v6648_v30, 0.0  ;;  %v6612_v29 = vmul.f32 %v7839_v27, %v9166_v53 }
 0xb5c   : > { %6657 = vadd.xlane.f32.xlu1 %v6656_v57  ;;  %v6625_v4 = vmul.f32 %v6940_v58, %v6613_v21 }
 0xb5d   : > { %v7841_v35 = vpop.eup %7840  ;;  %v6624_v10 = vmul.f32 %v6940_v58, %v6612_v29 }
 0xb5e   : > { %v7843_v55 = vpop.eup %7842  ;;  %v6637_v54 = vadd.f32 %v6941_v17, %v6625_v4  ;;  %v6615_v36 = vmul.f32 %v7841_v35, %v9172_v43 }
 0xb5f   : > { %v6636_v50 = vadd.f32 %v6941_v17, %v6624_v10  ;;  %v6614_v49 = vmul.f32 %v7843_v55, %v9175_v9 }
 0xb60   : > { %v6651_v51 = vmul.f32 %v6942_v25, %v6637_v54  ;;  %v6627_v33 = vmul.f32 %v6940_v58, %v6615_v36 }
 0xb61   : > { %v7845_v16 = vpop.eup %7844  ;;  %v6650_v1 = vmul.f32 %v6942_v25, %v6636_v50  ;;  %v6626_v44 = vmul.f32 %v6940_v58, %v6614_v49 }
 0xb62   : > { %v7847_v20 = vpop.eup %7846  ;;  %v6665_v5 = vsel %vm246_vm0, %v6651_v51, 0.0  ;;  %v6639_v53 = vadd.f32 %v6941_v17, %v6627_v33  ;;  %v6617_v42 = vmul.f32 %v7845_v16, %v9182_v37 }
 0xb63   : > { %6666 = vadd.xlane.f32.xlu0 %v6665_v5  ;;  %v6662_v52 = vsel %vm246_vm0, %v6650_v1, 0.0  ;;  %v6638_v56 = vadd.f32 %v6941_v17, %v6626_v44  ;;  %v6616_v43 = vmul.f32 %v7847_v20, %v9185_v47 }
 0xb64   : > { %6663 = vadd.xlane.f32.xlu1 %v6662_v52  ;;  %v6653_v7 = vmul.f32 %v6942_v25, %v6639_v53  ;;  %v6629_v9 = vmul.f32 %v6940_v58, %v6617_v42 }
 0xb65   : > { %v6652_v62 = vmul.f32 %v6942_v25, %v6638_v56  ;;  %v6628_v2 = vmul.f32 %v6940_v58, %v6616_v43 }
 0xb66   : > { %v6671_v3 = vsel %vm246_vm0, %v6653_v7, 0.0  ;;  %v6641_v28 = vadd.f32 %v6941_v17, %v6629_v9 }
 0xb67   : > { %6672 = vadd.xlane.f32.xlu0 %v6671_v3  ;;  %v6668_v59 = vsel %vm246_vm0, %v6652_v62, 0.0  ;;  %v6640_v40 = vadd.f32 %v6941_v17, %v6628_v2 }
 0xb68   : > { %6669 = vadd.xlane.f32.xlu1 %v6668_v59  ;;  %v6655_v37 = vmul.f32 %v6942_v25, %v6641_v28 }
 0xb69   : > { %v6654_v34 = vmul.f32 %v6942_v25, %v6640_v40 }
 0xb6a   : > { %v6677_v41 = vsel %vm246_vm0, %v6655_v37, 0.0 }
 0xb6b   : > { %6678 = vadd.xlane.f32.xlu0 %v6677_v41  ;;  %v6674_v47 = vsel %vm246_vm0, %v6654_v34, 0.0 }
 0xb6c   : > { %6675 = vadd.xlane.f32.xlu1 %v6674_v47 }
 0xbe8   : > { %v6661_v0 = vpop.xlane.xlu0 %6660 }
 0xbe9   : > { %v6685_v6 = vadd.f32 %v6943_v22, %v6661_v0  ;;  %v6658_v24 = vpop.xlane.xlu1 %6657 }
 0xbea   : > { %v6684_v13 = vadd.f32 %v6943_v22, %v6658_v24 }
 0xbeb   : > { %v6693_v14 = vmax.f32 %v6685_v6, 0.0 }
 0xbec   : > { %v6692_v12 = vmax.f32 %v6684_v13, 0.0 }
 0xbed   : > { %6707 = vperm.xlu0 %7686, %v6693_v14  }
 0xbee   : > { %6702 = vperm.xlu1 %7687, %v6692_v12  }
 0xbf0   : > { %v6667_v58 = vpop.xlane.xlu0 %6666 }
 0xbf1   : > { %v6687_v15 = vadd.f32 %v6943_v22, %v6667_v58  ;;  %v6664_v32 = vpop.xlane.xlu1 %6663 }
 0xbf2   : > { %v6686_v8 = vadd.f32 %v6943_v22, %v6664_v32 }
 0xbf3   : > { %v6695_v19 = vmax.f32 %v6687_v15, 0.0 }
 0xbf4   : > { %v6673_v31 = vpop.xlane.xlu0 %6672  ;;  %v6694_v39 = vmax.f32 %v6686_v8, 0.0 }
 0xbf5   : > { %v6670_v11 = vpop.xlane.xlu1 %6669  ;;  %6717 = vperm.xlu1 %7687, %v6695_v19   ;;  %v6689_v46 = vadd.f32 %v6943_v22, %v6673_v31 }
 0xbf6   : > { %v6688_v17 = vadd.f32 %v6943_v22, %v6670_v11 }
 0xbf7   : > { %v6697_v48 = vmax.f32 %v6689_v46, 0.0 }
 0xbf8   : > { %v6696_v45 = vmax.f32 %v6688_v17, 0.0  ;;  %v6679_v18 = vpop.xlane.xlu0 %6678 }
 0xbf9   : > { %v6676_v25 = vpop.xlane.xlu1 %6675  ;;  %6712 = vperm.xlu1 %7687, %v6694_v39   ;;  %v6691_v63 = vadd.f32 %v6943_v22, %v6679_v18 }
 0xbfa   : > { %v6690_v38 = vadd.f32 %v6943_v22, %v6676_v25  ;;  %6722 = vperm.xlu0 %7686, %v6696_v45  }
 0xbfb   : > { %v6699_v61 = vmax.f32 %v6691_v63, 0.0 }
 0xbfc   : > { %v6698_v26 = vmax.f32 %v6690_v38, 0.0 }
 0xbfd   : > { %6727 = vperm.xlu1 %7687, %v6697_v48  }
 0xbfe   : > { %6732 = vperm.xlu0 %7686, %v6698_v26  }
 0xc01   : > { %6737 = vperm.xlu1 %7687, %v6699_v61  }
 0xc6c   : > { %v6708_v60 = vpop.permute.xlu0 %6707 }
 0xc6d   : > { %6741 = vst [vmem:[%s152_s5 + $0x8] sm:$0xff] %v6708_v60  ;;  %v6703_v30 = vpop.permute.xlu1 %6702 }
 0xc6e   : > { %6740 = vst [vmem:[%s152_s5] sm:$0xff] %v6703_v30 }
 0xc74   : > { %v6718_v27 = vpop.permute.xlu1 %6717 }
 0xc75   : > { %6743 = vst [vmem:[%s152_s5 + $0x18] sm:$0xff] %v6718_v27 }
 0xc78   : > { %v6713_v23 = vpop.permute.xlu1 %6712 }
 0xc79   : > { %6742 = vst [vmem:[%s152_s5 + $0x10] sm:$0xff] %v6713_v23  ;;  %v6723_v21 = vpop.permute.xlu0 %6722 }
 0xc7a   : > { %6744 = vst [vmem:[%s152_s5 + $0x20] sm:$0xff] %v6723_v21 }
 0xc7c   : > { %v6728_v57 = vpop.permute.xlu1 %6727 }
 0xc7d   : > { %6745 = vst [vmem:[%s152_s5 + $0x28] sm:$0xff] %v6728_v57  ;;  %v6733_v29 = vpop.permute.xlu0 %6732 }
 0xc7e   : > { %6746 = vst [vmem:[%s152_s5 + $0x30] sm:$0xff] %v6733_v29 }
 0xc80   : > { %v6738_v4 = vpop.permute.xlu1 %6737 }
 0xc81   : > { %6747 = vst [vmem:[%s152_s5 + $0x38] sm:$0xff] %v6738_v4 }
 0xc82   : > { %7889 = shalt.err (!%p7886_p7)
}
 0xc83   : > { %s7890_s24 = scalar_lea.hbm %s9217_s16, 1024  ;;  %s7894_s27 = scalar_lea.hbm %s9263_s2, 2048 }
 0xc84   : > { %p7891_p8 = scmp.ne.s32.totalorder %s9217_s16, %s7890_s24  ;;  %p7895_p1 = scmp.lt.u32.totalorder %s9217_s16, %s9263_s2 }
 0xc85   : > { %p7896_p0 = scmp.lt.u32.totalorder %s7894_s27, %s7890_s24  ;;  %p7898_p6 = scmp.lt.u32.totalorder %s7890_s24, %s9217_s16 }
 0xc86   : > { %p7892_p11 = pnand %p7891_p8, %p9325_p9 }
 0xc87   : > { %p7897_p5 = por %p7896_p0, %p7895_p1 }
 0xc88   : > { %p7893_p13 = pneg %p7892_p11 }
 0xc89   : > { %p7899_p10 = por %p7898_p6, %p7897_p5 }
 0xc8b   : > { %p7900_p12 = pnand %p7899_p10, %p7893_p13 }
 0xc8d   : > { %7903 = shalt.err (!%p7900_p12)
}
 0xc8e   : > { %s7959_s3 = smov 128  }
 0xc8f   : > { %7626 = dma.vmem_to_hbm [thread:$0]  (%p9325_p9), %s9212_s6, 1024, %s9217_s16, %s9219_s17, %s7959_s3, %s7959_s3, %s7955_s28  }
 0xc90 PF: > { %p7638_p2 = scmp.ge.s32.totalorder %s7942_s12, 2  ;;  %s6777_s4 = sand.u32 1, %s7930_s9  }
 0xc91   : > { %p9326_p3 = scmp.ne.s32.totalorder %s9278_s20, 0  ;;  %s6778_s5 = scalar_lea.sflag [#allocation4], %s6777_s4 }
 0xc93   : > { %p7633_p4 = pnand %p7638_p2, %p9326_p3 }
 0xc95   : > { %7925 = dma.done.wait (!%p7633_p4), %s6778_s5, 1024  }
 0xc96   : > { %7927 = vsyncadd (!%p7633_p4), %s6778_s5, 4294966272  ;;  %p13_p7 = scmp.ge.s32.totalorder %s8000_s15, 4   ;;  %s9327_s9 = smov %s7934_s10 }
 0xc97   : > { %s9328_s10 = smov %s7938_s11  ;;  %s9329_s11 = smov %s8011_s18 }
 0xc98   : > { %s9330_s12 = smov %s8000_s15  ;;  %15 = sbr.rel (!%p13_p7) target bundleno = 4 (0x4), region = 68 }
 0xc9f   :  { %6783 = vsyncpa [#allocation3], 1 }
 0xca0   :  { %6785 = vsyncpa [#allocation3 + $0x1], 1 }
 0xca1   :  { %6786 = vsyncpa [#allocation4], 1 }
 0xca2   :  { %6788 = vsyncpa [#allocation4 + $0x1], 1 }

</bundles_post_ra>
